<compile_context>
chip_gen: v7x
topology: tpu7x:2x2x1
jax: 0.10.0
libtpu: 0.0.40
codegen_flags: <defaults>
</compile_context>

<pallas_src>
import jax
import jax.numpy as jnp
from jax import lax
from jax.experimental import pallas as pl
from jax.experimental.pallas import tpu as pltpu

H = W = 32                 # DVC reshapes inputs to 3x32x32
C_IN, C1, C2, N_CLS = 3, 16, 32, 10
W2_OUT = 16                # conv2 output width (stride 2)
N_PAD = 128                # lane-padded logits width

K1 = 3 * W * C_IN          # 288  (three row taps along K for conv1)
D1 = W * C1                # 512  (conv1 output lanes: w*16 + c)
K2 = 3 * D1                # 1536 (three row taps along K for conv2)
D2 = W2_OUT * C2           # 512  (conv2 output lanes: w*32 + c)

H1_OFF = 16                # h1 row offset inside the padded bf16 scratch
PAD_ROWS = 64              # scratch rows per image (16-aligned for bf16)


# ----------------------------------------------------------------------------
# Fused forward kernel: conv1 -> conv2 -> GAP -> fc, G images per grid step
# ----------------------------------------------------------------------------
def _fused_net_kernel(x_ref, w1_ref, b1_ref, w2_ref, b2_ref, wh_ref, bh_ref,
                      o_ref, h1p_ref):
    G = x_ref.shape[0]

    # ---- conv1: 3x3 s1 p1, 3->16, all three row taps fused along K ---------
    # x_ref block: [G, 34, 96] f32 (rows 0/33 are the zero row padding,
    # lane index = w*3 + c).  Tap kh reads padded rows kh .. kh+31.
    a1 = jnp.concatenate(
        [x_ref[:, pl.ds(kh, H), :].astype(jnp.bfloat16) for kh in range(3)],
        axis=-1).reshape(G * H, K1)                              # [G*32, 288]
    h1 = jnp.maximum(
        jnp.dot(a1, w1_ref[...], preferred_element_type=jnp.float32)
        + b1_ref[...], 0.0)                                      # [G*32, 512]

    # bf16 zero-row-padded copy of h1 so conv2 row taps can read rows -1..32
    # per image.  Main store is 16-row aligned; only pad rows 15 / 48 (the
    # two rows the taps actually read) are zeroed, every step (no program_id
    # gating -> safe under the "parallel" megacore split).
    h1p_ref[:, pl.ds(H1_OFF, H), :] = (
        h1.astype(jnp.bfloat16).reshape(G, H, D1))
    zrow = jnp.zeros((G, 1, D1), jnp.bfloat16)
    h1p_ref[:, pl.ds(H1_OFF - 1, 1), :] = zrow       # row -1  (tap kh=0)
    h1p_ref[:, pl.ds(H1_OFF + H, 1), :] = zrow       # row 32  (tap kh=2)

    # ---- conv2: 3x3 s2 p1, 16->32, taps fused along K ----------------------
    # Width taps + width stride-2 decimation live inside the banded weight;
    # rows are computed at stride 1 (even rows are exactly the s2 outputs).
    a2 = jnp.concatenate(
        [h1p_ref[:, pl.ds(H1_OFF - 1 + kh, H), :] for kh in range(3)],
        axis=-1).reshape(G * H, K2)                              # [G*32, 1536]
    h2 = jnp.maximum(
        jnp.dot(a2, w2_ref[...], preferred_element_type=jnp.float32)
        + b2_ref[...], 0.0)                                      # [G*32, 512]

    # ---- global average pool (even rows only) fused with the fc head -------
    h2 = h2.reshape(G, H, D2)
    row = lax.broadcasted_iota(jnp.int32, h2.shape, 1)
    pooled = jnp.sum(jnp.where(row % 2 == 0, h2, 0.0), axis=1)   # [G, 512]
    # whead already contains (sum over width / 256) folded into the fc weight.
    logits = jnp.dot(pooled.astype(jnp.bfloat16), wh_ref[...],
                     preferred_element_type=jnp.float32) + bh_ref[...]
    o_ref[...] = logits.astype(o_ref.dtype)                      # [G, 128]


def fused_net_forward(params, x):
    """x: [B, 3, 32, 32] f32 -> logits [B, 10] f32."""
    B = x.shape[0]
    # NCHW -> NHWC -> [B, 32, 32*3]; add the conv1 row zero-padding (tiny).
    # TODO(synk): the row pad could move in-kernel (perf-review item 7); kept
    # wrapper-side for lowering simplicity (a few KiB per image).
    xr = jnp.transpose(x, (0, 2, 3, 1)).reshape(B, H, W * C_IN)
    xp = jnp.pad(xr, ((0, 0), (1, 1), (0, 0)))                   # [B, 34, 96]

    # Images per grid step: whole batch if small, else 8 (pad batch to 8k).
    if B <= 8:
        G = B
    else:
        G = 8
        rem = B % G
        if rem:
            xp = jnp.pad(xp, ((0, G - rem), (0, 0), (0, 0)))
    Bp = xp.shape[0]

    flops_per_img = 2 * H * (K1 * D1 + K2 * D2) + 2 * D2 * N_PAD
    cost = pl.CostEstimate(
        flops=Bp * flops_per_img,
        transcendentals=0,
        bytes_accessed=(Bp * ((H + 2) * W * C_IN * 4 + N_PAD * 4)
                        + 2 * (K1 * D1 + K2 * D2 + D2 * N_PAD)
                        + 4 * (D1 + D2 + N_PAD)))

    out = pl.pallas_call(
        _fused_net_kernel,
        out_shape=jax.ShapeDtypeStruct((Bp, N_PAD), jnp.float32),
        grid=(Bp // G,),
        in_specs=[
            pl.BlockSpec((G, H + 2, W * C_IN), lambda b: (b, 0, 0)),  # images
            pl.BlockSpec((K1, D1), lambda b: (0, 0)),                 # w1k
            pl.BlockSpec((1, D1), lambda b: (0, 0)),                  # b1
            pl.BlockSpec((K2, D2), lambda b: (0, 0)),                 # w2k
            pl.BlockSpec((1, D2), lambda b: (0, 0)),                  # b2
            pl.BlockSpec((D2, N_PAD), lambda b: (0, 0)),              # whead
            pl.BlockSpec((1, N_PAD), lambda b: (0, 0)),               # bhead
        ],
        out_specs=pl.BlockSpec((G, N_PAD), lambda b: (b, 0)),
        scratch_shapes=[pltpu.VMEM((G, PAD_ROWS, D1), jnp.bfloat16)],
        compiler_params=pltpu.CompilerParams(
            dimension_semantics=("parallel",)),
        cost_estimate=cost,
    )(xp, params["w1k"], params["b1"], params["w2k"], params["b2"],
      params["whead"], params["bhead"])

    return out[:B, :N_CLS]


_forward_jit = jax.jit(fused_net_forward)


def net_forward(params, x, t=0):
    # Net.forward: output, _, _, _ = self.net(x); return output
    del t
    return _forward_jit(params, x)

# TODO(synk): Net.observe (replay buffer, augmentations, agmax/CE losses, SGD
# step) is training-only logic with no forward-pass Pallas equivalent.


# ----------------------------------------------------------------------------
# Deterministic synthetic backbone parameters + one-time kernel-operand prep
# ----------------------------------------------------------------------------
def init_params(key):
    ks = jax.random.split(key, 6)
    s1 = 1.0 / jnp.sqrt(3.0 * 3.0 * C_IN)
    s2 = 1.0 / jnp.sqrt(3.0 * 3.0 * C1)
    s3 = 1.0 / jnp.sqrt(float(C2))
    return {
        # conv weights in (kh, kw, cin, cout) layout.
        # TODO(synk): real PyTorch conv weights [cout,cin,kh,kw] must be
        # permuted with w.transpose(2,3,1,0) before prepare_params.
        "w1": jax.random.normal(ks[0], (3, 3, C_IN, C1), jnp.float32) * s1,
        "b1": jax.random.normal(ks[1], (C1,), jnp.float32) * s1,
        "w2": jax.random.normal(ks[2], (3, 3, C1, C2), jnp.float32) * s2,
        "b2": jax.random.normal(ks[3], (C2,), jnp.float32) * s2,
        "wfc": jax.random.normal(ks[4], (C2, N_CLS), jnp.float32) * s3,
        "bfc": jax.random.normal(ks[5], (N_CLS,), jnp.float32) * s3,
    }


def _band(n_out, n_in, kw, stride):
    """[n_in, n_out] 0/1 matrix: input col jc feeds output col jo via tap kw."""
    jc = jnp.arange(n_in)[:, None]
    jo = jnp.arange(n_out)[None, :]
    return (jc == stride * jo + kw - 1).astype(jnp.float32)


def prepare_params(p):
    """Expand convs into K-stacked banded weights, fold pool+fc, pad lanes."""
    w1_taps = [
        sum(jnp.kron(_band(W, W, kw, 1), p["w1"][kh, kw]) for kw in range(3))
        for kh in range(3)]                                  # 3 x [96, 512]
    w1k = jnp.concatenate(w1_taps, axis=0)                   # [288, 512]
    w2_taps = [
        sum(jnp.kron(_band(W2_OUT, W, kw, 2), p["w2"][kh, kw])
            for kw in range(3))
        for kh in range(3)]                                  # 3 x [512, 512]
    w2k = jnp.concatenate(w2_taps, axis=0)                   # [1536, 512]
    whead = jnp.tile(p["wfc"] / float(W2_OUT * W2_OUT), (W2_OUT, 1))
    whead = jnp.pad(whead, ((0, 0), (0, N_PAD - N_CLS)))     # [512, 128]
    bhead = jnp.pad(p["bfc"], (0, N_PAD - N_CLS)).reshape(1, N_PAD)
    return {
        "w1k": w1k.astype(jnp.bfloat16),
        "b1": jnp.tile(p["b1"], W).reshape(1, D1).astype(jnp.float32),
        "w2k": w2k.astype(jnp.bfloat16),
        "b2": jnp.tile(p["b2"], W2_OUT).reshape(1, D2).astype(jnp.float32),
        "whead": whead.astype(jnp.bfloat16),
        "bhead": bhead.astype(jnp.float32),
    }


# ----------------------------------------------------------------------------
# Pure-JAX reference of the same backbone (for a structural sanity check)
# ----------------------------------------------------------------------------
def reference_forward(p, x):
    dn = ("NCHW", "OIHW", "NCHW")
    w1 = jnp.transpose(p["w1"], (3, 2, 0, 1))
    w2 = jnp.transpose(p["w2"], (3, 2, 0, 1))
    h = lax.conv_general_dilated(x, w1, (1, 1), [(1, 1), (1, 1)],
                                 dimension_numbers=dn,
                                 precision=lax.Precision.HIGHEST)
    h = jnp.maximum(h + p["b1"][None, :, None, None], 0.0)
    h = lax.conv_general_dilated(h, w2, (2, 2), [(1, 1), (1, 1)],
                                 dimension_numbers=dn,
                                 precision=lax.Precision.HIGHEST)
    h = jnp.maximum(h + p["b2"][None, :, None, None], 0.0)
    feat = jnp.mean(h, axis=(2, 3))
    return feat @ p["wfc"] + p["bfc"]


if __name__ == "__main__":
    key = jax.random.PRNGKey(0)
    pkey, xkey = jax.random.split(key)

    raw = init_params(pkey)
    params = prepare_params(raw)          # one-time weight expansion
    x = jax.random.normal(xkey, (2, 3, 32, 32), jnp.float32)

    logits = net_forward(params, x, 0)
    jax.block_until_ready(logits)
    assert logits.shape == (2, 10) and logits.dtype == jnp.float32

    # Loose structural check vs. a pure-JAX f32 reference (kernel uses bf16
    # MXU operands, so only gross indexing errors would exceed this bound).
    ref = reference_forward(raw, x)
    err = float(jnp.max(jnp.abs(logits - ref)))
    assert err < 1e-1, f"kernel/reference mismatch: {err}"

    print("KERNEL_OK")
</pallas_src>

<mosaic_0001>
module attributes {stable_mosaic.version = 11 : i64} {
  func.func @_fused_net_kernel(%arg0: i32, %arg1: memref<2x34x96xf32, #tpu.memory_space<vmem>>, %arg2: memref<288x512xbf16, #tpu.memory_space<vmem>>, %arg3: memref<1x512xf32, #tpu.memory_space<vmem>>, %arg4: memref<1536x512xbf16, #tpu.memory_space<vmem>>, %arg5: memref<1x512xf32, #tpu.memory_space<vmem>>, %arg6: memref<512x128xbf16, #tpu.memory_space<vmem>>, %arg7: memref<1x128xf32, #tpu.memory_space<vmem>>, %arg8: memref<2x128xf32, #tpu.memory_space<vmem>>, %arg9: memref<2x64x512xbf16, #tpu.memory_space<vmem>>) attributes {dimension_semantics = [#tpu.dimension_semantics<parallel>], iteration_bounds = array<i64: 1>, scalar_prefetch = 0 : i64, scratch_operands = 1 : i64, tpu.core_type = #tpu.core_type<tc>, window_params = [{transform_indices = @transform_0, window_bounds = array<i64: 2, 34, 96>}, {pipeline_mode = #tpu.pipeline_mode<synchronous>, transform_indices = @transform_1, window_bounds = array<i64: 288, 512>}, {pipeline_mode = #tpu.pipeline_mode<synchronous>, transform_indices = @transform_2, window_bounds = array<i64: 1, 512>}, {pipeline_mode = #tpu.pipeline_mode<synchronous>, transform_indices = @transform_3, window_bounds = array<i64: 1536, 512>}, {pipeline_mode = #tpu.pipeline_mode<synchronous>, transform_indices = @transform_4, window_bounds = array<i64: 1, 512>}, {pipeline_mode = #tpu.pipeline_mode<synchronous>, transform_indices = @transform_5, window_bounds = array<i64: 512, 128>}, {pipeline_mode = #tpu.pipeline_mode<synchronous>, transform_indices = @transform_6, window_bounds = array<i64: 1, 128>}, {transform_indices = @transform_7, window_bounds = array<i64: 2, 128>}]} {
    %c0 = arith.constant 0 : index
    %c0_0 = arith.constant 0 : index
    %c0_1 = arith.constant 0 : index
    %0 = vector.load %arg1[%c0, %c0_0, %c0_1] : memref<2x34x96xf32, #tpu.memory_space<vmem>>, vector<2x32x96xf32>
    %1 = arith.truncf %0 : vector<2x32x96xf32> to vector<2x32x96xbf16>
    %c0_2 = arith.constant 0 : index
    %c1 = arith.constant 1 : index
    %c0_3 = arith.constant 0 : index
    %2 = vector.load %arg1[%c0_2, %c1, %c0_3] : memref<2x34x96xf32, #tpu.memory_space<vmem>>, vector<2x32x96xf32>
    %3 = arith.truncf %2 : vector<2x32x96xf32> to vector<2x32x96xbf16>
    %c0_4 = arith.constant 0 : index
    %c2 = arith.constant 2 : index
    %c0_5 = arith.constant 0 : index
    %4 = vector.load %arg1[%c0_4, %c2, %c0_5] : memref<2x34x96xf32, #tpu.memory_space<vmem>>, vector<2x32x96xf32>
    %5 = arith.truncf %4 : vector<2x32x96xf32> to vector<2x32x96xbf16>
    %6 = tpu.concatenate %1, %3, %5 in 2 : vector<2x32x96xbf16>, vector<2x32x96xbf16>, vector<2x32x96xbf16> -> vector<2x32x288xbf16>
    %7 = vector.shape_cast %6 : vector<2x32x288xbf16> to vector<64x288xbf16>
    %c0_6 = arith.constant 0 : index
    %c0_7 = arith.constant 0 : index
    %8 = vector.load %arg2[%c0_6, %c0_7] : memref<288x512xbf16, #tpu.memory_space<vmem>>, vector<288x512xbf16>
    %cst = arith.constant dense<0.000000e+00> : vector<64x512xf32>
    %9 = tpu.matmul %7, %8, %cst {dimension_numbers = #tpu.dot_dimension_numbers<[1], [0], [0], [1], [0, 0, 1, 1], [], []>} : vector<64x288xbf16>, vector<288x512xbf16>, vector<64x512xf32> -> vector<64x512xf32>
    %c0_8 = arith.constant 0 : index
    %c0_9 = arith.constant 0 : index
    %10 = vector.load %arg3[%c0_8, %c0_9] : memref<1x512xf32, #tpu.memory_space<vmem>>, vector<1x512xf32>
    %11 = vector.broadcast %10 : vector<1x512xf32> to vector<64x512xf32>
    %12 = arith.addf %9, %11 : vector<64x512xf32>
    %cst_10 = arith.constant 0.000000e+00 : f32
    %13 = vector.broadcast %cst_10 : f32 to vector<64x512xf32>
    %14 = arith.maximumf %12, %13 : vector<64x512xf32>
    %15 = arith.truncf %14 : vector<64x512xf32> to vector<64x512xbf16>
    %16 = vector.shape_cast %15 : vector<64x512xbf16> to vector<2x32x512xbf16>
    %c0_11 = arith.constant 0 : index
    %c16 = arith.constant 16 : index
    %c0_12 = arith.constant 0 : index
    %17 = vector.load %arg9[%c0_11, %c16, %c0_12] : memref<2x64x512xbf16, #tpu.memory_space<vmem>>, vector<2x32x512xbf16>
    tpu.vector_store %arg9[%c0_11, %c16, %c0_12], %16 {strides = array<i32>} : memref<2x64x512xbf16, #tpu.memory_space<vmem>>, vector<2x32x512xbf16>,
    %cst_13 = arith.constant 0.000000e+00 : bf16
    %18 = vector.broadcast %cst_13 : bf16 to vector<2x1x512xbf16>
    %c0_14 = arith.constant 0 : index
    %c15 = arith.constant 15 : index
    %c0_15 = arith.constant 0 : index
    %19 = vector.load %arg9[%c0_14, %c15, %c0_15] : memref<2x64x512xbf16, #tpu.memory_space<vmem>>, vector<2x1x512xbf16>
    tpu.vector_store %arg9[%c0_14, %c15, %c0_15], %18 {strides = array<i32>} : memref<2x64x512xbf16, #tpu.memory_space<vmem>>, vector<2x1x512xbf16>,
    %c0_16 = arith.constant 0 : index
    %c48 = arith.constant 48 : index
    %c0_17 = arith.constant 0 : index
    %20 = vector.load %arg9[%c0_16, %c48, %c0_17] : memref<2x64x512xbf16, #tpu.memory_space<vmem>>, vector<2x1x512xbf16>
    tpu.vector_store %arg9[%c0_16, %c48, %c0_17], %18 {strides = array<i32>} : memref<2x64x512xbf16, #tpu.memory_space<vmem>>, vector<2x1x512xbf16>,
    %c0_18 = arith.constant 0 : index
    %c15_19 = arith.constant 15 : index
    %c0_20 = arith.constant 0 : index
    %21 = vector.load %arg9[%c0_18, %c15_19, %c0_20] : memref<2x64x512xbf16, #tpu.memory_space<vmem>>, vector<2x32x512xbf16>
    %c0_21 = arith.constant 0 : index
    %c16_22 = arith.constant 16 : index
    %c0_23 = arith.constant 0 : index
    %22 = vector.load %arg9[%c0_21, %c16_22, %c0_23] : memref<2x64x512xbf16, #tpu.memory_space<vmem>>, vector<2x32x512xbf16>
    %c0_24 = arith.constant 0 : index
    %c17 = arith.constant 17 : index
    %c0_25 = arith.constant 0 : index
    %23 = vector.load %arg9[%c0_24, %c17, %c0_25] : memref<2x64x512xbf16, #tpu.memory_space<vmem>>, vector<2x32x512xbf16>
    %24 = tpu.concatenate %21, %22, %23 in 2 : vector<2x32x512xbf16>, vector<2x32x512xbf16>, vector<2x32x512xbf16> -> vector<2x32x1536xbf16>
    %25 = vector.shape_cast %24 : vector<2x32x1536xbf16> to vector<64x1536xbf16>
    %c0_26 = arith.constant 0 : index
    %c0_27 = arith.constant 0 : index
    %26 = vector.load %arg4[%c0_26, %c0_27] : memref<1536x512xbf16, #tpu.memory_space<vmem>>, vector<1536x512xbf16>
    %cst_28 = arith.constant dense<0.000000e+00> : vector<64x512xf32>
    %27 = tpu.matmul %25, %26, %cst_28 {dimension_numbers = #tpu.dot_dimension_numbers<[1], [0], [0], [1], [0, 0, 1, 1], [], []>} : vector<64x1536xbf16>, vector<1536x512xbf16>, vector<64x512xf32> -> vector<64x512xf32>
    %c0_29 = arith.constant 0 : index
    %c0_30 = arith.constant 0 : index
    %28 = vector.load %arg5[%c0_29, %c0_30] : memref<1x512xf32, #tpu.memory_space<vmem>>, vector<1x512xf32>
    %29 = vector.broadcast %28 : vector<1x512xf32> to vector<64x512xf32>
    %30 = arith.addf %27, %29 : vector<64x512xf32>
    %cst_31 = arith.constant 0.000000e+00 : f32
    %31 = vector.broadcast %cst_31 : f32 to vector<64x512xf32>
    %32 = arith.maximumf %30, %31 : vector<64x512xf32>
    %33 = vector.shape_cast %32 : vector<64x512xf32> to vector<2x32x512xf32>
    %34 = tpu.iota {dimensions = array<i32: 1>} : vector<2x32x512xi32>
    %c2_i32 = arith.constant 2 : i32
    %c0_i32 = arith.constant 0 : i32
    %35 = arith.cmpi eq, %c2_i32, %c0_i32 : i32
    %c1_i32 = arith.constant 1 : i32
    %36 = arith.select %35, %c1_i32, %c2_i32 : i32
    %37 = vector.broadcast %36 : i32 to vector<2x32x512xi32>
    %38 = arith.remsi %34, %37 : vector<2x32x512xi32>
    %c0_i32_32 = arith.constant 0 : i32
    %39 = vector.broadcast %c0_i32_32 : i32 to vector<2x32x512xi32>
    %40 = arith.cmpi ne, %38, %39 : vector<2x32x512xi32>
    %c0_i32_33 = arith.constant 0 : i32
    %41 = vector.broadcast %c0_i32_33 : i32 to vector<2x32x512xi32>
    %42 = arith.cmpi slt, %38, %41 : vector<2x32x512xi32>
    %c0_i32_34 = arith.constant 0 : i32
    %43 = arith.cmpi slt, %36, %c0_i32_34 : i32
    %44 = vector.broadcast %43 : i1 to vector<2x32x512xi1>
    %45 = vector.broadcast %44 : vector<2x32x512xi1> to vector<2x32x512xi1>
    %46 = arith.xori %42, %45 : vector<2x32x512xi1>
    %47 = arith.andi %46, %40 : vector<2x32x512xi1>
    %48 = vector.broadcast %36 : i32 to vector<2x32x512xi32>
    %49 = arith.addi %38, %48 : vector<2x32x512xi32>
    %50 = arith.select %47, %49, %38 : vector<2x32x512xi1>, vector<2x32x512xi32>
    %c0_i32_35 = arith.constant 0 : i32
    %51 = vector.broadcast %c0_i32_35 : i32 to vector<2x32x512xi32>
    %52 = arith.cmpi eq, %50, %51 : vector<2x32x512xi32>
    %cst_36 = arith.constant 0.000000e+00 : f32
    %53 = vector.broadcast %cst_36 : f32 to vector<2x32x512xf32>
    %54 = arith.select %52, %33, %53 : vector<2x32x512xi1>, vector<2x32x512xf32>
    %cst_37 = arith.constant dense<0.000000e+00> : vector<2x512xf32>
    %55 = vector.multi_reduction <add>, %54, %cst_37 [1] : vector<2x32x512xf32> to vector<2x512xf32>
    %56 = arith.truncf %55 : vector<2x512xf32> to vector<2x512xbf16>
    %c0_38 = arith.constant 0 : index
    %c0_39 = arith.constant 0 : index
    %57 = vector.load %arg6[%c0_38, %c0_39] : memref<512x128xbf16, #tpu.memory_space<vmem>>, vector<512x128xbf16>
    %cst_40 = arith.constant dense<0.000000e+00> : vector<2x128xf32>
    %58 = tpu.matmul %56, %57, %cst_40 {dimension_numbers = #tpu.dot_dimension_numbers<[1], [0], [0], [1], [0, 0, 1, 1], [], []>} : vector<2x512xbf16>, vector<512x128xbf16>, vector<2x128xf32> -> vector<2x128xf32>
    %c0_41 = arith.constant 0 : index
    %c0_42 = arith.constant 0 : index
    %59 = vector.load %arg7[%c0_41, %c0_42] : memref<1x128xf32, #tpu.memory_space<vmem>>, vector<1x128xf32>
    %60 = vector.broadcast %59 : vector<1x128xf32> to vector<2x128xf32>
    %61 = arith.addf %58, %60 : vector<2x128xf32>
    %c0_43 = arith.constant 0 : index
    %c0_44 = arith.constant 0 : index
    %62 = vector.load %arg8[%c0_43, %c0_44] : memref<2x128xf32, #tpu.memory_space<vmem>>, vector<2x128xf32>
    tpu.vector_store %arg8[%c0_43, %c0_44], %61 {strides = array<i32>} : memref<2x128xf32, #tpu.memory_space<vmem>>, vector<2x128xf32>,
    return
  }
  func.func @transform_0(%arg0: i32) -> (i32, i32, i32) {
    %c0_i32 = arith.constant 0 : i32
    %c0_i32_0 = arith.constant 0 : i32
    %c0_i32_1 = arith.constant 0 : i32
    return %arg0, %c0_i32, %c0_i32_0 : i32, i32, i32
  }
  func.func @transform_1(%arg0: i32) -> (i32, i32) {
    %c0_i32 = arith.constant 0 : i32
    %c0_i32_0 = arith.constant 0 : i32
    %c0_i32_1 = arith.constant 0 : i32
    return %c0_i32, %c0_i32_0 : i32, i32
  }
  func.func @transform_2(%arg0: i32) -> (i32, i32) {
    %c0_i32 = arith.constant 0 : i32
    %c0_i32_0 = arith.constant 0 : i32
    %c0_i32_1 = arith.constant 0 : i32
    return %c0_i32, %c0_i32_0 : i32, i32
  }
  func.func @transform_3(%arg0: i32) -> (i32, i32) {
    %c0_i32 = arith.constant 0 : i32
    %c0_i32_0 = arith.constant 0 : i32
    %c0_i32_1 = arith.constant 0 : i32
    return %c0_i32, %c0_i32_0 : i32, i32
  }
  func.func @transform_4(%arg0: i32) -> (i32, i32) {
    %c0_i32 = arith.constant 0 : i32
    %c0_i32_0 = arith.constant 0 : i32
    %c0_i32_1 = arith.constant 0 : i32
    return %c0_i32, %c0_i32_0 : i32, i32
  }
  func.func @transform_5(%arg0: i32) -> (i32, i32) {
    %c0_i32 = arith.constant 0 : i32
    %c0_i32_0 = arith.constant 0 : i32
    %c0_i32_1 = arith.constant 0 : i32
    return %c0_i32, %c0_i32_0 : i32, i32
  }
  func.func @transform_6(%arg0: i32) -> (i32, i32) {
    %c0_i32 = arith.constant 0 : i32
    %c0_i32_0 = arith.constant 0 : i32
    %c0_i32_1 = arith.constant 0 : i32
    return %c0_i32, %c0_i32_0 : i32, i32
  }
  func.func @transform_7(%arg0: i32) -> (i32, i32) {
    %c0_i32 = arith.constant 0 : i32
    %c0_i32_0 = arith.constant 0 : i32
    return %arg0, %c0_i32 : i32, i32
  }
}

</mosaic_0001>

<bundles_post_ra>
// kernel: fused_net_forward.1
= control target key start
LH: loop header
LB: loop body
LE: loop exit
PB: predicated region body
PF: predicated region fallthrough
CT: control target
= control target key end

     0   :  { %12 = vsyncpa [#allocation4], 0  ;;  %s8170_s0 = inlined_call_operand.vmem [shape: f32[2,34,96], index: 0, kind: input, shape index: {}]   ;;  %s8171_s1 = inlined_call_operand.hbm [shape: bf16[288,512], index: 1, kind: input, shape index: {}]   ;;  %s8172_s2 = inlined_call_operand.hbm [shape: f32[1,512], index: 2, kind: input, shape index: {}]   ;;  %s8173_s3 = inlined_call_operand.hbm [shape: bf16[1536,512], index: 3, kind: input, shape index: {}]   ;;  %s8174_s4 = inlined_call_operand.hbm [shape: f32[1,512], index: 4, kind: input, shape index: {}]   ;;  %s8175_s5 = inlined_call_operand.hbm [shape: bf16[512,128], index: 5, kind: input, shape index: {}]   ;;  %s8176_s6 = inlined_call_operand.hbm [shape: f32[1,128], index: 6, kind: input, shape index: {}]   ;;  %s8177_s7 = inlined_call_operand.hbm [shape: f32[2,128], index: 7, kind: output, shape index: {}]  }
   0x1   :  { %13 = vsyncpa [#allocation7], 0 }
   0x2   :  { %14 = vsyncpa [#allocation10], 0 }
   0x3   :  { %15 = vsyncpa [#allocation13], 0 }
   0x4   :  { %16 = vsyncpa [#allocation5], 0  ;;  %s7233_s24 = smov [#allocation6]   ;;  %s7234_s26 = smov [#allocation9]  }
   0x5   :  { %s37_s25 = sshll.u32 %s7233_s24, 4  ;;  %s59_s27 = sshll.u32 %s7234_s26, 4  ;;  %s38_s25 = int_to_ptr.vmem [resolvable:$true] %s37_s25  ;;  %s60_s27 = int_to_ptr.vmem [resolvable:$true] %s59_s27 }
   0x6   :  { %s7069_s30 = scalar_lea.hbm %s8172_s2, 64 }
   0x7   :  { %p7070_p0 = scmp.ne.s32.totalorder %s8172_s2, %s7069_s30  ;;  %p7073_p1 = scmp.lt.u32.totalorder %s7069_s30, %s8172_s2 }
   0x9   :  { %p7075_p2 = pnand %p7073_p1, %p7070_p0 }
   0xb   :  { %7078 = shalt.err (!%p7075_p2)
}
   0xc   :  { %s7079_s12 = scalar_lea.vmem %s38_s25, 64  ;;  %p7084_p4 = scmp.lt.s32.totalorder %s38_s25, %s38_s25 }
   0xd   :  { %p7080_p3 = scmp.ne.s32.totalorder %s38_s25, %s7079_s12  ;;  %p7085_p5 = scmp.lt.s32.totalorder %s7079_s12, %s7079_s12 }
   0xf   :  { %p7086_p6 = por %p7085_p5, %p7084_p4 }
  0x11   :  { %p7087_p7 = pnand %p7086_p6, %p7080_p3 }
  0x13   :  { %7090 = shalt.err (!%p7087_p7)
}
  0x14   :  { %40 = dma.hbm_to_vmem [thread:$0]  %s8172_s2, 64, %s38_s25, [#allocation7]  }
  0x15   :  { %s7091_s17 = scalar_lea.hbm %s8174_s4, 64 }
  0x16   :  { %p7092_p8 = scmp.ne.s32.totalorder %s8174_s4, %s7091_s17  ;;  %p7095_p9 = scmp.lt.u32.totalorder %s7091_s17, %s8174_s4 }
  0x18   :  { %p7097_p10 = pnand %p7095_p9, %p7092_p8 }
  0x1a   :  { %7100 = shalt.err (!%p7097_p10)
}
  0x1b   :  { %s7101_s22 = scalar_lea.vmem %s60_s27, 64  ;;  %p7106_p12 = scmp.lt.s32.totalorder %s60_s27, %s60_s27 }
  0x1c   :  { %p7102_p11 = scmp.ne.s32.totalorder %s60_s27, %s7101_s22  ;;  %p7107_p13 = scmp.lt.s32.totalorder %s7101_s22, %s7101_s22 }
  0x1e   :  { %p7108_p0 = por %p7107_p13, %p7106_p12 }
  0x20   :  { %p7109_p1 = pnand %p7108_p0, %p7102_p11 }
  0x22   :  { %7112 = shalt.err (!%p7109_p1)
}
  0x23   :  { %62 = dma.hbm_to_vmem [thread:$0]  %s8174_s4, 64, %s60_s27, [#allocation10]  }
  0x24   :  { %s7235_s24 = smov [#allocation3]   ;;  %s7113_s29 = scalar_lea.hbm %s8171_s1, 9216 }
  0x25   :  { %s24_s25 = sshll.u32 %s7235_s24, 4  ;;  %p7114_p2 = scmp.ne.s32.totalorder %s8171_s1, %s7113_s29  ;;  %s25_s25 = int_to_ptr.vmem [resolvable:$true] %s24_s25 }
  0x26   :  { %p7117_p3 = scmp.lt.u32.totalorder %s7113_s29, %s8171_s1 }
  0x28   :  { %p7119_p4 = pnand %p7117_p3, %p7114_p2 }
  0x2a   :  { %7122 = shalt.err (!%p7119_p4)
}
  0x2b   :  { %s7123_s11 = scalar_lea.vmem %s25_s25, 9216  ;;  %p7128_p6 = scmp.lt.s32.totalorder %s25_s25, %s25_s25 }
  0x2c   :  { %p7124_p5 = scmp.ne.s32.totalorder %s25_s25, %s7123_s11  ;;  %p7129_p7 = scmp.lt.s32.totalorder %s7123_s11, %s7123_s11 }
  0x2e   :  { %p7130_p8 = por %p7129_p7, %p7128_p6 }
  0x30   :  { %p7131_p9 = pnand %p7130_p8, %p7124_p5 }
  0x32   :  { %7134 = shalt.err (!%p7131_p9)
}
  0x33   :  { %s7236_s4 = smov 256   ;;  %s7237_s27 = smov 16  }
  0x34   :  { %30 = dma.hbm_to_vmem [thread:$0]  %s8171_s1, 9216, %s25_s25, [#allocation4], %s7236_s4, %s7236_s4, %s7237_s27  }
  0x35   :  { %s7238_s14 = smov [#allocation8]   ;;  %s7239_s16 = smov [#allocation11]  }
  0x36   :  { %s46_s15 = sshll.u32 %s7238_s14, 4  ;;  %s68_s17 = sshll.u32 %s7239_s16, 4  ;;  %s47_s15 = int_to_ptr.vmem [resolvable:$true] %s46_s15  ;;  %s69_s17 = int_to_ptr.vmem [resolvable:$true] %s68_s17 }
  0x37   :  { %s7135_s20 = scalar_lea.hbm %s8173_s3, 49152 }
  0x38   :  { %p7136_p10 = scmp.ne.s32.totalorder %s8173_s3, %s7135_s20  ;;  %p7139_p11 = scmp.lt.u32.totalorder %s7135_s20, %s8173_s3 }
  0x3a   :  { %p7141_p12 = pnand %p7139_p11, %p7136_p10 }
  0x3c   :  { %7144 = shalt.err (!%p7141_p12)
}
  0x3d   :  { %s7145_s1 = scalar_lea.vmem %s47_s15, 49152  ;;  %p7150_p0 = scmp.lt.s32.totalorder %s47_s15, %s47_s15 }
  0x3e   :  { %p7146_p13 = scmp.ne.s32.totalorder %s47_s15, %s7145_s1  ;;  %p7151_p1 = scmp.lt.s32.totalorder %s7145_s1, %s7145_s1 }
  0x40   :  { %p7152_p2 = por %p7151_p1, %p7150_p0 }
  0x42   :  { %p7153_p3 = pnand %p7152_p2, %p7146_p13 }
  0x44   :  { %7156 = shalt.err (!%p7153_p3)
}
  0x45   :  { %52 = dma.hbm_to_vmem [thread:$0]  %s8173_s3, 49152, %s47_s15, [#allocation7], %s7236_s4, %s7236_s4, %s7237_s27  }
  0x46   :  { %s7157_s29 = scalar_lea.hbm %s8175_s5, 4096 }
  0x47   :  { %p7158_p4 = scmp.ne.s32.totalorder %s8175_s5, %s7157_s29  ;;  %p7161_p5 = scmp.lt.u32.totalorder %s7157_s29, %s8175_s5 }
  0x49   :  { %p7163_p6 = pnand %p7161_p5, %p7158_p4 }
  0x4b   :  { %7166 = shalt.err (!%p7163_p6)
}
  0x4c   :  { %s7167_s11 = scalar_lea.vmem %s69_s17, 4096  ;;  %p7172_p8 = scmp.lt.s32.totalorder %s69_s17, %s69_s17 }
  0x4d   :  { %p7168_p7 = scmp.ne.s32.totalorder %s69_s17, %s7167_s11  ;;  %p7173_p9 = scmp.lt.s32.totalorder %s7167_s11, %s7167_s11 }
  0x4f   :  { %p7174_p10 = por %p7173_p9, %p7172_p8 }
  0x51   :  { %p7175_p11 = pnand %p7174_p10, %p7168_p7 }
  0x53   :  { %7178 = shalt.err (!%p7175_p11)
}
  0x54   :  { %s7240_s3 = smov 64   ;;  %s7241_s4 = smov 4  }
  0x55   :  { %74 = dma.hbm_to_vmem [thread:$0]  %s8175_s5, 4096, %s69_s17, [#allocation10], %s7240_s3, %s7240_s3, %s7241_s4  }
  0x56   :  { %s7242_s13 = smov [#allocation12]   ;;  %s7179_s18 = scalar_lea.hbm %s8176_s6, 16 }
  0x57   :  { %s81_s14 = sshll.u32 %s7242_s13, 4  ;;  %p7180_p12 = scmp.ne.s32.totalorder %s8176_s6, %s7179_s18  ;;  %s82_s14 = int_to_ptr.vmem [resolvable:$true] %s81_s14 }
  0x58   :  { %p7183_p13 = scmp.lt.u32.totalorder %s7179_s18, %s8176_s6 }
  0x5a   :  { %p7185_p0 = pnand %p7183_p13, %p7180_p12 }
  0x5c   :  { %7188 = shalt.err (!%p7185_p0)
}
  0x5d   :  { %s7189_s2 = scalar_lea.vmem %s82_s14, 16  ;;  %s7193_s5 = scalar_lea.vmem %s82_s14, 32 }
  0x5e   :  { %p7190_p1 = scmp.ne.s32.totalorder %s82_s14, %s7189_s2  ;;  %p7194_p2 = scmp.lt.s32.totalorder %s82_s14, %s82_s14 }
  0x5f   :  { %p7195_p3 = scmp.lt.s32.totalorder %s7193_s5, %s7189_s2 }
  0x61   :  { %p7196_p4 = por %p7195_p3, %p7194_p2 }
  0x63   :  { %p7197_p5 = pnand %p7196_p4, %p7190_p1 }
  0x65   :  { %7200 = shalt.err (!%p7197_p5)
}
  0x66   :  { %84 = dma.hbm_to_vmem [thread:$0]  %s8176_s6, 16, %s82_s14, [#allocation13]  }
  0x67   :  { %7223 = dma.done.wait [#allocation4], 9216  }
  0x68   :  { %7224 = vsyncadd [#allocation4], 4294958080 }
  0x69   :  { %7225 = dma.done.wait [#allocation7], 49216  }
  0x6a   :  { %7226 = vsyncadd [#allocation7], 4294918080 }
  0x6b   :  { %7227 = dma.done.wait [#allocation10], 4160  }
  0x6c   :  { %7228 = vsyncadd [#allocation10], 4294963136 }
  0x6d   :  { %7229 = dma.done.wait [#allocation13], 16  }
  0x6e   :  { %7230 = vsyncadd [#allocation13], 4294967280  ;;  %v116_v0 = vld [vmem:[%s8170_s0 + $0x1] sm:$0xff]  ;;  %v117_v1 = vld [vmem:[%s8170_s0 + $0x9] sm:$0xff]  ;;  %s7243_s14 = smov 96   ;;  %vm181_vm0 = vcmask 523264  }
  0x6f   :  { %v118_v2 = vld [vmem:[%s8170_s0 + $0x11] sm:$0xff]  ;;  %v124_v3 = vpack.c.bf16 %v117_v1, %v116_v0  ;;  %v119_v4 = vld [vmem:[%s8170_s0 + $0x19] sm:$0xff]  ;;  %v128_v5 = vld [vmem:[%s8170_s0 + $0x2] sm:$0xff]  ;;  %vm164_vm1 = vcmask 785408   ;;  %vm648_vm2 = vcmask 261120   ;;  %vm1013_vm3 = vcmask 1047559  }
  0x70   :  { %v129_v6 = vld [vmem:[%s8170_s0 + $0xa] sm:$0xff]  ;;  %v125_v7 = vpack.c.bf16 %v119_v4, %v118_v2  ;;  %v130_v8 = vld [vmem:[%s8170_s0 + $0x12] sm:$0xff]  ;;  %v131_v9 = vld [vmem:[%s8170_s0 + $0x1a] sm:$0xff]  ;;  %vm1014_vm4 = vsmask.f32 7966  ;;  %vm1040_vm7 = vcmask 1040384  }
  0x71   :  { %144 = vrot.lane.b32.xlu0 %v124_v3, %s7243_s14  ;;  %v136_v10 = vpack.c.bf16 %v129_v6, %v128_v5  ;;  %v137_v11 = vpack.c.bf16 %v131_v9, %v130_v8  ;;  %v132_v12 = vld [vmem:[%s8170_s0 + $0x2a] sm:$0xff]  ;;  %v133_v15 = vld [vmem:[%s8170_s0 + $0x32] sm:$0xff]  ;;  %v123_v17 = vld [vmem:[%s8170_s0 + $0x41] sm:$0xff]  ;;  %vm1041_vm6 = vsmask.f32 256  ;;  %vm1260_vm10 = vcmask 1046528  }
  0x72   :  { %146 = vrot.lane.b32.xlu1 %v125_v7, %s7243_s14  ;;  %v120_v13 = vld [vmem:[%s8170_s0 + $0x29] sm:$0xff]  ;;  %v121_v14 = vld [vmem:[%s8170_s0 + $0x31] sm:$0xff]  ;;  %v122_v16 = vld [vmem:[%s8170_s0 + $0x39] sm:$0xff]  ;;  %v138_v25 = vpack.c.bf16 %v133_v15, %v132_v12  ;;  %vm1115_vm9 = vsmask.f32 7424  ;;  %vm5239_vm15 = vcmask 1041409  }
  0x73   :  { %v6353_v18 = vld [vmem:[#allocation3 + $0x4] ss:$16 sps:$4 sm:$0xff]   ;;  %v6355_v19 = vld [vmem:[#allocation3] ss:$16 sps:$4 sm:$0xff]   ;;  %v126_v20 = vpack.c.bf16 %v121_v14, %v120_v13  ;;  %v6356_v23 = vld [vmem:[#allocation3 + $0xc] ss:$16 sps:$4 sm:$0xff]   ;;  %v127_v30 = vpack.c.bf16 %v123_v17, %v122_v16 }
  0x74   :  { %v134_v21 = vld [vmem:[%s8170_s0 + $0x3a] sm:$0xff]  ;;  %v135_v22 = vld [vmem:[%s8170_s0 + $0x42] sm:$0xff]  ;;  %657 = vmatprep.subr.bf16.mxu0 %v6353_v18  ;;  %803 = vmatprep.subr.bf16.mxu1 %v6356_v23  ;;  %vm7471_vm5 = vmand %vm1013_vm3, %vm1014_vm4 }
  0x75   :  { %156 = vrot.lane.b32.xlu0 %v136_v10, %s7240_s3  ;;  %v6358_v24 = vld [vmem:[#allocation3 + $0x8] ss:$16 sps:$4 sm:$0xff]   ;;  %v6359_v26 = vld [vmem:[#allocation3 + $0x24] ss:$16 sps:$4 sm:$0xff]   ;;  %658 = vmatpush1.bf16.msra.mxu0 %v6355_v19  ;;  %v6361_v27 = vld [vmem:[#allocation3 + $0x20] ss:$16 sps:$4 sm:$0xff]   ;;  %v139_v32 = vpack.c.bf16 %v135_v22, %v134_v21 }
  0x76   :  { %158 = vrot.lane.b32.xlu1 %v137_v11, %s7240_s3  ;;  %804 = vmatpush1.bf16.msra.mxu1 %v6358_v24  ;;  %v6362_v28 = vld [vmem:[#allocation3 + $0x2c] ss:$16 sps:$4 sm:$0xff]   ;;  %v6364_v29 = vld [vmem:[#allocation3 + $0x28] ss:$16 sps:$4 sm:$0xff]   ;;  %v6365_v31 = vld [vmem:[#allocation3 + $0x44] ss:$16 sps:$4 sm:$0xff]  }
  0x77   :  { %659 = vmatprep.subr.bf16.mxu0 %v6359_v26  ;;  %805 = vmatprep.subr.bf16.mxu1 %v6362_v28  ;;  %v6368_v33 = vld [vmem:[#allocation3 + $0x4c] ss:$16 sps:$4 sm:$0xff]   ;;  %v6367_v34 = vld [vmem:[#allocation3 + $0x40] ss:$16 sps:$4 sm:$0xff]   ;;  %v6370_v35 = vld [vmem:[#allocation3 + $0x48] ss:$16 sps:$4 sm:$0xff]  }
  0x78   :  { %v6371_v36 = vld [vmem:[#allocation3 + $0x64] ss:$16 sps:$4 sm:$0xff]   ;;  %v6374_v37 = vld [vmem:[#allocation3 + $0x6c] ss:$16 sps:$4 sm:$0xff]   ;;  %v6373_v38 = vld [vmem:[#allocation3 + $0x60] ss:$16 sps:$4 sm:$0xff]  }
  0x79   :  { %148 = vrot.lane.b32.xlu0 %v126_v20, %s7243_s14  ;;  %660 = vmatpush1.bf16.msra.mxu0 %v6361_v27  ;;  %v6376_v39 = vld [vmem:[#allocation3 + $0x68] ss:$16 sps:$4 sm:$0xff]   ;;  %v6377_v40 = vld [vmem:[#allocation3 + $0x84] ss:$16 sps:$4 sm:$0xff]   ;;  %v6380_v41 = vld [vmem:[#allocation3 + $0x8c] ss:$16 sps:$4 sm:$0xff]  }
  0x7a   :  { %160 = vrot.lane.b32.xlu1 %v138_v25, %s7240_s3  ;;  %806 = vmatpush1.bf16.msra.mxu1 %v6364_v29  ;;  %v6379_v42 = vld [vmem:[#allocation3 + $0x80] ss:$16 sps:$4 sm:$0xff]   ;;  %v6382_v43 = vld [vmem:[#allocation3 + $0x88] ss:$16 sps:$4 sm:$0xff]   ;;  %v6383_v44 = vld [vmem:[#allocation3 + $0xa4] ss:$16 sps:$4 sm:$0xff]  }
  0x7b   :  { %661 = vmatprep.subr.bf16.mxu0 %v6365_v31  ;;  %807 = vmatprep.subr.bf16.mxu1 %v6368_v33  ;;  %v6386_v45 = vld [vmem:[#allocation3 + $0xac] ss:$16 sps:$4 sm:$0xff]   ;;  %v6385_v46 = vld [vmem:[#allocation3 + $0xa0] ss:$16 sps:$4 sm:$0xff]   ;;  %v6388_v47 = vld [vmem:[#allocation3 + $0xa8] ss:$16 sps:$4 sm:$0xff]  }
  0x7c   :  { %v6389_v48 = vld [vmem:[#allocation3 + $0xc4] ss:$16 sps:$4 sm:$0xff]   ;;  %v6392_v49 = vld [vmem:[#allocation3 + $0xcc] ss:$16 sps:$4 sm:$0xff]   ;;  %v6391_v50 = vld [vmem:[#allocation3 + $0xc0] ss:$16 sps:$4 sm:$0xff]  }
  0x7d   :  { %150 = vrot.lane.b32.xlu0 %v127_v30, %s7243_s14  ;;  %662 = vmatpush1.bf16.msra.mxu0 %v6367_v34  ;;  %v6394_v51 = vld [vmem:[#allocation3 + $0xc8] ss:$16 sps:$4 sm:$0xff]   ;;  %v6395_v52 = vld [vmem:[#allocation3 + $0xe4] ss:$16 sps:$4 sm:$0xff]   ;;  %v6398_v53 = vld [vmem:[#allocation3 + $0xec] ss:$16 sps:$4 sm:$0xff]  }
  0x7e   :  { %162 = vrot.lane.b32.xlu1 %v139_v32, %s7240_s3  ;;  %808 = vmatpush1.bf16.msra.mxu1 %v6370_v35  ;;  %v6397_v54 = vld [vmem:[#allocation3 + $0xe0] ss:$16 sps:$4 sm:$0xff]   ;;  %v6400_v55 = vld [vmem:[#allocation3 + $0xe8] ss:$16 sps:$4 sm:$0xff]   ;;  %v6401_v56 = vld [vmem:[#allocation3 + $0x104] ss:$16 sps:$4 sm:$0xff]  }
  0x7f   :  { %663 = vmatprep.subr.bf16.mxu0 %v6371_v36  ;;  %809 = vmatprep.subr.bf16.mxu1 %v6374_v37  ;;  %v6404_v57 = vld [vmem:[#allocation3 + $0x10c] ss:$16 sps:$4 sm:$0xff]   ;;  %v6403_v58 = vld [vmem:[#allocation3 + $0x100] ss:$16 sps:$4 sm:$0xff]   ;;  %v6406_v59 = vld [vmem:[#allocation3 + $0x108] ss:$16 sps:$4 sm:$0xff]  }
  0x80   :  { %v6407_v60 = vld [vmem:[#allocation3 + $0x124] ss:$16 sps:$4 sm:$0xff]   ;;  %v6410_v61 = vld [vmem:[#allocation3 + $0x12c] ss:$16 sps:$4 sm:$0xff]   ;;  %v6409_v62 = vld [vmem:[#allocation3 + $0x120] ss:$16 sps:$4 sm:$0xff]  }
  0x81   :  { %664 = vmatpush1.bf16.msra.mxu0 %v6373_v38  ;;  %v6412_v63 = vld [vmem:[#allocation3 + $0x128] ss:$16 sps:$4 sm:$0xff]   ;;  %v6413_v0 = vld [vmem:[#allocation3 + $0x144] ss:$16 sps:$4 sm:$0xff]   ;;  %v6416_v1 = vld [vmem:[#allocation3 + $0x14c] ss:$16 sps:$4 sm:$0xff]  }
  0x82   :  { %810 = vmatpush1.bf16.msra.mxu1 %v6376_v39  ;;  %665 = vmatprep.subr.bf16.mxu0 %v6377_v40  ;;  %v6415_v2 = vld [vmem:[#allocation3 + $0x140] ss:$16 sps:$4 sm:$0xff]   ;;  %v6418_v3 = vld [vmem:[#allocation3 + $0x148] ss:$16 sps:$4 sm:$0xff]   ;;  %v6419_v4 = vld [vmem:[#allocation3 + $0x164] ss:$16 sps:$4 sm:$0xff]  }
  0x83   :  { %811 = vmatprep.subr.bf16.mxu1 %v6380_v41  ;;  %v6422_v5 = vld [vmem:[#allocation3 + $0x16c] ss:$16 sps:$4 sm:$0xff]   ;;  %v6421_v6 = vld [vmem:[#allocation3 + $0x160] ss:$16 sps:$4 sm:$0xff]   ;;  %v6424_v7 = vld [vmem:[#allocation3 + $0x168] ss:$16 sps:$4 sm:$0xff]  }
  0x84   :  { %v6425_v8 = vld [vmem:[#allocation3 + $0x184] ss:$16 sps:$4 sm:$0xff]   ;;  %v6428_v9 = vld [vmem:[#allocation3 + $0x18c] ss:$16 sps:$4 sm:$0xff]   ;;  %v6427_v10 = vld [vmem:[#allocation3 + $0x180] ss:$16 sps:$4 sm:$0xff]  }
  0x85   :  { %666 = vmatpush1.bf16.msra.mxu0 %v6379_v42  ;;  %v6430_v11 = vld [vmem:[#allocation3 + $0x188] ss:$16 sps:$4 sm:$0xff]   ;;  %v6431_v12 = vld [vmem:[#allocation3 + $0x1a4] ss:$16 sps:$4 sm:$0xff]   ;;  %v6434_v13 = vld [vmem:[#allocation3 + $0x1ac] ss:$16 sps:$4 sm:$0xff]  }
  0x86   :  { %812 = vmatpush1.bf16.msra.mxu1 %v6382_v43  ;;  %667 = vmatprep.subr.bf16.mxu0 %v6383_v44  ;;  %v6433_v14 = vld [vmem:[#allocation3 + $0x1a0] ss:$16 sps:$4 sm:$0xff]   ;;  %v6436_v15 = vld [vmem:[#allocation3 + $0x1a8] ss:$16 sps:$4 sm:$0xff]   ;;  %v6437_v16 = vld [vmem:[#allocation3 + $0x1c4] ss:$16 sps:$4 sm:$0xff]  }
  0x87   :  { %813 = vmatprep.subr.bf16.mxu1 %v6386_v45  ;;  %v6440_v17 = vld [vmem:[#allocation3 + $0x1cc] ss:$16 sps:$4 sm:$0xff]   ;;  %v6439_v18 = vld [vmem:[#allocation3 + $0x1c0] ss:$16 sps:$4 sm:$0xff]   ;;  %v6442_v19 = vld [vmem:[#allocation3 + $0x1c8] ss:$16 sps:$4 sm:$0xff]  }
  0x88   :  { %v6443_v20 = vld [vmem:[#allocation3 + $0x1e4] ss:$16 sps:$4 sm:$0xff]   ;;  %v6446_v21 = vld [vmem:[#allocation3 + $0x1ec] ss:$16 sps:$4 sm:$0xff]   ;;  %v6445_v22 = vld [vmem:[#allocation3 + $0x1e0] ss:$16 sps:$4 sm:$0xff]  }
  0x89   :  { %668 = vmatpush1.bf16.msra.mxu0 %v6385_v46  ;;  %v6448_v23 = vld [vmem:[#allocation3 + $0x1e8] ss:$16 sps:$4 sm:$0xff]   ;;  %v6451_v24 = vld [vmem:[#allocation3 + $0x204] ss:$16 sps:$4 sm:$0xff]   ;;  %v6457_v25 = vld [vmem:[#allocation3 + $0x20c] ss:$16 sps:$4 sm:$0xff]  }
  0x8a   :  { %814 = vmatpush1.bf16.msra.mxu1 %v6388_v47  ;;  %669 = vmatprep.subr.bf16.mxu0 %v6389_v48  ;;  %v104_v26 = vld [vmem:[%s8170_s0] sm:$0xff]  ;;  %v105_v27 = vld [vmem:[%s8170_s0 + $0x8] sm:$0xff]  ;;  %v106_v37 = vld [vmem:[%s8170_s0 + $0x10] sm:$0xff] }
  0x8b   :  { %815 = vmatprep.subr.bf16.mxu1 %v6392_v49  ;;  %v6449_v30 = vld [vmem:[#allocation3 + $0x200] ss:$16 sps:$4 sm:$0xff]   ;;  %v112_v31 = vpack.c.bf16 %v105_v27, %v104_v26  ;;  %v6454_v32 = vld [vmem:[#allocation3 + $0x224] ss:$16 sps:$4 sm:$0xff]   ;;  %v6455_v34 = vld [vmem:[#allocation3 + $0x208] ss:$16 sps:$4 sm:$0xff]  }
  0x8c   :  { %v107_v38 = vld [vmem:[%s8170_s0 + $0x18] sm:$0xff]  ;;  %v6452_v42 = vld [vmem:[#allocation3 + $0x220] ss:$16 sps:$4 sm:$0xff]   ;;  %v108_v48 = vld [vmem:[%s8170_s0 + $0x28] sm:$0xff] }
  0x8d   :  { %670 = vmatpush1.bf16.msra.mxu0 %v6391_v50  ;;  %v6460_v39 = vld [vmem:[#allocation3 + $0x22c] ss:$16 sps:$4 sm:$0xff]   ;;  %v6463_v43 = vld [vmem:[#allocation8 + $0x4] ss:$16 sps:$4 sm:$0xff]   ;;  %v113_v45 = vpack.c.bf16 %v107_v38, %v106_v37  ;;  %v109_v49 = vld [vmem:[%s8170_s0 + $0x30] sm:$0xff] }
  0x8e   :  { %816 = vmatpush1.bf16.msra.mxu1 %v6394_v51  ;;  %671 = vmatprep.subr.bf16.mxu0 %v6395_v52  ;;  %v6458_v44 = vld [vmem:[#allocation3 + $0x228] ss:$16 sps:$4 sm:$0xff]   ;;  %v6466_v50 = vld [vmem:[#allocation8 + $0xc] ss:$16 sps:$4 sm:$0xff]   ;;  %v6503_v27 = vld [vmem:[#allocation8 + $0xe0] ss:$16 sps:$4 sm:$0xff]  }
  0x8f   :  { %817 = vmatprep.subr.bf16.mxu1 %v6398_v53  ;;  %v114_v53 = vpack.c.bf16 %v109_v49, %v108_v48  ;;  %v6508_v26 = vld [vmem:[#allocation8 + $0xec] ss:$16 sps:$4 sm:$0xff]   ;;  %v6523_v37 = vld [vmem:[#allocation8 + $0x144] ss:$16 sps:$4 sm:$0xff]   ;;  %v6536_v48 = vld [vmem:[#allocation8 + $0x188] ss:$16 sps:$4 sm:$0xff]  }
  0x90   :  { %v6526_v38 = vld [vmem:[#allocation8 + $0x14c] ss:$16 sps:$4 sm:$0xff]   ;;  %vm7492_vm8 = vmand %vm1040_vm7, %vm1041_vm6 }
  0x91   :  { %672 = vmatpush1.bf16.msra.mxu0 %v6397_v54 }
  0x92   :  { %818 = vmatpush1.bf16.msra.mxu1 %v6400_v55  ;;  %673 = vmatprep.subr.bf16.mxu0 %v6401_v56  ;;  %v110_v56 = vld [vmem:[%s8170_s0 + $0x38] sm:$0xff] }
  0x93   :  { %819 = vmatprep.subr.bf16.mxu1 %v6404_v57  ;;  %v111_v57 = vld [vmem:[%s8170_s0 + $0x40] sm:$0xff]  ;;  %s7245_s0 = smov [#allocation14]  }
  0x94   :  { %s5531_s19 = sshll.u32 %s7245_s0, 4  ;;  %s5532_s19 = int_to_ptr.vmem [resolvable:$true] %s5531_s19 }
  0x95   :  { %674 = vmatpush1.bf16.msra.mxu0 %v6403_v58  ;;  %s7201_s20 = scalar_lea.vmem %s5532_s19, 32  ;;  %p7206_p7 = scmp.lt.s32.totalorder %s5532_s19, %s5532_s19 }
  0x96   :  { %820 = vmatpush1.bf16.msra.mxu1 %v6406_v59  ;;  %675 = vmatprep.subr.bf16.mxu0 %v6407_v60  ;;  %v115_v60 = vpack.c.bf16 %v111_v57, %v110_v56  ;;  %v6539_v56 = vld [vmem:[#allocation8 + $0x1a0] ss:$16 sps:$4 sm:$0xff]   ;;  %v6542_v57 = vld [vmem:[#allocation8 + $0x1a8] ss:$16 sps:$4 sm:$0xff]   ;;  %p7202_p6 = scmp.ne.s32.totalorder %s5532_s19, %s7201_s20  ;;  %p7207_p8 = scmp.lt.s32.totalorder %s7201_s20, %s7201_s20 }
  0x97   :  { %821 = vmatprep.subr.bf16.mxu1 %v6410_v61 }
  0x98   :  { %p7208_p9 = por %p7207_p8, %p7206_p7 }
  0x99   :  { %676 = vmatpush1.bf16.msra.mxu0 %v6409_v62  ;;  %v7244_v62 = vmov 0  }
  0x9a   :  { %822 = vmatpush1.bf16.msra.mxu1 %v6412_v63  ;;  %677 = vmatprep.subr.bf16.mxu0 %v6413_v0  ;;  %v6461_v63 = vld [vmem:[#allocation8] ss:$16 sps:$4 sm:$0xff]   ;;  %v6464_v0 = vld [vmem:[#allocation8 + $0x8] ss:$16 sps:$4 sm:$0xff]   ;;  %p7209_p10 = pnand %p7208_p9, %p7202_p6 }
  0x9b   :  { %823 = vmatprep.subr.bf16.mxu1 %v6416_v1  ;;  %v6469_v1 = vld [vmem:[#allocation8 + $0x24] ss:$16 sps:$4 sm:$0xff]  }
  0x9d   :  { %678 = vmatpush1.bf16.msra.mxu0 %v6415_v2  ;;  %v6472_v2 = vld [vmem:[#allocation8 + $0x2c] ss:$16 sps:$4 sm:$0xff]  }
  0x9e   :  { %824 = vmatpush1.bf16.msra.mxu1 %v6418_v3  ;;  %679 = vmatprep.subr.bf16.mxu0 %v6419_v4  ;;  %v6467_v3 = vld [vmem:[#allocation8 + $0x20] ss:$16 sps:$4 sm:$0xff]   ;;  %v6470_v4 = vld [vmem:[#allocation8 + $0x28] ss:$16 sps:$4 sm:$0xff]  }
  0x9f   :  { %825 = vmatprep.subr.bf16.mxu1 %v6422_v5  ;;  %v6475_v5 = vld [vmem:[#allocation8 + $0x44] ss:$16 sps:$4 sm:$0xff]  }
  0xa1   :  { %680 = vmatpush1.bf16.msra.mxu0 %v6421_v6  ;;  %v6478_v6 = vld [vmem:[#allocation8 + $0x4c] ss:$16 sps:$4 sm:$0xff]  }
  0xa2   :  { %826 = vmatpush1.bf16.msra.mxu1 %v6424_v7  ;;  %681 = vmatprep.subr.bf16.mxu0 %v6425_v8  ;;  %v6473_v7 = vld [vmem:[#allocation8 + $0x40] ss:$16 sps:$4 sm:$0xff]   ;;  %v6476_v8 = vld [vmem:[#allocation8 + $0x48] ss:$16 sps:$4 sm:$0xff]  }
  0xa3   :  { %827 = vmatprep.subr.bf16.mxu1 %v6428_v9  ;;  %v6481_v9 = vld [vmem:[#allocation8 + $0x64] ss:$16 sps:$4 sm:$0xff]  }
  0xa5   :  { %682 = vmatpush1.bf16.msra.mxu0 %v6427_v10  ;;  %v6484_v10 = vld [vmem:[#allocation8 + $0x6c] ss:$16 sps:$4 sm:$0xff]  }
  0xa6   :  { %828 = vmatpush1.bf16.msra.mxu1 %v6430_v11  ;;  %683 = vmatprep.subr.bf16.mxu0 %v6431_v12  ;;  %v6479_v11 = vld [vmem:[#allocation8 + $0x60] ss:$16 sps:$4 sm:$0xff]   ;;  %v6482_v12 = vld [vmem:[#allocation8 + $0x68] ss:$16 sps:$4 sm:$0xff]  }
  0xa7   :  { %829 = vmatprep.subr.bf16.mxu1 %v6434_v13  ;;  %v6487_v13 = vld [vmem:[#allocation8 + $0x84] ss:$16 sps:$4 sm:$0xff]  }
  0xa9   :  { %684 = vmatpush1.bf16.msra.mxu0 %v6433_v14  ;;  %v6490_v14 = vld [vmem:[#allocation8 + $0x8c] ss:$16 sps:$4 sm:$0xff]  }
  0xaa   :  { %830 = vmatpush1.bf16.msra.mxu1 %v6436_v15  ;;  %685 = vmatprep.subr.bf16.mxu0 %v6437_v16  ;;  %v6485_v15 = vld [vmem:[#allocation8 + $0x80] ss:$16 sps:$4 sm:$0xff]   ;;  %v6488_v16 = vld [vmem:[#allocation8 + $0x88] ss:$16 sps:$4 sm:$0xff]  }
  0xab   :  { %831 = vmatprep.subr.bf16.mxu1 %v6440_v17  ;;  %v6493_v17 = vld [vmem:[#allocation8 + $0xa4] ss:$16 sps:$4 sm:$0xff]  }
  0xad   :  { %686 = vmatpush1.bf16.msra.mxu0 %v6439_v18  ;;  %v6496_v18 = vld [vmem:[#allocation8 + $0xac] ss:$16 sps:$4 sm:$0xff]  }
  0xae   :  { %832 = vmatpush1.bf16.msra.mxu1 %v6442_v19  ;;  %687 = vmatprep.subr.bf16.mxu0 %v6443_v20  ;;  %v6491_v19 = vld [vmem:[#allocation8 + $0xa0] ss:$16 sps:$4 sm:$0xff]   ;;  %v6494_v20 = vld [vmem:[#allocation8 + $0xa8] ss:$16 sps:$4 sm:$0xff]  }
  0xaf   :  { %833 = vmatprep.subr.bf16.mxu1 %v6446_v21  ;;  %v6499_v21 = vld [vmem:[#allocation8 + $0xc4] ss:$16 sps:$4 sm:$0xff]  }
  0xb1   :  { %688 = vmatpush1.bf16.msra.mxu0 %v6445_v22  ;;  %v6502_v22 = vld [vmem:[#allocation8 + $0xcc] ss:$16 sps:$4 sm:$0xff]  }
  0xb2   :  { %834 = vmatpush1.bf16.msra.mxu1 %v6448_v23  ;;  %730 = vmatprep.subr.bf16.mxu0 %v6451_v24  ;;  %v6497_v23 = vld [vmem:[#allocation8 + $0xc0] ss:$16 sps:$4 sm:$0xff]   ;;  %v6500_v24 = vld [vmem:[#allocation8 + $0xc8] ss:$16 sps:$4 sm:$0xff]  }
  0xb3   :  { %876 = vmatprep.subr.bf16.mxu1 %v6457_v25  ;;  %v6505_v25 = vld [vmem:[#allocation8 + $0xe4] ss:$16 sps:$4 sm:$0xff]  }
  0xe3   :  { %v145_v28 = vpop.permute.xlu0 %144 }
  0xe4   :  { %v147_v29 = vpop.permute.xlu1 %146  ;;  %v167_v40 = vsel %vm164_vm1, %v112_v31, %v145_v28  ;;  %v6509_v31 = vld [vmem:[#allocation8 + $0x100] ss:$16 sps:$4 sm:$0xff]  }
  0xe5   :  { %v171_v52 = vsel %vm164_vm1, %v113_v45, %v147_v29  ;;  %v6535_v45 = vld [vmem:[#allocation8 + $0x184] ss:$16 sps:$4 sm:$0xff]  }
  0xe7   :  { %v157_v33 = vpop.permute.xlu0 %156 }
  0xe8   :  { %v183_v35 = vsel %vm181_vm0, %v145_v28, %v157_v33  ;;  %v7423_v36 = vpop.permute.xlu1 %158  ;;  %v6506_v28 = vld [vmem:[#allocation8 + $0xe8] ss:$16 sps:$4 sm:$0xff]  }
  0xe9   :  { %689 = vmatprep.mubr.bf16.mxu0 %v183_v35  ;;  %835 = vmatprep.mubr.bf16.mxu1 %v183_v35  ;;  %v186_v41 = vsel %vm181_vm0, %v147_v29, %v7423_v36  ;;  %v6511_v29 = vld [vmem:[#allocation8 + $0x104] ss:$16 sps:$4 sm:$0xff]   ;;  %v6515_v35 = vld [vmem:[#allocation8 + $0x120] ss:$16 sps:$4 sm:$0xff]  }
  0xea   :  { %690 = vmatmul.mubr.bf16.vlgmr.msra.gmra.mrb[0].mxu0 %v167_v40  ;;  %836 = vmatmul.mubr.bf16.vlgmr.msra.gmra.mrb[0].mxu1 %v167_v40  ;;  %v6524_v40 = vld [vmem:[#allocation8 + $0x148] ss:$16 sps:$4 sm:$0xff]  }
  0xeb   :  { %731 = vmatpush1.bf16.msra.mxu0 %v6449_v30  ;;  %699 = vmatprep.mubr.bf16.mxu0 %v186_v41  ;;  %v149_v47 = vpop.permute.xlu0 %148  ;;  %v6514_v30 = vld [vmem:[#allocation8 + $0x10c] ss:$16 sps:$4 sm:$0xff]  }
  0xec   :  { %845 = vmatprep.mubr.bf16.mxu1 %v186_v41  ;;  %732 = vmatprep.subr.bf16.mxu0 %v6454_v32  ;;  %v7434_v46 = vpop.permute.xlu1 %160  ;;  %v175_v58 = vsel %vm164_vm1, %v114_v53, %v149_v47  ;;  %v6512_v32 = vld [vmem:[#allocation8 + $0x108] ss:$16 sps:$4 sm:$0xff]   ;;  %v6529_v41 = vld [vmem:[#allocation8 + $0x164] ss:$16 sps:$4 sm:$0xff]   ;;  %v6544_v53 = vld [vmem:[#allocation8 + $0x1ac] ss:$16 sps:$4 sm:$0xff]  }
  0xed   :  { %877 = vmatpush1.bf16.msra.mxu1 %v6455_v34  ;;  %v189_v51 = vsel %vm181_vm0, %v149_v47, %v7434_v46  ;;  %v6520_v34 = vld [vmem:[#allocation8 + $0x12c] ss:$16 sps:$4 sm:$0xff]   ;;  %v6533_v47 = vld [vmem:[#allocation8 + $0x180] ss:$16 sps:$4 sm:$0xff]  }
  0xee   :  { %878 = vmatprep.subr.bf16.mxu1 %v6460_v39  ;;  %v6521_v39 = vld [vmem:[#allocation8 + $0x140] ss:$16 sps:$4 sm:$0xff]  }
  0xef   :  { %733 = vmatpush1.bf16.msra.mxu0 %v6452_v42  ;;  %v151_v55 = vpop.permute.xlu0 %150  ;;  %v6532_v42 = vld [vmem:[#allocation8 + $0x16c] ss:$16 sps:$4 sm:$0xff]  }
  0xf0   :  { %4075 = vmatprep.subr.bf16.mxu0 %v6463_v43  ;;  %v7445_v54 = vpop.permute.xlu1 %162  ;;  %v179_v61 = vsel %vm164_vm1, %v115_v60, %v151_v55  ;;  %v6527_v43 = vld [vmem:[#allocation8 + $0x160] ss:$16 sps:$4 sm:$0xff]  }
  0xf1   :  { %879 = vmatpush1.bf16.msra.mxu1 %v6458_v44  ;;  %v192_v59 = vsel %vm181_vm0, %v151_v55, %v7445_v54  ;;  %v6530_v44 = vld [vmem:[#allocation8 + $0x168] ss:$16 sps:$4 sm:$0xff]   ;;  %v6545_v60 = vld [vmem:[#allocation8 + $0x1c0] ss:$16 sps:$4 sm:$0xff]  }
  0xf2   :  { %700 = vmatmul.mubr.bf16.gmra.mrb[4].mxu0 %v171_v52  ;;  %846 = vmatmul.mubr.bf16.gmra.mrb[4].mxu1 %v171_v52  ;;  %v6541_v52 = vld [vmem:[#allocation8 + $0x1a4] ss:$16 sps:$4 sm:$0xff]  }
  0xf3   :  { %709 = vmatprep.mubr.bf16.mxu0 %v189_v51  ;;  %855 = vmatprep.mubr.bf16.mxu1 %v189_v51  ;;  %v1016_v51 = vld [vmem:[#allocation2] sm:$0x80] }
  0xf4   :  { %4513 = vmatprep.subr.bf16.mxu1 %v6466_v50  ;;  %v1019_v50 = vld [vmem:[#allocation2 + $0x8] sm:$0x80]  ;;  %v1017_v55 = vsel %vm7471_vm5, 0, %v1016_v51 }
  0xf5   :  { %1018 = vst [vmem:[#allocation2] sm:$0x80] %v1017_v55 }
  0xfa   :  { %710 = vmatmul.mubr.bf16.gmra.mrb[8].mxu0 %v175_v58  ;;  %856 = vmatmul.mubr.bf16.gmra.mrb[8].mxu1 %v175_v58  ;;  %v6547_v58 = vld [vmem:[#allocation8 + $0x1c4] ss:$16 sps:$4 sm:$0xff]  }
  0xfb   :  { %719 = vmatprep.mubr.bf16.mxu0 %v192_v59  ;;  %865 = vmatprep.mubr.bf16.mxu1 %v192_v59  ;;  %v6550_v59 = vld [vmem:[#allocation8 + $0x1cc] ss:$16 sps:$4 sm:$0xff]  }
  0xfc   :  { %v1067_v51 = vld [vmem:[#allocation2] sm:$0x80] }
 0x102   :  { %720 = vmatmul.mubr.bf16.gmra.mrb[12].mxu0 %v179_v61  ;;  %866 = vmatmul.mubr.bf16.gmra.mrb[12].mxu1 %v179_v61  ;;  %v6548_v61 = vld [vmem:[#allocation8 + $0x1c8] ss:$16 sps:$4 sm:$0xff]  }
 0x103   :  { %762 = vmatprep.mubr.bf16.mxu0 %v7244_v62  ;;  %908 = vmatprep.mubr.bf16.mxu1 %v7244_v62 }
 0x10a   :  { %5615 = vmatmul.mubr.msk.bf16.vlgmr.msra.gmra.mrb[0].mxu0 %vm648_vm2, %v157_v33  ;;  %5619 = vmatmul.mubr.msk.bf16.vlgmr.msra.gmra.mrb[0].mxu1 %vm648_vm2, %v157_v33  ;;  %v6517_v33 = vld [vmem:[#allocation8 + $0x124] ss:$16 sps:$4 sm:$0xff]  }
 0x10b   :  { %772 = vmatprep.mubr.bf16.mxu0 %v7244_v62  ;;  %918 = vmatprep.mubr.bf16.mxu1 %v7244_v62 }
 0x10c   :  { %4076 = vmatpush1.bf16.msra.mxu0 %v6461_v63  ;;  %4514 = vmatpush1.bf16.msra.mxu1 %v6464_v0  ;;  %v6553_v0 = vld [vmem:[#allocation8 + $0x1e4] ss:$16 sps:$4 sm:$0xff]  }
 0x10d   :  { %4077 = vmatprep.subr.bf16.mxu0 %v6469_v1  ;;  %4515 = vmatprep.subr.bf16.mxu1 %v6472_v2  ;;  %v6556_v1 = vld [vmem:[#allocation8 + $0x1ec] ss:$16 sps:$4 sm:$0xff]   ;;  %v6551_v2 = vld [vmem:[#allocation8 + $0x1e0] ss:$16 sps:$4 sm:$0xff]  }
 0x110   :  { %4078 = vmatpush1.bf16.msra.mxu0 %v6467_v3  ;;  %4516 = vmatpush1.bf16.msra.mxu1 %v6470_v4  ;;  %v6554_v3 = vld [vmem:[#allocation8 + $0x1e8] ss:$16 sps:$4 sm:$0xff]   ;;  %v1022_v4 = vld [vmem:[#allocation2 + $0x10] sm:$0x80] }
 0x111   :  { %4079 = vmatprep.subr.bf16.mxu0 %v6475_v5  ;;  %4517 = vmatprep.subr.bf16.mxu1 %v6478_v6  ;;  %v6559_v5 = vld [vmem:[#allocation8 + $0x204] ss:$16 sps:$4 sm:$0xff]   ;;  %v6562_v6 = vld [vmem:[#allocation8 + $0x20c] ss:$16 sps:$4 sm:$0xff]  }
 0x112   :  { %5616 = vmatmul.mubr.msk.bf16.gmra.mrb[4].mxu0 %vm648_vm2, %v7423_v36  ;;  %5620 = vmatmul.mubr.msk.bf16.gmra.mrb[4].mxu1 %vm648_vm2, %v7423_v36  ;;  %v6518_v36 = vld [vmem:[#allocation8 + $0x128] ss:$16 sps:$4 sm:$0xff]  }
 0x113   :  { %782 = vmatprep.mubr.bf16.mxu0 %v7244_v62  ;;  %928 = vmatprep.mubr.bf16.mxu1 %v7244_v62 }
 0x114   :  { %4080 = vmatpush1.bf16.msra.mxu0 %v6473_v7  ;;  %4518 = vmatpush1.bf16.msra.mxu1 %v6476_v8  ;;  %v1023_v7 = vsel %vm7471_vm5, 0, %v1022_v4  ;;  %v1028_v8 = vld [vmem:[#allocation2 + $0x80] sm:$0x80] }
 0x115   :  { %4081 = vmatprep.subr.bf16.mxu0 %v6481_v9  ;;  %4519 = vmatprep.subr.bf16.mxu1 %v6484_v10  ;;  %1024 = vst [vmem:[#allocation2 + $0x10] sm:$0x80] %v1023_v7  ;;  %v1031_v9 = vld [vmem:[#allocation2 + $0x88] sm:$0x80]  ;;  %v1029_v10 = vsel %vm7471_vm5, 0, %v1028_v8 }
 0x116   :  { %1030 = vst [vmem:[#allocation2 + $0x80] sm:$0x80] %v1029_v10 }
 0x118   :  { %4082 = vmatpush1.bf16.msra.mxu0 %v6479_v11  ;;  %4520 = vmatpush1.bf16.msra.mxu1 %v6482_v12  ;;  %v1032_v11 = vsel %vm7471_vm5, 0, %v1031_v9  ;;  %v1034_v12 = vld [vmem:[#allocation2 + $0x90] sm:$0x80] }
 0x119   :  { %4083 = vmatprep.subr.bf16.mxu0 %v6487_v13  ;;  %4521 = vmatprep.subr.bf16.mxu1 %v6490_v14  ;;  %1033 = vst [vmem:[#allocation2 + $0x88] sm:$0x80] %v1032_v11  ;;  %v1037_v13 = vld [vmem:[#allocation2 + $0x98] sm:$0x80]  ;;  %v1035_v14 = vsel %vm7471_vm5, 0, %v1034_v12 }
 0x11a   :  { %5617 = vmatmul.mubr.msk.bf16.gmra.mrb[8].mxu0 %vm648_vm2, %v7434_v46  ;;  %5621 = vmatmul.mubr.msk.bf16.gmra.mrb[8].mxu1 %vm648_vm2, %v7434_v46  ;;  %v6538_v46 = vld [vmem:[#allocation8 + $0x18c] ss:$16 sps:$4 sm:$0xff]   ;;  %1036 = vst [vmem:[#allocation2 + $0x90] sm:$0x80] %v1035_v14 }
 0x11b   :  { %792 = vmatprep.mubr.bf16.mxu0 %v7244_v62  ;;  %938 = vmatprep.mubr.bf16.mxu1 %v7244_v62  ;;  %v1025_v62 = vld [vmem:[#allocation2 + $0x18] sm:$0x80] }
 0x11c   :  { %4084 = vmatpush1.bf16.msra.mxu0 %v6485_v15  ;;  %4522 = vmatpush1.bf16.msra.mxu1 %v6488_v16  ;;  %v1026_v63 = vsel %vm7471_vm5, 0, %v1025_v62  ;;  %v1038_v15 = vsel %vm7471_vm5, 0, %v1037_v13 }
 0x11d   :  { %4085 = vmatprep.subr.bf16.mxu0 %v6493_v17  ;;  %4523 = vmatprep.subr.bf16.mxu1 %v6496_v18  ;;  %1027 = vst [vmem:[#allocation2 + $0x18] sm:$0x80] %v1026_v63  ;;  %1039 = vst [vmem:[#allocation2 + $0x98] sm:$0x80] %v1038_v15  ;;  %v1046_v17 = vld [vmem:[#allocation2 + $0x68] sm:$0x1] }
 0x11e   :  { %v1043_v18 = vld [vmem:[#allocation2 + $0x60] sm:$0x1] }
 0x120   :  { %4086 = vmatpush1.bf16.msra.mxu0 %v6491_v19  ;;  %4524 = vmatpush1.bf16.msra.mxu1 %v6494_v20  ;;  %v1047_v19 = vsel %vm7492_vm8, 0, %v1046_v17  ;;  %v1044_v20 = vsel %vm7492_vm8, 0, %v1043_v18 }
 0x121   :  { %4087 = vmatprep.subr.bf16.mxu0 %v6499_v21  ;;  %4525 = vmatprep.subr.bf16.mxu1 %v6502_v22  ;;  %1048 = vst [vmem:[#allocation2 + $0x68] sm:$0x1] %v1047_v19  ;;  %1045 = vst [vmem:[#allocation2 + $0x60] sm:$0x1] %v1044_v20  ;;  %v1055_v21 = vld [vmem:[#allocation2 + $0xe0] sm:$0x1] }
 0x122   :  { %5618 = vmatmul.mubr.msk.bf16.gmra.mrb[12].mxu0 %vm648_vm2, %v7445_v54  ;;  %5622 = vmatmul.mubr.msk.bf16.gmra.mrb[12].mxu1 %vm648_vm2, %v7445_v54  ;;  %v1020_v54 = vsel %vm7471_vm5, 0, %v1019_v50  ;;  %v1058_v22 = vld [vmem:[#allocation2 + $0xe8] sm:$0x1] }
 0x123   :  { %1021 = vst [vmem:[#allocation2 + $0x8] sm:$0x80] %v1020_v54 }
 0x124   :  { %4088 = vmatpush1.bf16.msra.mxu0 %v6497_v23  ;;  %4526 = vmatpush1.bf16.msra.mxu1 %v6500_v24  ;;  %v1059_v23 = vsel %vm7492_vm8, 0, %v1058_v22  ;;  %v1056_v24 = vsel %vm7492_vm8, 0, %v1055_v21 }
 0x125   :  { %4089 = vmatprep.subr.bf16.mxu0 %v6505_v25  ;;  %4527 = vmatprep.subr.bf16.mxu1 %v6508_v26  ;;  %v1049_v25 = vld [vmem:[#allocation2 + $0x70] sm:$0x1]  ;;  %1060 = vst [vmem:[#allocation2 + $0xe8] sm:$0x1] %v1059_v23  ;;  %1057 = vst [vmem:[#allocation2 + $0xe0] sm:$0x1] %v1056_v24 }
 0x126   :  { %v1052_v26 = vld [vmem:[#allocation2 + $0x78] sm:$0x1] }
 0x128   :  { %4090 = vmatpush1.bf16.msra.mxu0 %v6503_v27  ;;  %4528 = vmatpush1.bf16.msra.mxu1 %v6506_v28  ;;  %v1050_v27 = vsel %vm7492_vm8, 0, %v1049_v25  ;;  %v1053_v28 = vsel %vm7492_vm8, 0, %v1052_v26 }
 0x129   :  { %4091 = vmatprep.subr.bf16.mxu0 %v6511_v29  ;;  %4529 = vmatprep.subr.bf16.mxu1 %v6514_v30  ;;  %1051 = vst [vmem:[#allocation2 + $0x70] sm:$0x1] %v1050_v27  ;;  %1054 = vst [vmem:[#allocation2 + $0x78] sm:$0x1] %v1053_v28  ;;  %v1061_v29 = vld [vmem:[#allocation2 + $0xf0] sm:$0x1]  ;;  %v268_v30 = vlaneseq }
 0x12c   :  { %4092 = vmatpush1.bf16.msra.mxu0 %v6509_v31  ;;  %4530 = vmatpush1.bf16.msra.mxu1 %v6512_v32  ;;  %v1064_v31 = vld [vmem:[#allocation2 + $0xf8] sm:$0x1]  ;;  %v1062_v32 = vsel %vm7492_vm8, 0, %v1061_v29 }
 0x12d   :  { %4093 = vmatprep.subr.bf16.mxu0 %v6517_v33  ;;  %4531 = vmatprep.subr.bf16.mxu1 %v6520_v34  ;;  %1063 = vst [vmem:[#allocation2 + $0xf0] sm:$0x1] %v1062_v32  ;;  %v1065_v33 = vsel %vm7492_vm8, 0, %v1064_v31  ;;  %v7512_v34 = vshrl.u32 %v268_v30, 7 }
 0x12e   :  { %1066 = vst [vmem:[#allocation2 + $0xf8] sm:$0x1] %v1065_v33 }
 0x130   :  { %4094 = vmatpush1.bf16.msra.mxu0 %v6515_v35  ;;  %4532 = vmatpush1.bf16.msra.mxu1 %v6518_v36  ;;  %v8181_v35 = vsub.s32 0, %v7512_v34  ;;  %v8180_v36 = vsub.s32 2, %v7512_v34 }
 0x131   :  { %4095 = vmatprep.subr.bf16.mxu0 %v6523_v37  ;;  %4533 = vmatprep.subr.bf16.mxu1 %v6526_v38  ;;  %v266_v37 = vld [vmem:[#allocation6] sm:$0xf]  ;;  %v8179_v38 = vsub.s32 1, %v7512_v34 }
 0x134   :  { %4096 = vmatpush1.bf16.msra.mxu0 %v6521_v39  ;;  %4534 = vmatpush1.bf16.msra.mxu1 %v6524_v40  ;;  %v8178_v39 = vsub.s32 3, %v7512_v34  ;;  %v7520_v40 = vrot.slane %v266_v37, %v8181_v35 }
 0x135   :  { %4097 = vmatprep.subr.bf16.mxu0 %v6529_v41  ;;  %4535 = vmatprep.subr.bf16.mxu1 %v6532_v42  ;;  %v7524_v41 = vrot.slane %v266_v37, %v8180_v36  ;;  %v7528_v42 = vrot.slane %v266_v37, %v8179_v38 }
 0x138   :  { %4098 = vmatpush1.bf16.msra.mxu0 %v6527_v43  ;;  %4536 = vmatpush1.bf16.msra.mxu1 %v6530_v44  ;;  %v7532_v43 = vrot.slane %v266_v37, %v8178_v39 }
 0x139   :  { %4099 = vmatprep.subr.bf16.mxu0 %v6535_v45  ;;  %4537 = vmatprep.subr.bf16.mxu1 %v6538_v46  ;;  %v1068_v46 = vld [vmem:[#allocation2 + $0x8] sm:$0x80] }
 0x13c   :  { %4100 = vmatpush1.bf16.msra.mxu0 %v6533_v47  ;;  %4538 = vmatpush1.bf16.msra.mxu1 %v6536_v48 }
 0x13d   :  { %4101 = vmatprep.subr.bf16.mxu0 %v6541_v52  ;;  %4539 = vmatprep.subr.bf16.mxu1 %v6544_v53  ;;  %v1070_v52 = vld [vmem:[#allocation2 + $0x18] sm:$0x80] }
 0x140   :  { %4102 = vmatpush1.bf16.msra.mxu0 %v6539_v56  ;;  %4540 = vmatpush1.bf16.msra.mxu1 %v6542_v57 }
 0x141   :  { %4103 = vmatprep.subr.bf16.mxu0 %v6547_v58  ;;  %4541 = vmatprep.subr.bf16.mxu1 %v6550_v59 }
 0x144   :  { %4104 = vmatpush1.bf16.msra.mxu0 %v6545_v60  ;;  %4542 = vmatpush1.bf16.msra.mxu1 %v6548_v61  ;;  %v1309_v61 = vshrl.u32 %v1068_v46, 16 }
 0x145   :  { %4105 = vmatprep.subr.bf16.mxu0 %v6553_v0  ;;  %4543 = vmatprep.subr.bf16.mxu1 %v6556_v1  ;;  %v1302_v0 = vshrl.u32 %v1067_v51, 16  ;;  %v1323_v1 = vshrl.u32 %v1070_v52, 16 }
 0x146   :  { %v1311_v16 = vrot.slane %v1309_v61, 7  ;;  %v6560_v61 = vld [vmem:[#allocation8 + $0x208] ss:$16 sps:$4 sm:$0xff]  }
 0x147   :  { %v1304_v22 = vrot.slane %v1302_v0, 7  ;;  %v7560_v28 = vrot.slane %v1323_v1, 7 }
 0x148   :  { %4106 = vmatpush1.bf16.msra.mxu0 %v6551_v2  ;;  %4544 = vmatpush1.bf16.msra.mxu1 %v6554_v3 }
 0x149   :  { %4148 = vmatprep.subr.bf16.mxu0 %v6559_v5  ;;  %4586 = vmatprep.subr.bf16.mxu1 %v6562_v6 }
 0x1dd   :  { %v764_v44 = vpop.f32.mrb[0].mxu0  ;;  %v910_v45 = vpop.f32.mrb[0].mxu1 }
 0x1de   :  { %v6084_v47 = vadd.f32 %v764_v44, %v7520_v40  ;;  %v6100_v48 = vadd.f32 %v910_v45, %v7524_v41  ;;  %v766_v49 = vpop.f32.mrb[1].mxu0  ;;  %v912_v50 = vpop.f32.mrb[1].mxu1 }
 0x1df   :  { %v6085_v53 = vadd.f32 %v766_v49, %v7528_v42  ;;  %v6101_v54 = vadd.f32 %v912_v50, %v7532_v43  ;;  %v768_v55 = vpop.f32.mrb[2].mxu0  ;;  %v914_v56 = vpop.f32.mrb[2].mxu1 }
 0x1e0   :  { %v6086_v57 = vadd.f32 %v768_v55, %v7520_v40  ;;  %v6102_v58 = vadd.f32 %v914_v56, %v7524_v41  ;;  %v770_v59 = vpop.f32.mrb[3].mxu0  ;;  %v916_v60 = vpop.f32.mrb[3].mxu1  ;;  %v949_v2 = vmax.f32 %v6084_v47, 0.0  ;;  %v951_v3 = vmax.f32 %v6100_v48, 0.0  ;;  %v7576_v56 = vld [vmem:[#allocation2 + $0x88] sm:$0x80] }
 0x1e1   :  { %v6087_v62 = vadd.f32 %v770_v59, %v7528_v42  ;;  %v6103_v63 = vadd.f32 %v916_v60, %v7532_v43  ;;  %v950_v6 = vmax.f32 %v6085_v53, 0.0  ;;  %v952_v7 = vmax.f32 %v6101_v54, 0.0  ;;  %v6557_v60 = vld [vmem:[#allocation8 + $0x200] ss:$16 sps:$4 sm:$0xff]  }
 0x1e2   :  { %v953_v4 = vmax.f32 %v6086_v57, 0.0  ;;  %v955_v5 = vmax.f32 %v6102_v58, 0.0 }
 0x1e3   :  { %v954_v8 = vmax.f32 %v6087_v62, 0.0  ;;  %v956_v9 = vmax.f32 %v6103_v63, 0.0 }
 0x1e4   :  { %v7542_v10 = vpack.c.bf16 %v953_v4, %v949_v2  ;;  %v7544_v11 = vpack.c.bf16 %v955_v5, %v951_v3  ;;  %v6565_v3 = vld [vmem:[#allocation8 + $0x224] ss:$16 sps:$4 sm:$0xff]   ;;  %v7592_v4 = vld [vmem:[#allocation2 + $0x80] sm:$0x80] }
 0x1e5   :  { %v7546_v12 = vpack.c.bf16 %v954_v8, %v950_v6  ;;  %v7548_v13 = vpack.c.bf16 %v956_v9, %v952_v7  ;;  %v774_v14 = vpop.f32.mrb[4].mxu0  ;;  %v920_v15 = vpop.f32.mrb[4].mxu1 }
 0x1e6   :  { %997 = vst [vmem:[#allocation2 + $0x20] sm:$0xff] %v7542_v10  ;;  %999 = vst [vmem:[#allocation2 + $0x30] sm:$0xff] %v7544_v11  ;;  %v6088_v17 = vadd.f32 %v774_v14, %v7520_v40  ;;  %v6104_v18 = vadd.f32 %v920_v15, %v7524_v41  ;;  %v776_v19 = vpop.f32.mrb[5].mxu0  ;;  %v922_v20 = vpop.f32.mrb[5].mxu1  ;;  %v1132_v21 = vshrl.u32 %v7542_v10, 16  ;;  %v1117_v37 = vshll.u32 %v7542_v10, 16 }
 0x1e7   :  { %998 = vst [vmem:[#allocation2 + $0x28] sm:$0xff] %v7546_v12  ;;  %1000 = vst [vmem:[#allocation2 + $0x38] sm:$0xff] %v7548_v13  ;;  %v6089_v23 = vadd.f32 %v776_v19, %v7528_v42  ;;  %v6105_v24 = vadd.f32 %v922_v20, %v7532_v43  ;;  %v778_v25 = vpop.f32.mrb[6].mxu0  ;;  %v924_v26 = vpop.f32.mrb[6].mxu1  ;;  %v1140_v27 = vshrl.u32 %v7546_v12, 16  ;;  %v1121_v33 = vshll.u32 %v7546_v12, 16 }
 0x1e8   :  { %v6090_v29 = vadd.f32 %v778_v25, %v7520_v40  ;;  %v6106_v30 = vadd.f32 %v924_v26, %v7524_v41  ;;  %v780_v31 = vpop.f32.mrb[7].mxu0  ;;  %v926_v32 = vpop.f32.mrb[7].mxu1  ;;  %v957_v44 = vmax.f32 %v6088_v17, 0.0  ;;  %v959_v45 = vmax.f32 %v6104_v18, 0.0  ;;  %v6568_v14 = vld [vmem:[#allocation8 + $0x22c] ss:$16 sps:$4 sm:$0xff]  }
 0x1e9   :  { %v6091_v46 = vadd.f32 %v780_v31, %v7528_v42  ;;  %v6107_v47 = vadd.f32 %v926_v32, %v7532_v43  ;;  %v7570_v50 = vrot.slane %v1140_v27, 7  ;;  %v7574_v51 = vrot.slane %v1132_v21, 7 }
 0x1ea   :  { %v961_v48 = vmax.f32 %v6090_v29, 0.0  ;;  %v963_v49 = vmax.f32 %v6106_v30, 0.0  ;;  %v958_v52 = vmax.f32 %v6089_v23, 0.0  ;;  %v960_v53 = vmax.f32 %v6105_v24, 0.0  ;;  %v6563_v30 = vld [vmem:[#allocation8 + $0x220] ss:$16 sps:$4 sm:$0xff]  }
 0x1eb   :  { %v962_v54 = vmax.f32 %v6091_v46, 0.0  ;;  %v964_v55 = vmax.f32 %v6107_v47, 0.0  ;;  %v1313_v59 = vor.u32 %v7570_v50, %v1121_v33  ;;  %v1306_v62 = vor.u32 %v7574_v51, %v1117_v37  ;;  %v6566_v47 = vld [vmem:[#allocation8 + $0x228] ss:$16 sps:$4 sm:$0xff]  }
 0x1ec   :  { %v7578_v57 = vpack.c.bf16 %v961_v48, %v957_v44  ;;  %v7580_v58 = vpack.c.bf16 %v963_v49, %v959_v45  ;;  %v1509_v15 = vshrl.u32 %v7576_v56, 16  ;;  %v1502_v32 = vshrl.u32 %v7592_v4, 16  ;;  %v6571_v48 = vld [vmem:[#allocation8 + $0x244] ss:$16 sps:$4 sm:$0xff]  }
 0x1ed   :  { %v7588_v63 = vpack.c.bf16 %v962_v54, %v958_v52  ;;  %v7590_v0 = vpack.c.bf16 %v964_v55, %v960_v53  ;;  %v784_v1 = vpop.f32.mrb[8].mxu0  ;;  %v930_v2 = vpop.f32.mrb[8].mxu1  ;;  %v1314_v9 = vsel %vm1041_vm6, %v1311_v16, %v1313_v59  ;;  %v1307_v23 = vsel %vm1041_vm6, %v1304_v22, %v1306_v62  ;;  %v6574_v55 = vld [vmem:[#allocation8 + $0x24c] ss:$16 sps:$4 sm:$0xff]  }
 0x1ee   :  { %1001 = vst [vmem:[#allocation2 + $0x40] sm:$0xff] %v7578_v57  ;;  %1003 = vst [vmem:[#allocation2 + $0x50] sm:$0xff] %v7580_v58  ;;  %v6092_v5 = vadd.f32 %v784_v1, %v7520_v40  ;;  %v6108_v6 = vadd.f32 %v930_v2, %v7524_v41  ;;  %v786_v7 = vpop.f32.mrb[9].mxu0  ;;  %v932_v8 = vpop.f32.mrb[9].mxu1  ;;  %4107 = vmatprep.mubr.bf16.mxu0 %v1314_v9  ;;  %4545 = vmatprep.mubr.bf16.mxu1 %v1314_v9  ;;  %v1164_v2 = vshrl.u32 %v7578_v57, 16 }
 0x1ef   :  { %1002 = vst [vmem:[#allocation2 + $0x48] sm:$0xff] %v7588_v63  ;;  %1004 = vst [vmem:[#allocation2 + $0x58] sm:$0xff] %v7590_v0  ;;  %v6093_v17 = vadd.f32 %v786_v7, %v7528_v42  ;;  %v6109_v18 = vadd.f32 %v932_v8, %v7532_v43  ;;  %v788_v19 = vpop.f32.mrb[10].mxu0  ;;  %v934_v20 = vpop.f32.mrb[10].mxu1  ;;  %v1167_v24 = vshrl.u32 %v7588_v63, 16  ;;  %4108 = vmatmul.mubr.bf16.vlgmr.msra.gmra.mrb[16].mxu0 %v1307_v23  ;;  %4546 = vmatmul.mubr.bf16.vlgmr.msra.gmra.mrb[16].mxu1 %v1307_v23 }
 0x1f0   :  { %v6094_v16 = vadd.f32 %v788_v19, %v7520_v40  ;;  %v6110_v25 = vadd.f32 %v934_v20, %v7524_v41  ;;  %v790_v26 = vpop.f32.mrb[11].mxu0  ;;  %v936_v29 = vpop.f32.mrb[11].mxu1  ;;  %v1144_v31 = vshll.u32 %v7588_v63, 16  ;;  %v965_v44 = vmax.f32 %v6092_v5, 0.0  ;;  %4149 = vmatpush1.bf16.msra.mxu0 %v6557_v60  ;;  %4587 = vmatpush1.bf16.msra.mxu1 %v6560_v61  ;;  %v6572_v7 = vld [vmem:[#allocation8 + $0x248] ss:$16 sps:$4 sm:$0xff]  }
 0x1f1   :  { %v967_v45 = vmax.f32 %v6108_v6, 0.0  ;;  %v6095_v46 = vadd.f32 %v790_v26, %v7528_v42  ;;  %v6111_v22 = vadd.f32 %v936_v29, %v7532_v43  ;;  %v966_v49 = vmax.f32 %v6093_v17, 0.0  ;;  %4150 = vmatprep.subr.bf16.mxu0 %v6565_v3  ;;  %4588 = vmatprep.subr.bf16.mxu1 %v6568_v14  ;;  %v6569_v6 = vld [vmem:[#allocation8 + $0x240] ss:$16 sps:$4 sm:$0xff]   ;;  %v6577_v20 = vld [vmem:[#allocation8 + $0x264] ss:$16 sps:$4 sm:$0xff]  }
 0x1f2   :  { %v969_v52 = vmax.f32 %v6094_v16, 0.0  ;;  %v971_v53 = vmax.f32 %v6110_v25, 0.0  ;;  %v1428_v54 = vrot.slane %v1167_v24, 7  ;;  %v968_v59 = vmax.f32 %v6109_v18, 0.0 }
 0x1f3   :  { %v970_v62 = vmax.f32 %v6095_v46, 0.0  ;;  %v972_v1 = vmax.f32 %v6111_v22, 0.0  ;;  %v1156_v3 = vshrl.u32 %v7548_v13, 16  ;;  %v1136_v18 = vshll.u32 %v7578_v57, 16 }
 0x1f4   :  { %v7615_v5 = vpack.c.bf16 %v969_v52, %v965_v44  ;;  %v7617_v60 = vpack.c.bf16 %v971_v53, %v967_v45  ;;  %v1429_v61 = vor.u32 %v1428_v54, %v1144_v31  ;;  %4151 = vmatpush1.bf16.msra.mxu0 %v6563_v30  ;;  %4589 = vmatpush1.bf16.msra.mxu1 %v6566_v47  ;;  %v1425_v19 = vrot.slane %v1164_v2, 7  ;;  %v6580_v30 = vld [vmem:[#allocation8 + $0x26c] ss:$16 sps:$4 sm:$0xff]   ;;  %v6575_v54 = vld [vmem:[#allocation8 + $0x260] ss:$16 sps:$4 sm:$0xff]  }
 0x1f5   :  { %v7622_v8 = vpack.c.bf16 %v970_v62, %v966_v49  ;;  %v7624_v9 = vpack.c.bf16 %v972_v1, %v968_v59  ;;  %v794_v14 = vpop.f32.mrb[12].mxu0  ;;  %v940_v17 = vpop.f32.mrb[12].mxu1  ;;  %4152 = vmatprep.subr.bf16.mxu0 %v6571_v48  ;;  %4590 = vmatprep.subr.bf16.mxu1 %v6574_v55  ;;  %v7637_v44 = vrot.slane %v1509_v15, 7  ;;  %v1129_v48 = vshll.u32 %v7548_v13, 16 }
 0x1f6   :  { %1005 = vst [vmem:[#allocation2 + $0xa0] sm:$0xff] %v7615_v5  ;;  %1007 = vst [vmem:[#allocation2 + $0xb0] sm:$0xff] %v7617_v60  ;;  %v6096_v23 = vadd.f32 %v794_v14, %v7520_v40  ;;  %v6112_v16 = vadd.f32 %v940_v17, %v7524_v41  ;;  %v796_v25 = vpop.f32.mrb[13].mxu0  ;;  %v942_v26 = vpop.f32.mrb[13].mxu1  ;;  %v1430_v29 = vsel %vm1041_vm6, %v7570_v50, %v1429_v61  ;;  %v7650_v55 = vrot.slane %v1156_v3, 7 }
 0x1f7   :  { %1006 = vst [vmem:[#allocation2 + $0xa8] sm:$0xff] %v7622_v8  ;;  %1008 = vst [vmem:[#allocation2 + $0xb8] sm:$0xff] %v7624_v9  ;;  %v6097_v45 = vadd.f32 %v796_v25, %v7528_v42  ;;  %v6113_v46 = vadd.f32 %v942_v26, %v7532_v43  ;;  %v798_v22 = vpop.f32.mrb[14].mxu0  ;;  %v944_v47 = vpop.f32.mrb[14].mxu1  ;;  %4117 = vmatprep.mubr.bf16.mxu0 %v1430_v29  ;;  %4555 = vmatprep.mubr.bf16.mxu1 %v1430_v29  ;;  %v6578_v14 = vld [vmem:[#allocation8 + $0x268] ss:$16 sps:$4 sm:$0xff]  }
 0x1f8   :  { %v1426_v50 = vor.u32 %v1425_v19, %v1136_v18  ;;  %v973_v56 = vmax.f32 %v6096_v23, 0.0  ;;  %v6098_v15 = vadd.f32 %v798_v22, %v7520_v40  ;;  %v6114_v49 = vadd.f32 %v944_v47, %v7524_v41  ;;  %v800_v52 = vpop.f32.mrb[15].mxu0  ;;  %v946_v53 = vpop.f32.mrb[15].mxu1  ;;  %4153 = vmatpush1.bf16.msra.mxu0 %v6569_v6  ;;  %4591 = vmatpush1.bf16.msra.mxu1 %v6572_v7  ;;  %v6583_v17 = vld [vmem:[#allocation8 + $0x284] ss:$16 sps:$4 sm:$0xff]  }
 0x1f9   :  { %v975_v59 = vmax.f32 %v6112_v16, 0.0  ;;  %v974_v62 = vmax.f32 %v6097_v45, 0.0  ;;  %v6099_v1 = vadd.f32 %v800_v52, %v7528_v42  ;;  %v6115_v61 = vadd.f32 %v946_v53, %v7532_v43  ;;  %4154 = vmatprep.subr.bf16.mxu0 %v6577_v20  ;;  %4592 = vmatprep.subr.bf16.mxu1 %v6580_v30  ;;  %v6586_v25 = vld [vmem:[#allocation8 + $0x28c] ss:$16 sps:$4 sm:$0xff]   ;;  %v6581_v45 = vld [vmem:[#allocation8 + $0x280] ss:$16 sps:$4 sm:$0xff]  }
 0x1fa   :  { %v977_v40 = vmax.f32 %v6098_v15, 0.0  ;;  %v979_v19 = vmax.f32 %v6114_v49, 0.0  ;;  %v1427_v41 = vsel %vm1041_vm6, %v7574_v51, %v1426_v50  ;;  %v1200_v23 = vshrl.u32 %v7622_v8, 16  ;;  %v6584_v50 = vld [vmem:[#allocation8 + $0x288] ss:$16 sps:$4 sm:$0xff]  }
 0x1fb   :  { %v976_v16 = vmax.f32 %v6113_v46, 0.0  ;;  %v978_v26 = vmax.f32 %v6099_v1, 0.0  ;;  %v980_v29 = vmax.f32 %v6115_v61, 0.0  ;;  %4118 = vmatmul.mubr.bf16.gmra.mrb[20].mxu0 %v1427_v41  ;;  %4556 = vmatmul.mubr.bf16.gmra.mrb[20].mxu1 %v1427_v41  ;;  %v1192_v42 = vshrl.u32 %v7615_v5, 16  ;;  %v6589_v53 = vld [vmem:[#allocation8 + $0x2a4] ss:$16 sps:$4 sm:$0xff]  }
 0x1fc   :  { %v7658_v43 = vpack.c.bf16 %v977_v40, %v973_v56  ;;  %v7660_v6 = vpack.c.bf16 %v979_v19, %v975_v59  ;;  %v1181_v7 = vshll.u32 %v7622_v8, 16  ;;  %v1512_v51 = vrot.slane %v1200_v23, 7  ;;  %4155 = vmatpush1.bf16.msra.mxu0 %v6575_v54  ;;  %4593 = vmatpush1.bf16.msra.mxu1 %v6578_v14  ;;  %v6592_v1 = vld [vmem:[#allocation8 + $0x2ac] ss:$16 sps:$4 sm:$0xff]  }
 0x1fd   :  { %v7665_v20 = vpack.c.bf16 %v978_v26, %v974_v62  ;;  %v7667_v30 = vpack.c.bf16 %v980_v29, %v976_v16  ;;  %v1177_v46 = vshll.u32 %v7615_v5, 16  ;;  %v1505_v22 = vrot.slane %v1192_v42, 7  ;;  %4156 = vmatprep.subr.bf16.mxu0 %v6583_v17  ;;  %4594 = vmatprep.subr.bf16.mxu1 %v6586_v25  ;;  %v6587_v25 = vld [vmem:[#allocation8 + $0x2a0] ss:$16 sps:$4 sm:$0xff]   ;;  %v6590_v16 = vld [vmem:[#allocation8 + $0x2a8] ss:$16 sps:$4 sm:$0xff]  }
 0x1fe   :  { %1009 = vst [vmem:[#allocation2 + $0xc0] sm:$0xff] %v7658_v43  ;;  %1011 = vst [vmem:[#allocation2 + $0xd0] sm:$0xff] %v7660_v6  ;;  %v1513_v47 = vor.u32 %v1512_v51, %v1181_v7  ;;  %v1504_v56 = vrot.slane %v1502_v32, 7  ;;  %v1224_v15 = vshrl.u32 %v7658_v43, 16  ;;  %v1327_v59 = vor.u32 %v7650_v55, %v1129_v48 }
 0x1ff   :  { %1010 = vst [vmem:[#allocation2 + $0xc8] sm:$0xff] %v7665_v20  ;;  %1012 = vst [vmem:[#allocation2 + $0xd8] sm:$0xff] %v7667_v30  ;;  %v1506_v52 = vor.u32 %v1505_v22, %v1177_v46  ;;  %v1227_v54 = vshrl.u32 %v7665_v20, 16  ;;  %v8186_v4 = vshrl.u32 %v7544_v11, 16  ;;  %v7691_v32 = vrot.slane %v1144_v31, 1 }
 0x200   :  { %v1514_v62 = vsel %vm1041_vm6, %v7637_v44, %v1513_v47  ;;  %v1196_v61 = vshll.u32 %v7658_v43, 16  ;;  %v1625_v14 = vrot.slane %v1224_v15, 7  ;;  %v1204_v17 = vshll.u32 %v7665_v20, 16  ;;  %4157 = vmatpush1.bf16.msra.mxu0 %v6581_v45  ;;  %4595 = vmatpush1.bf16.msra.mxu1 %v6584_v50  ;;  %v6598_v50 = vld [vmem:[#allocation8 + $0x2cc] ss:$16 sps:$4 sm:$0xff]  }
 0x201   :  { %4127 = vmatprep.mubr.bf16.mxu0 %v1514_v62  ;;  %4565 = vmatprep.mubr.bf16.mxu1 %v1514_v62  ;;  %v1628_v40 = vrot.slane %v1227_v54, 7  ;;  %v1160_v19 = vshll.u32 %v7590_v0, 16  ;;  %v1173_v31 = vshrl.u32 %v7590_v0, 16  ;;  %v7705_v44 = vrot.slane %v1136_v18, 1  ;;  %v6595_v62 = vld [vmem:[#allocation8 + $0x2c4] ss:$16 sps:$4 sm:$0xff]  }
 0x202   :  { %v1507_v41 = vsel %vm1041_vm6, %v1504_v56, %v1506_v52  ;;  %v1626_v26 = vor.u32 %v1625_v14, %v1196_v61  ;;  %v1170_v29 = vshrl.u32 %v7580_v58, 16  ;;  %v1328_v39 = vsel %vm1041_vm6, %v7560_v28, %v1327_v59  ;;  %4158 = vmatprep.subr.bf16.mxu0 %v6589_v53  ;;  %4596 = vmatprep.subr.bf16.mxu1 %v6592_v1  ;;  %v6593_v59 = vld [vmem:[#allocation8 + $0x2c0] ss:$16 sps:$4 sm:$0xff]  }
 0x203   :  { %4128 = vmatmul.mubr.bf16.gmra.mrb[24].mxu0 %v1507_v41  ;;  %4566 = vmatmul.mubr.bf16.gmra.mrb[24].mxu1 %v1507_v41  ;;  %v1629_v47 = vor.u32 %v1628_v40, %v1204_v17  ;;  %v7713_v18 = vrot.slane %v8186_v4, 7  ;;  %v1434_v45 = vrot.slane %v1173_v31, 7  ;;  %v1152_v52 = vshll.u32 %v7580_v58, 16  ;;  %v6631_v58 = vld [vmem:[#allocation8 + $0x384] ss:$16 sps:$4 sm:$0xff]  }
 0x204   :  { %v1627_v56 = vsel %vm1041_vm6, %v1505_v22, %v1626_v26  ;;  %v1431_v14 = vrot.slane %v1170_v29, 7  ;;  %v8182_v40 = vshrl.u32 %v7624_v9, 16  ;;  %v7723_v41 = vrot.slane %v1160_v19, 1  ;;  %4159 = vmatpush1.bf16.msra.mxu0 %v6587_v25  ;;  %4597 = vmatpush1.bf16.msra.mxu1 %v6590_v16  ;;  %v6596_v22 = vld [vmem:[#allocation8 + $0x2c8] ss:$16 sps:$4 sm:$0xff]  }
 0x205   :  { %v1630_v28 = vsel %vm1041_vm6, %v1512_v51, %v1629_v47  ;;  %v1435_v38 = vor.u32 %v1434_v45, %v1160_v19  ;;  %v8183_v36 = vshrl.u32 %v7617_v60, 16  ;;  %v7726_v53 = vrot.slane %v1204_v17, 1  ;;  %4160 = vmatprep.subr.bf16.mxu0 %v6595_v62  ;;  %4598 = vmatprep.subr.bf16.mxu1 %v6598_v50  ;;  %v6601_v17 = vld [vmem:[#allocation8 + $0x2e4] ss:$16 sps:$4 sm:$0xff]  }
 0x206   :  { %v7728_v1 = vrot.slane %v1196_v61, 1  ;;  %v1432_v26 = vor.u32 %v1431_v14, %v1152_v52  ;;  %v8184_v35 = vshrl.u32 %v7667_v30, 16  ;;  %4137 = vmatprep.mubr.bf16.mxu0 %v1630_v28  ;;  %v1220_v47 = vshll.u32 %v7667_v30, 16  ;;  %4575 = vmatprep.mubr.bf16.mxu1 %v1630_v28  ;;  %v6599_v28 = vld [vmem:[#allocation8 + $0x2e0] ss:$16 sps:$4 sm:$0xff]  }
 0x207   :  { %v7733_v51 = vsel %vm1041_vm6, %v7650_v55, %v1435_v38  ;;  %v8185_v25 = vshrl.u32 %v7660_v6, 16  ;;  %v7738_v61 = vrot.slane %v1152_v52, 1  ;;  %v7746_v62 = vrot.slane %v8182_v40, 7  ;;  %v6604_v55 = vld [vmem:[#allocation8 + $0x2ec] ss:$16 sps:$4 sm:$0xff]  }
 0x208   :  { %v7742_v16 = vsel %vm1041_vm6, %v7713_v18, %v1432_v26  ;;  %v1634_v38 = vrot.slane %v8184_v35, 7  ;;  %v7752_v45 = vrot.slane %v8183_v36, 7  ;;  %v8187_v50 = vshll.u32 %v7660_v6, 16  ;;  %4161 = vmatpush1.bf16.msra.mxu0 %v6593_v59  ;;  %4599 = vmatpush1.bf16.msra.mxu1 %v6596_v22  ;;  %v6602_v26 = vld [vmem:[#allocation8 + $0x2e8] ss:$16 sps:$4 sm:$0xff]  }
 0x209   :  { %v1631_v52 = vrot.slane %v8185_v25, 7  ;;  %v1123_v14 = vrot.slane %v1121_v33, 1  ;;  %v1119_v19 = vrot.slane %v1117_v37, 1  ;;  %v1169_v36 = vor.u32 %v1167_v24, %v7691_v32  ;;  %v6607_v25 = vld [vmem:[#allocation8 + $0x304] ss:$16 sps:$4 sm:$0xff]   ;;  %4162 = vmatprep.subr.bf16.mxu0 %v6601_v17  ;;  %4600 = vmatprep.subr.bf16.mxu1 %v6604_v55 }
 0x20a   :  { %v1635_v40 = vor.u32 %v1634_v38, %v1220_v47  ;;  %v1166_v35 = vor.u32 %v1164_v2, %v7705_v44  ;;  %v6610_v33 = vld [vmem:[#allocation8 + $0x30c] ss:$16 sps:$4 sm:$0xff]   ;;  %v7767_v59 = vrot.slane %v1220_v47, 1  ;;  %v6608_v47 = vld [vmem:[#allocation8 + $0x308] ss:$16 sps:$4 sm:$0xff]   ;;  %v8192_v0 = vshll.u32 %v7544_v11, 16 }
 0x20b   :  { %4138 = vmatmul.mubr.bf16.gmra.mrb[28].mxu0 %v1627_v56  ;;  %4576 = vmatmul.mubr.bf16.gmra.mrb[28].mxu1 %v1627_v56  ;;  %v1632_v22 = vor.u32 %v1631_v52, %v8187_v50  ;;  %v1142_v37 = vor.u32 %v1140_v27, %v1123_v14  ;;  %v1342_v38 = vshrl.u32 %v1123_v14, 16  ;;  %v1134_v57 = vor.u32 %v1132_v21, %v1119_v19  ;;  %v6605_v56 = vld [vmem:[#allocation8 + $0x300] ss:$16 sps:$4 sm:$0xff]   ;;  %v6616_v55 = vld [vmem:[#allocation8 + $0x32c] ss:$16 sps:$4 sm:$0xff]  }
 0x20c   :  { %4180 = vmatprep.mubr.bf16.mxu0 %v1328_v39  ;;  %4618 = vmatprep.mubr.bf16.mxu1 %v1328_v39  ;;  %v7775_v63 = vsel %vm1041_vm6, %v7746_v62, %v1635_v40  ;;  %v1330_v24 = vshrl.u32 %v1119_v19, 16  ;;  %v1446_v2 = vshrl.u32 %v1169_v36, 16  ;;  %v1449_v52 = vshll.u32 %v1169_v36, 16  ;;  %v6613_v40 = vld [vmem:[#allocation8 + $0x324] ss:$16 sps:$4 sm:$0xff]  }
 0x20d   :  { %v7781_v12 = vsel %vm1041_vm6, %v7752_v45, %v1632_v22  ;;  %v1147_v39 = vsel %vm1115_vm9, %v1142_v37, %v7691_v32  ;;  %v1344_v27 = vrot.slane %v1342_v38, 7  ;;  %4163 = vmatpush1.bf16.msra.mxu0 %v6599_v28  ;;  %4601 = vmatpush1.bf16.msra.mxu1 %v6602_v26  ;;  %v1139_v19 = vsel %vm1115_vm9, %v1134_v57, %v7705_v44 }
 0x20e   :  { %v1346_v10 = vshrl.u32 %v1147_v39, 16  ;;  %v1349_v21 = vshll.u32 %v1147_v39, 16  ;;  %v1332_v17 = vrot.slane %v1330_v24, 7  ;;  %4164 = vmatprep.subr.bf16.mxu0 %v6607_v25  ;;  %4602 = vmatprep.subr.bf16.mxu1 %v6610_v33  ;;  %v1334_v14 = vshrl.u32 %v1139_v19, 16  ;;  %v6611_v25 = vld [vmem:[#allocation8 + $0x320] ss:$16 sps:$4 sm:$0xff]  }
 0x20f   :  { %v1337_v22 = vshll.u32 %v1139_v19, 16  ;;  %v1448_v4 = vrot.slane %v1446_v2, 7  ;;  %v1438_v50 = vshrl.u32 %v1166_v35, 16  ;;  %v1441_v32 = vshll.u32 %v1166_v35, 16  ;;  %v6614_v33 = vld [vmem:[#allocation8 + $0x328] ss:$16 sps:$4 sm:$0xff]  }
 0x210   :  { %v1348_v49 = vrot.slane %v1346_v10, 7  ;;  %v1183_v36 = vrot.slane %v1181_v7, 1  ;;  %v1179_v28 = vrot.slane %v1177_v46, 1  ;;  %v1336_v26 = vrot.slane %v1334_v14, 7  ;;  %v6619_v46 = vld [vmem:[#allocation8 + $0x344] ss:$16 sps:$4 sm:$0xff]  }
 0x211   :  { %v1451_v37 = vor.u32 %v1449_v52, %v1448_v4  ;;  %v1440_v38 = vrot.slane %v1438_v50, 7  ;;  %v1229_v44 = vor.u32 %v1227_v54, %v7726_v53  ;;  %4165 = vmatpush1.bf16.msra.mxu0 %v6605_v56  ;;  %4603 = vmatpush1.bf16.msra.mxu1 %v6608_v47  ;;  %v6622_v4 = vld [vmem:[#allocation8 + $0x34c] ss:$16 sps:$4 sm:$0xff]   ;;  %v6620_v47 = vld [vmem:[#allocation8 + $0x348] ss:$16 sps:$4 sm:$0xff]  }
 0x212   :  { %v1351_v57 = vor.u32 %v1349_v21, %v1348_v49  ;;  %v1202_v35 = vor.u32 %v1200_v23, %v1183_v36  ;;  %v1542_v24 = vshrl.u32 %v1183_v36, 16  ;;  %v1194_v7 = vor.u32 %v1192_v42, %v1179_v28  ;;  %4166 = vmatprep.subr.bf16.mxu0 %v6613_v40  ;;  %4604 = vmatprep.subr.bf16.mxu1 %v6616_v55  ;;  %v6617_v42 = vld [vmem:[#allocation8 + $0x340] ss:$16 sps:$4 sm:$0xff]   ;;  %v6628_v55 = vld [vmem:[#allocation8 + $0x36c] ss:$16 sps:$4 sm:$0xff]  }
 0x213   :  { %v1339_v50 = vor.u32 %v1337_v22, %v1336_v26  ;;  %v7799_v20 = vsel %vm1041_vm6, %v1348_v49, %v1451_v37  ;;  %v1443_v54 = vor.u32 %v1441_v32, %v1440_v38  ;;  %v1530_v2 = vshrl.u32 %v1179_v28, 16 }
 0x214   :  { %v7802_v56 = vsel %vm1041_vm6, %v1344_v27, %v1351_v57  ;;  %v1207_v8 = vsel %vm1115_vm9, %v1202_v35, %v7726_v53  ;;  %v1544_v23 = vrot.slane %v1542_v24, 7  ;;  %v1199_v5 = vsel %vm1115_vm9, %v1194_v7, %v7728_v1  ;;  %v6625_v27 = vld [vmem:[#allocation8 + $0x364] ss:$16 sps:$4 sm:$0xff]  }
 0x215   :  { %v7809_v39 = vsel %vm1041_vm6, %v1332_v17, %v1339_v50  ;;  %v7812_v49 = vsel %vm1041_vm6, %v1336_v26, %v1443_v54  ;;  %v1546_v52 = vshrl.u32 %v1207_v8, 16  ;;  %v1549_v40 = vshll.u32 %v1207_v8, 16  ;;  %4167 = vmatpush1.bf16.msra.mxu0 %v6611_v25  ;;  %4605 = vmatpush1.bf16.msra.mxu1 %v6614_v33 }
 0x216   :  { %v1532_v10 = vrot.slane %v1530_v2, 7  ;;  %v1534_v21 = vshrl.u32 %v1199_v5, 16  ;;  %v1537_v53 = vshll.u32 %v1199_v5, 16  ;;  %v1646_v19 = vshrl.u32 %v1229_v44, 16  ;;  %4168 = vmatprep.subr.bf16.mxu0 %v6619_v46  ;;  %4606 = vmatprep.subr.bf16.mxu1 %v6622_v4  ;;  %v6629_v2 = vld [vmem:[#allocation8 + $0x380] ss:$16 sps:$4 sm:$0xff]  }
 0x217   :  { %v1548_v14 = vrot.slane %v1546_v52, 7  ;;  %v1649_v22 = vshll.u32 %v1229_v44, 16  ;;  %v1226_v17 = vor.u32 %v1224_v15, %v7728_v1  ;;  %v1131_v32 = vrot.slane %v1129_v48, 1  ;;  %v6623_v48 = vld [vmem:[#allocation8 + $0x360] ss:$16 sps:$4 sm:$0xff]  }
 0x218   :  { %v1536_v36 = vrot.slane %v1534_v21, 7  ;;  %v1648_v28 = vrot.slane %v1646_v19, 7  ;;  %v1175_v26 = vor.u32 %v1173_v31, %v7723_v41  ;;  %v7825_v37 = vor.u32 %v1170_v29, %v7738_v61  ;;  %v6626_v15 = vld [vmem:[#allocation8 + $0x368] ss:$16 sps:$4 sm:$0xff]   ;;  %v6634_v29 = vld [vmem:[#allocation8 + $0x38c] ss:$16 sps:$4 sm:$0xff]  }
 0x219   :  { %v1551_v38 = vor.u32 %v1549_v40, %v1548_v14  ;;  %v1638_v44 = vshrl.u32 %v1226_v17, 16  ;;  %v1641_v25 = vshll.u32 %v1226_v17, 16  ;;  %v1158_v43 = vor.u32 %v1156_v3, %v1131_v32  ;;  %4169 = vmatpush1.bf16.msra.mxu0 %v6617_v42  ;;  %4607 = vmatpush1.bf16.msra.mxu1 %v6620_v47  ;;  %v6637_v21 = vld [vmem:[#allocation8 + $0x3a4] ss:$16 sps:$4 sm:$0xff]  }
 0x21a   :  { %v1539_v1 = vor.u32 %v1537_v53, %v1536_v36  ;;  %v1651_v33 = vor.u32 %v1649_v22, %v1648_v28  ;;  %v1366_v57 = vshrl.u32 %v1131_v32, 16  ;;  %v1127_v31 = vrot.slane %v8192_v0, 1  ;;  %4170 = vmatprep.subr.bf16.mxu0 %v6625_v27  ;;  %4608 = vmatprep.subr.bf16.mxu1 %v6628_v55  ;;  %v6640_v53 = vld [vmem:[#allocation8 + $0x3ac] ss:$16 sps:$4 sm:$0xff]  }
 0x21b   :  { %v7832_v35 = vsel %vm1041_vm6, %v1544_v23, %v1551_v38  ;;  %v1640_v24 = vrot.slane %v1638_v44, 7  ;;  %v1163_v13 = vsel %vm1115_vm9, %v1158_v43, %v7723_v41  ;;  %v1462_v3 = vshrl.u32 %v1175_v26, 16  ;;  %v6632_v41 = vld [vmem:[#allocation8 + $0x388] ss:$16 sps:$4 sm:$0xff]   ;;  %v6646_v0 = vld [vmem:[#allocation8 + $0x3cc] ss:$16 sps:$4 sm:$0xff]  }
 0x21c   :  { %v8193_v7 = vshll.u32 %v7660_v6, 16  ;;  %v7839_v4 = vsel %vm1041_vm6, %v1532_v10, %v1539_v1  ;;  %v7842_v50 = vsel %vm1041_vm6, %v1548_v14, %v1651_v33  ;;  %v1370_v54 = vshrl.u32 %v1163_v13, 16  ;;  %v6638_v1 = vld [vmem:[#allocation8 + $0x3a8] ss:$16 sps:$4 sm:$0xff]  }
 0x21d   :  { %v1185_v8 = vshll.u32 %v7617_v60, 16  ;;  %v1643_v23 = vor.u32 %v1641_v25, %v1640_v24  ;;  %v1373_v5 = vshll.u32 %v1163_v13, 16  ;;  %v8194_v42 = vshrl.u32 %v7544_v11, 16  ;;  %4171 = vmatpush1.bf16.msra.mxu0 %v6623_v48  ;;  %4609 = vmatpush1.bf16.msra.mxu1 %v6626_v15 }
 0x21e   :  { %v1214_v46 = vrot.slane %v8193_v7, 1  ;;  %v1372_v52 = vrot.slane %v1370_v54, 7  ;;  %v1464_v40 = vrot.slane %v1462_v3, 7  ;;  %v1465_v27 = vshll.u32 %v1175_v26, 16  ;;  %4172 = vmatprep.subr.bf16.mxu0 %v6631_v58  ;;  %4610 = vmatprep.subr.bf16.mxu1 %v6634_v29  ;;  %v6641_v54 = vld [vmem:[#allocation8 + $0x3c0] ss:$16 sps:$4 sm:$0xff]  }
 0x21f   :  { %v1150_v47 = vor.u32 %v8194_v42, %v1127_v31  ;;  %v1454_v10 = vshrl.u32 %v7825_v37, 16  ;;  %v7849_v19 = vsel %vm1041_vm6, %v1536_v36, %v1643_v23  ;;  %v1368_v55 = vrot.slane %v1366_v57, 7 }
 0x220   :  { %v1354_v22 = vshrl.u32 %v1127_v31, 16  ;;  %v1375_v17 = vor.u32 %v1373_v5, %v1372_v52  ;;  %v1467_v32 = vor.u32 %v1465_v27, %v1464_v40  ;;  %v8195_v28 = vshrl.u32 %v7667_v30, 16 }
 0x221   :  { %v1155_v14 = vsel %vm1115_vm9, %v1150_v47, %v7738_v61  ;;  %v8196_v38 = vshrl.u32 %v7660_v6, 16  ;;  %v1456_v43 = vrot.slane %v1454_v10, 7  ;;  %v1457_v36 = vshll.u32 %v7825_v37, 16  ;;  %4173 = vmatpush1.bf16.msra.mxu0 %v6629_v2  ;;  %4611 = vmatpush1.bf16.msra.mxu1 %v6632_v41  ;;  %v6635_v61 = vld [vmem:[#allocation8 + $0x3a0] ss:$16 sps:$4 sm:$0xff]  }
 0x222   :  { %v7856_v26 = vor.u32 %v8195_v28, %v7767_v59  ;;  %v1358_v25 = vshrl.u32 %v1155_v14, 16  ;;  %v8197_v48 = vshll.u32 %v7624_v9, 16  ;;  %v7866_v33 = vsel %vm1041_vm6, %v1368_v55, %v1375_v17  ;;  %4174 = vmatprep.subr.bf16.mxu0 %v6637_v21  ;;  %4612 = vmatprep.subr.bf16.mxu1 %v6640_v53  ;;  %v6643_v37 = vld [vmem:[#allocation8 + $0x3c4] ss:$16 sps:$4 sm:$0xff]   ;;  %v1069_v2 = vld [vmem:[#allocation2 + $0x10] sm:$0x80] }
 0x223   :  { %v7860_v44 = vor.u32 %v8196_v38, %v1214_v46  ;;  %v1361_v30 = vshll.u32 %v1155_v14, 16  ;;  %v7869_v57 = vsel %vm1041_vm6, %v1372_v52, %v1467_v32  ;;  %v1187_v6 = vrot.slane %v1185_v8, 1  ;;  %v6644_v41 = vld [vmem:[#allocation8 + $0x3c8] ss:$16 sps:$4 sm:$0xff]   ;;  %v6649_v52 = vld [vmem:[#allocation8 + $0x3e4] ss:$16 sps:$4 sm:$0xff]  }
 0x224   :  { %v1191_v15 = vrot.slane %v8197_v48, 1  ;;  %v1360_v31 = vrot.slane %v1358_v25, 7  ;;  %v1459_v58 = vor.u32 %v1457_v36, %v1456_v43  ;;  %v8198_v29 = vshrl.u32 %v7624_v9, 16  ;;  %v6652_v21 = vld [vmem:[#allocation8 + $0x3ec] ss:$16 sps:$4 sm:$0xff]  }
 0x225   :  { %v1662_v13 = vshrl.u32 %v7856_v26, 16  ;;  %v8199_v3 = vshrl.u32 %v7617_v60, 16  ;;  %v1356_v23 = vrot.slane %v1354_v22, 7  ;;  %4175 = vmatpush1.bf16.msra.mxu0 %v6635_v61  ;;  %4613 = vmatpush1.bf16.msra.mxu1 %v6638_v1  ;;  %v1554_v55 = vshrl.u32 %v1187_v6, 16  ;;  %v6647_v43 = vld [vmem:[#allocation8 + $0x3e0] ss:$16 sps:$4 sm:$0xff]  }
 0x226   :  { %v1218_v24 = vor.u32 %v8198_v29, %v1191_v15  ;;  %v1363_v5 = vor.u32 %v1361_v30, %v1360_v31  ;;  %v7879_v42 = vsel %vm1041_vm6, %v1360_v31, %v1459_v58  ;;  %v1566_v40 = vshrl.u32 %v1191_v15, 16  ;;  %4176 = vmatprep.subr.bf16.mxu0 %v6643_v37  ;;  %4614 = vmatprep.subr.bf16.mxu1 %v6646_v0  ;;  %v6655_v15 = vld [vmem:[#allocation8 + $0x404] ss:$16 sps:$4 sm:$0xff]   ;;  %v6658_v61 = vld [vmem:[#allocation8 + $0x40c] ss:$16 sps:$4 sm:$0xff]  }
 0x227   :  { %v1210_v7 = vor.u32 %v8199_v3, %v1187_v6  ;;  %v1664_v22 = vrot.slane %v1662_v13, 7  ;;  %v1316_v17 = vshrl.u32 %v1069_v2, 16  ;;  %v1665_v25 = vshll.u32 %v7856_v26, 16  ;;  %v6661_v2 = vld [vmem:[#allocation8 + $0x424] ss:$16 sps:$4 sm:$0xff]  }
 0x228   :  { %v1223_v47 = vsel %vm1115_vm9, %v1218_v24, %v7767_v59  ;;  %v7885_v53 = vsel %vm1041_vm6, %v1356_v23, %v1363_v5  ;;  %v1568_v36 = vrot.slane %v1566_v40, 7  ;;  %v1654_v48 = vshrl.u32 %v7860_v44, 16  ;;  %v6664_v23 = vld [vmem:[#allocation8 + $0x42c] ss:$16 sps:$4 sm:$0xff]   ;;  %v6667_v40 = vld [vmem:[#allocation8 + $0x444] ss:$16 sps:$4 sm:$0xff]  }
 0x229   :  { %v1570_v27 = vshrl.u32 %v1223_v47, 16  ;;  %v1215_v10 = vsel %vm1115_vm9, %v1210_v7, %v1214_v46  ;;  %v1573_v32 = vshll.u32 %v1223_v47, 16  ;;  %4177 = vmatpush1.bf16.msra.mxu0 %v6641_v54  ;;  %4615 = vmatpush1.bf16.msra.mxu1 %v6644_v41  ;;  %v6650_v46 = vld [vmem:[#allocation8 + $0x3e8] ss:$16 sps:$4 sm:$0xff]   ;;  %v1556_v30 = vrot.slane %v1554_v55, 7 }
 0x22a   :  { %v1558_v14 = vshrl.u32 %v1215_v10, 16  ;;  %v1561_v38 = vshll.u32 %v1215_v10, 16  ;;  %4178 = vmatprep.subr.bf16.mxu0 %v6649_v52  ;;  %4616 = vmatprep.subr.bf16.mxu1 %v6652_v21  ;;  %v1667_v37 = vor.u32 %v1665_v25, %v1664_v22  ;;  %v1318_v0 = vrot.slane %v1316_v17, 7  ;;  %v6653_v7 = vld [vmem:[#allocation8 + $0x400] ss:$16 sps:$4 sm:$0xff]  }
 0x22b   :  { %v1572_v59 = vrot.slane %v1570_v27, 7  ;;  %v8200_v31 = vshll.u32 %v7544_v11, 16  ;;  %v1657_v58 = vshll.u32 %v7860_v44, 16  ;;  %v1656_v3 = vrot.slane %v1654_v48, 7  ;;  %v1082_v54 = vld [vmem:[#allocation2 + $0x98] sm:$0x80] }
 0x22c   :  { %v1560_v28 = vrot.slane %v1558_v14, 7  ;;  %v6656_v11 = vld [vmem:[#allocation8 + $0x408] ss:$16 sps:$4 sm:$0xff]   ;;  %v1523_v5 = vshrl.u32 %v1082_v54, 16  ;;  %v6659_v41 = vld [vmem:[#allocation8 + $0x420] ss:$16 sps:$4 sm:$0xff]  }
 0x22d   :  { %v1575_v1 = vor.u32 %v1573_v32, %v1572_v59  ;;  %v1320_v26 = vor.u32 %v7713_v18, %v8200_v31  ;;  %v7900_v13 = vsel %vm1041_vm6, %v1572_v59, %v1667_v37  ;;  %4179 = vmatpush1.bf16.msra.mxu0 %v6647_v43  ;;  %4617 = vmatpush1.bf16.msra.mxu1 %v6650_v46  ;;  %v6662_v52 = vld [vmem:[#allocation8 + $0x428] ss:$16 sps:$4 sm:$0xff]   ;;  %v6670_v27 = vld [vmem:[#allocation8 + $0x44c] ss:$16 sps:$4 sm:$0xff]   ;;  %v8201_v21 = vshll.u32 %v7624_v9, 16 }
 0x22e   :  { %v1563_v6 = vor.u32 %v1561_v38, %v1560_v28  ;;  %4221 = vmatprep.subr.bf16.mxu0 %v6655_v15  ;;  %4659 = vmatprep.subr.bf16.mxu1 %v6658_v61  ;;  %v1659_v18 = vor.u32 %v1657_v58, %v1656_v3  ;;  %v1525_v10 = vrot.slane %v1523_v5, 7  ;;  %v1081_v14 = vld [vmem:[#allocation2 + $0x90] sm:$0x80]  ;;  %v6668_v17 = vld [vmem:[#allocation8 + $0x448] ss:$16 sps:$4 sm:$0xff]   ;;  %v1520_v43 = vor.u32 %v7752_v45, %v1185_v8 }
 0x22f   :  { %v7894_v29 = vsel %vm1041_vm6, %v1568_v36, %v1575_v1  ;;  %v1321_v44 = vsel %vm1041_vm6, %v1318_v0, %v1320_v26  ;;  %v1527_v55 = vor.u32 %v7746_v62, %v8201_v21  ;;  %v6665_v22 = vld [vmem:[#allocation8 + $0x440] ss:$16 sps:$4 sm:$0xff]   ;;  %v6673_v32 = vld [vmem:[#allocation8 + $0x464] ss:$16 sps:$4 sm:$0xff]   ;;  %v1516_v59 = vshrl.u32 %v1081_v14, 16 }
 0x230   :  { %v7897_v24 = vsel %vm1041_vm6, %v1556_v30, %v1563_v6  ;;  %4181 = vmatmul.mubr.bf16.vlgmr.msra.gmra.mrb[16].mxu0 %v1321_v44  ;;  %4619 = vmatmul.mubr.bf16.vlgmr.msra.gmra.mrb[16].mxu1 %v1321_v44  ;;  %v7904_v47 = vsel %vm1041_vm6, %v1560_v28, %v1659_v18  ;;  %v6671_v9 = vld [vmem:[#allocation8 + $0x460] ss:$16 sps:$4 sm:$0xff]   ;;  %v6674_v62 = vld [vmem:[#allocation8 + $0x468] ss:$16 sps:$4 sm:$0xff]   ;;  %v6679_v38 = vld [vmem:[#allocation8 + $0x484] ss:$16 sps:$4 sm:$0xff]  }
 0x231   :  { %4190 = vmatprep.mubr.bf16.mxu0 %v7733_v51  ;;  %4222 = vmatpush1.bf16.msra.mxu0 %v6653_v7  ;;  %v1528_v28 = vsel %vm1041_vm6, %v1525_v10, %v1527_v55  ;;  %v1518_v25 = vrot.slane %v1516_v59, 7  ;;  %v6682_v46 = vld [vmem:[#allocation8 + $0x48c] ss:$16 sps:$4 sm:$0xff]   ;;  %v6677_v36 = vld [vmem:[#allocation8 + $0x480] ss:$16 sps:$4 sm:$0xff]  }
 0x232   :  { %4628 = vmatprep.mubr.bf16.mxu1 %v7733_v51  ;;  %4660 = vmatpush1.bf16.msra.mxu1 %v6656_v11  ;;  %v6676_v51 = vld [vmem:[#allocation8 + $0x46c] ss:$16 sps:$4 sm:$0xff]   ;;  %v6685_v15 = vld [vmem:[#allocation8 + $0x4a4] ss:$16 sps:$4 sm:$0xff]   ;;  %v6683_v1 = vld [vmem:[#allocation8 + $0x4a0] ss:$16 sps:$4 sm:$0xff]  }
 0x233   :  { %4223 = vmatprep.subr.bf16.mxu0 %v6661_v2  ;;  %4661 = vmatprep.subr.bf16.mxu1 %v6664_v23  ;;  %v1521_v48 = vsel %vm1041_vm6, %v1518_v25, %v1520_v43  ;;  %v6688_v61 = vld [vmem:[#allocation8 + $0x4ac] ss:$16 sps:$4 sm:$0xff]   ;;  %v6686_v60 = vld [vmem:[#allocation8 + $0x4a8] ss:$16 sps:$4 sm:$0xff]   ;;  %v6691_v45 = vld [vmem:[#allocation8 + $0x4c4] ss:$16 sps:$4 sm:$0xff]  }
 0x234   :  { %v6694_v8 = vld [vmem:[#allocation8 + $0x4cc] ss:$16 sps:$4 sm:$0xff]   ;;  %v6689_v30 = vld [vmem:[#allocation8 + $0x4c0] ss:$16 sps:$4 sm:$0xff]   ;;  %v6692_v6 = vld [vmem:[#allocation8 + $0x4c8] ss:$16 sps:$4 sm:$0xff]  }
 0x235   :  { %4224 = vmatpush1.bf16.msra.mxu0 %v6659_v41  ;;  %v6697_v37 = vld [vmem:[#allocation8 + $0x4e4] ss:$16 sps:$4 sm:$0xff]   ;;  %v6700_v0 = vld [vmem:[#allocation8 + $0x4ec] ss:$16 sps:$4 sm:$0xff]   ;;  %v6698_v31 = vld [vmem:[#allocation8 + $0x4e8] ss:$16 sps:$4 sm:$0xff]  }
 0x236   :  { %4662 = vmatpush1.bf16.msra.mxu1 %v6662_v52  ;;  %4225 = vmatprep.subr.bf16.mxu0 %v6667_v40  ;;  %v6703_v26 = vld [vmem:[#allocation8 + $0x504] ss:$16 sps:$4 sm:$0xff]   ;;  %v6706_v58 = vld [vmem:[#allocation8 + $0x50c] ss:$16 sps:$4 sm:$0xff]   ;;  %v6701_v3 = vld [vmem:[#allocation8 + $0x500] ss:$16 sps:$4 sm:$0xff]  }
 0x237   :  { %4663 = vmatprep.subr.bf16.mxu1 %v6670_v27  ;;  %v6704_v7 = vld [vmem:[#allocation8 + $0x508] ss:$16 sps:$4 sm:$0xff]   ;;  %v6709_v54 = vld [vmem:[#allocation8 + $0x524] ss:$16 sps:$4 sm:$0xff]   ;;  %v6707_v11 = vld [vmem:[#allocation8 + $0x520] ss:$16 sps:$4 sm:$0xff]  }
 0x238   :  { %4191 = vmatmul.mubr.bf16.gmra.mrb[20].mxu0 %v7742_v16  ;;  %4629 = vmatmul.mubr.bf16.gmra.mrb[20].mxu1 %v7742_v16  ;;  %v6680_v16 = vld [vmem:[#allocation8 + $0x488] ss:$16 sps:$4 sm:$0xff]   ;;  %v6715_v44 = vld [vmem:[#allocation8 + $0x544] ss:$16 sps:$4 sm:$0xff]   ;;  %v6713_v2 = vld [vmem:[#allocation8 + $0x540] ss:$16 sps:$4 sm:$0xff]  }
 0x239   :  { %4200 = vmatprep.mubr.bf16.mxu0 %v1528_v28  ;;  %4226 = vmatpush1.bf16.msra.mxu0 %v6665_v22  ;;  %v6710_v18 = vld [vmem:[#allocation8 + $0x528] ss:$16 sps:$4 sm:$0xff]   ;;  %v6721_v5 = vld [vmem:[#allocation8 + $0x564] ss:$16 sps:$4 sm:$0xff]   ;;  %v6724_v41 = vld [vmem:[#allocation8 + $0x56c] ss:$16 sps:$4 sm:$0xff]  }
 0x23a   :  { %4638 = vmatprep.mubr.bf16.mxu1 %v1528_v28  ;;  %4664 = vmatpush1.bf16.msra.mxu1 %v6668_v17  ;;  %v6716_v23 = vld [vmem:[#allocation8 + $0x548] ss:$16 sps:$4 sm:$0xff]   ;;  %v6719_v52 = vld [vmem:[#allocation8 + $0x560] ss:$16 sps:$4 sm:$0xff]   ;;  %v6727_v27 = vld [vmem:[#allocation8 + $0x584] ss:$16 sps:$4 sm:$0xff]  }
 0x23b   :  { %4227 = vmatprep.subr.bf16.mxu0 %v6673_v32  ;;  %4665 = vmatprep.subr.bf16.mxu1 %v6676_v51  ;;  %v6722_v40 = vld [vmem:[#allocation8 + $0x568] ss:$16 sps:$4 sm:$0xff]   ;;  %v6730_v10 = vld [vmem:[#allocation8 + $0x58c] ss:$16 sps:$4 sm:$0xff]   ;;  %v6725_v21 = vld [vmem:[#allocation8 + $0x580] ss:$16 sps:$4 sm:$0xff]  }
 0x23c   :  { %v6728_v55 = vld [vmem:[#allocation8 + $0x588] ss:$16 sps:$4 sm:$0xff]   ;;  %v6733_v14 = vld [vmem:[#allocation8 + $0x5a4] ss:$16 sps:$4 sm:$0xff]   ;;  %v6736_v22 = vld [vmem:[#allocation8 + $0x5ac] ss:$16 sps:$4 sm:$0xff]  }
 0x23d   :  { %4228 = vmatpush1.bf16.msra.mxu0 %v6671_v9  ;;  %v6731_v17 = vld [vmem:[#allocation8 + $0x5a0] ss:$16 sps:$4 sm:$0xff]   ;;  %v6734_v32 = vld [vmem:[#allocation8 + $0x5a8] ss:$16 sps:$4 sm:$0xff]   ;;  %v6739_v51 = vld [vmem:[#allocation8 + $0x5c4] ss:$16 sps:$4 sm:$0xff]  }
 0x23e   :  { %4666 = vmatpush1.bf16.msra.mxu1 %v6674_v62  ;;  %4229 = vmatprep.subr.bf16.mxu0 %v6679_v38  ;;  %v6742_v59 = vld [vmem:[#allocation8 + $0x5cc] ss:$16 sps:$4 sm:$0xff]   ;;  %v6737_v28 = vld [vmem:[#allocation8 + $0x5c0] ss:$16 sps:$4 sm:$0xff]   ;;  %v6740_v9 = vld [vmem:[#allocation8 + $0x5c8] ss:$16 sps:$4 sm:$0xff]  }
 0x23f   :  { %4667 = vmatprep.subr.bf16.mxu1 %v6682_v46  ;;  %v6745_v62 = vld [vmem:[#allocation8 + $0x5e4] ss:$16 sps:$4 sm:$0xff]   ;;  %v6748_v38 = vld [vmem:[#allocation8 + $0x5ec] ss:$16 sps:$4 sm:$0xff]   ;;  %v6743_v25 = vld [vmem:[#allocation8 + $0x5e0] ss:$16 sps:$4 sm:$0xff]  }
 0x240   :  { %4201 = vmatmul.mubr.bf16.gmra.mrb[24].mxu0 %v1521_v48  ;;  %4639 = vmatmul.mubr.bf16.gmra.mrb[24].mxu1 %v1521_v48  ;;  %v6746_v43 = vld [vmem:[#allocation8 + $0x5e8] ss:$16 sps:$4 sm:$0xff]   ;;  %v6751_v46 = vld [vmem:[#allocation8 + $0x604] ss:$16 sps:$4 sm:$0xff]  }
 0x241   :  { %4210 = vmatprep.mubr.bf16.mxu0 %v7775_v63  ;;  %4230 = vmatpush1.bf16.msra.mxu0 %v6677_v36  ;;  %v6754_v36 = vld [vmem:[#allocation8 + $0x60c] ss:$16 sps:$4 sm:$0xff]   ;;  %v6752_v48 = vld [vmem:[#allocation8 + $0x608] ss:$16 sps:$4 sm:$0xff]  }
 0x242   :  { %4648 = vmatprep.mubr.bf16.mxu1 %v7775_v63  ;;  %4668 = vmatpush1.bf16.msra.mxu1 %v6680_v16  ;;  %v6695_v63 = vld [vmem:[#allocation8 + $0x4e0] ss:$16 sps:$4 sm:$0xff]  }
 0x243   :  { %4231 = vmatprep.subr.bf16.mxu0 %v6685_v15  ;;  %4669 = vmatprep.subr.bf16.mxu1 %v6688_v61  ;;  %v6749_v16 = vld [vmem:[#allocation8 + $0x600] ss:$16 sps:$4 sm:$0xff]   ;;  %v6757_v15 = vld [vmem:[#allocation8 + $0x624] ss:$16 sps:$4 sm:$0xff]   ;;  %v6760_v61 = vld [vmem:[#allocation8 + $0x62c] ss:$16 sps:$4 sm:$0xff]  }
 0x245   :  { %4232 = vmatpush1.bf16.msra.mxu0 %v6683_v1  ;;  %v6755_v1 = vld [vmem:[#allocation8 + $0x620] ss:$16 sps:$4 sm:$0xff]  }
 0x246   :  { %4670 = vmatpush1.bf16.msra.mxu1 %v6686_v60  ;;  %4233 = vmatprep.subr.bf16.mxu0 %v6691_v45  ;;  %v6758_v60 = vld [vmem:[#allocation8 + $0x628] ss:$16 sps:$4 sm:$0xff]   ;;  %v6763_v45 = vld [vmem:[#allocation8 + $0x644] ss:$16 sps:$4 sm:$0xff]  }
 0x247   :  { %4671 = vmatprep.subr.bf16.mxu1 %v6694_v8  ;;  %v6766_v8 = vld [vmem:[#allocation8 + $0x64c] ss:$16 sps:$4 sm:$0xff]  }
 0x248   :  { %4211 = vmatmul.mubr.bf16.gmra.mrb[28].mxu0 %v7781_v12  ;;  %4649 = vmatmul.mubr.bf16.gmra.mrb[28].mxu1 %v7781_v12  ;;  %v6712_v12 = vld [vmem:[#allocation8 + $0x52c] ss:$16 sps:$4 sm:$0xff]  }
 0x249   :  { %4234 = vmatpush1.bf16.msra.mxu0 %v6689_v30  ;;  %4253 = vmatprep.mubr.bf16.mxu0 %v7802_v56  ;;  %v6761_v30 = vld [vmem:[#allocation8 + $0x640] ss:$16 sps:$4 sm:$0xff]  }
 0x24a   :  { %4672 = vmatpush1.bf16.msra.mxu1 %v6692_v6  ;;  %4691 = vmatprep.mubr.bf16.mxu1 %v7802_v56  ;;  %v6718_v56 = vld [vmem:[#allocation8 + $0x54c] ss:$16 sps:$4 sm:$0xff]   ;;  %v6764_v6 = vld [vmem:[#allocation8 + $0x648] ss:$16 sps:$4 sm:$0xff]  }
 0x24b   :  { %4235 = vmatprep.subr.bf16.mxu0 %v6697_v37  ;;  %4673 = vmatprep.subr.bf16.mxu1 %v6700_v0  ;;  %v6769_v37 = vld [vmem:[#allocation8 + $0x664] ss:$16 sps:$4 sm:$0xff]   ;;  %v6770_v0 = vld [vmem:[#allocation8 + $0x668] ss:$16 sps:$4 sm:$0xff]  }
 0x24d   :  { %4236 = vmatpush1.bf16.msra.mxu0 %v6695_v63  ;;  %v6775_v63 = vld [vmem:[#allocation8 + $0x684] ss:$16 sps:$4 sm:$0xff]  }
 0x24e   :  { %4674 = vmatpush1.bf16.msra.mxu1 %v6698_v31  ;;  %4237 = vmatprep.subr.bf16.mxu0 %v6703_v26  ;;  %v6778_v31 = vld [vmem:[#allocation8 + $0x68c] ss:$16 sps:$4 sm:$0xff]   ;;  %v6773_v26 = vld [vmem:[#allocation8 + $0x680] ss:$16 sps:$4 sm:$0xff]  }
 0x24f   :  { %4675 = vmatprep.subr.bf16.mxu1 %v6706_v58  ;;  %v6776_v58 = vld [vmem:[#allocation8 + $0x688] ss:$16 sps:$4 sm:$0xff]  }
 0x251   :  { %4238 = vmatpush1.bf16.msra.mxu0 %v6701_v3  ;;  %v6781_v3 = vld [vmem:[#allocation8 + $0x6a4] ss:$16 sps:$4 sm:$0xff]  }
 0x252   :  { %4676 = vmatpush1.bf16.msra.mxu1 %v6704_v7  ;;  %4239 = vmatprep.subr.bf16.mxu0 %v6709_v54  ;;  %v6782_v7 = vld [vmem:[#allocation8 + $0x6a8] ss:$16 sps:$4 sm:$0xff]   ;;  %v6787_v54 = vld [vmem:[#allocation8 + $0x6c4] ss:$16 sps:$4 sm:$0xff]  }
 0x253   :  { %4677 = vmatprep.subr.bf16.mxu1 %v6712_v12  ;;  %v6790_v12 = vld [vmem:[#allocation8 + $0x6cc] ss:$16 sps:$4 sm:$0xff]  }
 0x255   :  { %4240 = vmatpush1.bf16.msra.mxu0 %v6707_v11  ;;  %v6785_v11 = vld [vmem:[#allocation8 + $0x6c0] ss:$16 sps:$4 sm:$0xff]  }
 0x256   :  { %4678 = vmatpush1.bf16.msra.mxu1 %v6710_v18  ;;  %4241 = vmatprep.subr.bf16.mxu0 %v6715_v44  ;;  %v6788_v18 = vld [vmem:[#allocation8 + $0x6c8] ss:$16 sps:$4 sm:$0xff]   ;;  %v6793_v44 = vld [vmem:[#allocation8 + $0x6e4] ss:$16 sps:$4 sm:$0xff]  }
 0x257   :  { %4679 = vmatprep.subr.bf16.mxu1 %v6718_v56  ;;  %v6794_v56 = vld [vmem:[#allocation8 + $0x6e8] ss:$16 sps:$4 sm:$0xff]  }
 0x259   :  { %4242 = vmatpush1.bf16.msra.mxu0 %v6713_v2  ;;  %v6799_v2 = vld [vmem:[#allocation8 + $0x704] ss:$16 sps:$4 sm:$0xff]  }
 0x25a   :  { %4680 = vmatpush1.bf16.msra.mxu1 %v6716_v23  ;;  %4243 = vmatprep.subr.bf16.mxu0 %v6721_v5  ;;  %v6802_v23 = vld [vmem:[#allocation8 + $0x70c] ss:$16 sps:$4 sm:$0xff]   ;;  %v6797_v5 = vld [vmem:[#allocation8 + $0x700] ss:$16 sps:$4 sm:$0xff]  }
 0x25b   :  { %4681 = vmatprep.subr.bf16.mxu1 %v6724_v41  ;;  %v6800_v41 = vld [vmem:[#allocation8 + $0x708] ss:$16 sps:$4 sm:$0xff]  }
 0x25d   :  { %4244 = vmatpush1.bf16.msra.mxu0 %v6719_v52  ;;  %v6805_v52 = vld [vmem:[#allocation8 + $0x724] ss:$16 sps:$4 sm:$0xff]  }
 0x25e   :  { %4682 = vmatpush1.bf16.msra.mxu1 %v6722_v40  ;;  %4245 = vmatprep.subr.bf16.mxu0 %v6727_v27  ;;  %v6803_v40 = vld [vmem:[#allocation8 + $0x720] ss:$16 sps:$4 sm:$0xff]   ;;  %v6811_v27 = vld [vmem:[#allocation8 + $0x744] ss:$16 sps:$4 sm:$0xff]  }
 0x25f   :  { %4683 = vmatprep.subr.bf16.mxu1 %v6730_v10  ;;  %v6814_v10 = vld [vmem:[#allocation8 + $0x74c] ss:$16 sps:$4 sm:$0xff]  }
 0x261   :  { %4246 = vmatpush1.bf16.msra.mxu0 %v6725_v21  ;;  %v6809_v21 = vld [vmem:[#allocation8 + $0x740] ss:$16 sps:$4 sm:$0xff]  }
 0x262   :  { %4684 = vmatpush1.bf16.msra.mxu1 %v6728_v55  ;;  %4247 = vmatprep.subr.bf16.mxu0 %v6733_v14  ;;  %v6812_v55 = vld [vmem:[#allocation8 + $0x748] ss:$16 sps:$4 sm:$0xff]   ;;  %v6817_v14 = vld [vmem:[#allocation8 + $0x764] ss:$16 sps:$4 sm:$0xff]  }
 0x263   :  { %4685 = vmatprep.subr.bf16.mxu1 %v6736_v22  ;;  %v6820_v22 = vld [vmem:[#allocation8 + $0x76c] ss:$16 sps:$4 sm:$0xff]  }
 0x265   :  { %4248 = vmatpush1.bf16.msra.mxu0 %v6731_v17  ;;  %v6815_v17 = vld [vmem:[#allocation8 + $0x760] ss:$16 sps:$4 sm:$0xff]  }
 0x266   :  { %4686 = vmatpush1.bf16.msra.mxu1 %v6734_v32  ;;  %4249 = vmatprep.subr.bf16.mxu0 %v6739_v51  ;;  %v6818_v32 = vld [vmem:[#allocation8 + $0x768] ss:$16 sps:$4 sm:$0xff]   ;;  %v6823_v51 = vld [vmem:[#allocation8 + $0x784] ss:$16 sps:$4 sm:$0xff]  }
 0x267   :  { %4687 = vmatprep.subr.bf16.mxu1 %v6742_v59  ;;  %v6826_v59 = vld [vmem:[#allocation8 + $0x78c] ss:$16 sps:$4 sm:$0xff]  }
 0x269   :  { %4250 = vmatpush1.bf16.msra.mxu0 %v6737_v28  ;;  %v6821_v28 = vld [vmem:[#allocation8 + $0x780] ss:$16 sps:$4 sm:$0xff]  }
 0x26a   :  { %4688 = vmatpush1.bf16.msra.mxu1 %v6740_v9  ;;  %4251 = vmatprep.subr.bf16.mxu0 %v6745_v62  ;;  %v6824_v9 = vld [vmem:[#allocation8 + $0x788] ss:$16 sps:$4 sm:$0xff]   ;;  %v6829_v62 = vld [vmem:[#allocation8 + $0x7a4] ss:$16 sps:$4 sm:$0xff]  }
 0x26b   :  { %4689 = vmatprep.subr.bf16.mxu1 %v6748_v38  ;;  %v6832_v38 = vld [vmem:[#allocation8 + $0x7ac] ss:$16 sps:$4 sm:$0xff]  }
 0x26d   :  { %4252 = vmatpush1.bf16.msra.mxu0 %v6743_v25  ;;  %v6827_v25 = vld [vmem:[#allocation8 + $0x7a0] ss:$16 sps:$4 sm:$0xff]  }
 0x26e   :  { %4690 = vmatpush1.bf16.msra.mxu1 %v6746_v43  ;;  %4294 = vmatprep.subr.bf16.mxu0 %v6751_v46  ;;  %v6830_v43 = vld [vmem:[#allocation8 + $0x7a8] ss:$16 sps:$4 sm:$0xff]   ;;  %v6835_v46 = vld [vmem:[#allocation8 + $0x7c4] ss:$16 sps:$4 sm:$0xff]  }
 0x26f   :  { %4732 = vmatprep.subr.bf16.mxu1 %v6754_v36  ;;  %v6838_v36 = vld [vmem:[#allocation8 + $0x7cc] ss:$16 sps:$4 sm:$0xff]  }
 0x270   :  { %4254 = vmatmul.mubr.bf16.vlgmr.msra.gmra.mrb[16].mxu0 %v7809_v39 }
 0x271   :  { %4692 = vmatmul.mubr.bf16.vlgmr.msra.gmra.mrb[16].mxu1 %v7809_v39  ;;  %4263 = vmatprep.mubr.bf16.mxu0 %v7799_v20  ;;  %v6772_v39 = vld [vmem:[#allocation8 + $0x66c] ss:$16 sps:$4 sm:$0xff]  }
 0x272   :  { %4295 = vmatpush1.bf16.msra.mxu0 %v6749_v16  ;;  %4701 = vmatprep.mubr.bf16.mxu1 %v7799_v20  ;;  %v6767_v20 = vld [vmem:[#allocation8 + $0x660] ss:$16 sps:$4 sm:$0xff]  }
 0x273   :  { %4733 = vmatpush1.bf16.msra.mxu1 %v6752_v48  ;;  %4296 = vmatprep.subr.bf16.mxu0 %v6757_v15  ;;  %v6833_v16 = vld [vmem:[#allocation8 + $0x7c0] ss:$16 sps:$4 sm:$0xff]   ;;  %v6836_v48 = vld [vmem:[#allocation8 + $0x7c8] ss:$16 sps:$4 sm:$0xff]   ;;  %v6841_v15 = vld [vmem:[#allocation8 + $0x7e4] ss:$16 sps:$4 sm:$0xff]  }
 0x274   :  { %4734 = vmatprep.subr.bf16.mxu1 %v6760_v61  ;;  %v6844_v61 = vld [vmem:[#allocation8 + $0x7ec] ss:$16 sps:$4 sm:$0xff]  }
 0x276   :  { %4297 = vmatpush1.bf16.msra.mxu0 %v6755_v1  ;;  %v6839_v1 = vld [vmem:[#allocation8 + $0x7e0] ss:$16 sps:$4 sm:$0xff]  }
 0x277   :  { %4735 = vmatpush1.bf16.msra.mxu1 %v6758_v60  ;;  %4298 = vmatprep.subr.bf16.mxu0 %v6763_v45  ;;  %v6842_v60 = vld [vmem:[#allocation8 + $0x7e8] ss:$16 sps:$4 sm:$0xff]   ;;  %v6847_v45 = vld [vmem:[#allocation8 + $0x804] ss:$16 sps:$4 sm:$0xff]  }
 0x278   :  { %4264 = vmatmul.mubr.bf16.gmra.mrb[20].mxu0 %v7812_v49  ;;  %4736 = vmatprep.subr.bf16.mxu1 %v6766_v8  ;;  %v6850_v8 = vld [vmem:[#allocation8 + $0x80c] ss:$16 sps:$4 sm:$0xff]  }
 0x279   :  { %4702 = vmatmul.mubr.bf16.gmra.mrb[20].mxu1 %v7812_v49  ;;  %4273 = vmatprep.mubr.bf16.mxu0 %v7832_v35  ;;  %v6784_v49 = vld [vmem:[#allocation8 + $0x6ac] ss:$16 sps:$4 sm:$0xff]  }
 0x27a   :  { %4299 = vmatpush1.bf16.msra.mxu0 %v6761_v30  ;;  %4711 = vmatprep.mubr.bf16.mxu1 %v7832_v35  ;;  %v6779_v35 = vld [vmem:[#allocation8 + $0x6a0] ss:$16 sps:$4 sm:$0xff]  }
 0x27b   :  { %4737 = vmatpush1.bf16.msra.mxu1 %v6764_v6  ;;  %4300 = vmatprep.subr.bf16.mxu0 %v6769_v37  ;;  %v6845_v30 = vld [vmem:[#allocation8 + $0x800] ss:$16 sps:$4 sm:$0xff]   ;;  %v6848_v6 = vld [vmem:[#allocation8 + $0x808] ss:$16 sps:$4 sm:$0xff]   ;;  %v6853_v37 = vld [vmem:[#allocation8 + $0x824] ss:$16 sps:$4 sm:$0xff]  }
 0x27c   :  { %4738 = vmatprep.subr.bf16.mxu1 %v6772_v39  ;;  %v6856_v39 = vld [vmem:[#allocation8 + $0x82c] ss:$16 sps:$4 sm:$0xff]  }
 0x27e   :  { %4301 = vmatpush1.bf16.msra.mxu0 %v6767_v20  ;;  %v6851_v20 = vld [vmem:[#allocation8 + $0x820] ss:$16 sps:$4 sm:$0xff]  }
 0x27f   :  { %4739 = vmatpush1.bf16.msra.mxu1 %v6770_v0  ;;  %4302 = vmatprep.subr.bf16.mxu0 %v6775_v63  ;;  %v7944_v0 = vld [vmem:[#allocation2 + $0x48] sm:$0xff] }
 0x280   :  { %4274 = vmatmul.mubr.bf16.gmra.mrb[24].mxu0 %v7839_v4  ;;  %4740 = vmatprep.subr.bf16.mxu1 %v6778_v31  ;;  %v6854_v63 = vld [vmem:[#allocation8 + $0x828] ss:$16 sps:$4 sm:$0xff]   ;;  %v6859_v31 = vld [vmem:[#allocation8 + $0x844] ss:$16 sps:$4 sm:$0xff]  }
 0x281   :  { %4712 = vmatmul.mubr.bf16.gmra.mrb[24].mxu1 %v7839_v4  ;;  %4283 = vmatprep.mubr.bf16.mxu0 %v7842_v50  ;;  %v6796_v4 = vld [vmem:[#allocation8 + $0x6ec] ss:$16 sps:$4 sm:$0xff]  }
 0x282   :  { %4303 = vmatpush1.bf16.msra.mxu0 %v6773_v26  ;;  %4721 = vmatprep.mubr.bf16.mxu1 %v7842_v50  ;;  %v6791_v50 = vld [vmem:[#allocation8 + $0x6e0] ss:$16 sps:$4 sm:$0xff]   ;;  %v6862_v26 = vld [vmem:[#allocation8 + $0x84c] ss:$16 sps:$4 sm:$0xff]  }
 0x283   :  { %4741 = vmatpush1.bf16.msra.mxu1 %v6776_v58  ;;  %4304 = vmatprep.subr.bf16.mxu0 %v6781_v3  ;;  %v1092_v58 = vld [vmem:[#allocation2 + $0x28] sm:$0xff]  ;;  %v1267_v3 = vrot.slane %v7944_v0, 1 }
 0x284   :  { %4742 = vmatprep.subr.bf16.mxu1 %v6784_v49  ;;  %v6857_v49 = vld [vmem:[#allocation8 + $0x840] ss:$16 sps:$4 sm:$0xff]   ;;  %v6932_v0 = vld [vmem:[#allocation8 + $0x9c8] ss:$16 sps:$4 sm:$0xff]  }
 0x286   :  { %4305 = vmatpush1.bf16.msra.mxu0 %v6779_v35  ;;  %v6865_v35 = vld [vmem:[#allocation8 + $0x864] ss:$16 sps:$4 sm:$0xff]  }
 0x287   :  { %4743 = vmatpush1.bf16.msra.mxu1 %v6782_v7  ;;  %4306 = vmatprep.subr.bf16.mxu0 %v6787_v54  ;;  %v6868_v7 = vld [vmem:[#allocation8 + $0x86c] ss:$16 sps:$4 sm:$0xff]  }
 0x288   :  { %4284 = vmatmul.mubr.bf16.gmra.mrb[28].mxu0 %v7849_v19  ;;  %4744 = vmatprep.subr.bf16.mxu1 %v6790_v12  ;;  %v6863_v12 = vld [vmem:[#allocation8 + $0x860] ss:$16 sps:$4 sm:$0xff]  }
 0x289   :  { %4722 = vmatmul.mubr.bf16.gmra.mrb[28].mxu1 %v7849_v19  ;;  %4326 = vmatprep.mubr.bf16.mxu0 %v7866_v33  ;;  %v6808_v19 = vld [vmem:[#allocation8 + $0x72c] ss:$16 sps:$4 sm:$0xff]  }
 0x28a   :  { %4307 = vmatpush1.bf16.msra.mxu0 %v6785_v11  ;;  %4764 = vmatprep.mubr.bf16.mxu1 %v7866_v33  ;;  %v6806_v33 = vld [vmem:[#allocation8 + $0x728] ss:$16 sps:$4 sm:$0xff]  }
 0x28b   :  { %4745 = vmatpush1.bf16.msra.mxu1 %v6788_v18  ;;  %4308 = vmatprep.subr.bf16.mxu0 %v6793_v44  ;;  %v6866_v11 = vld [vmem:[#allocation8 + $0x868] ss:$16 sps:$4 sm:$0xff]   ;;  %v6871_v18 = vld [vmem:[#allocation8 + $0x884] ss:$16 sps:$4 sm:$0xff]   ;;  %v6874_v44 = vld [vmem:[#allocation8 + $0x88c] ss:$16 sps:$4 sm:$0xff]  }
 0x28c   :  { %4746 = vmatprep.subr.bf16.mxu1 %v6796_v4 }
 0x28e   :  { %4309 = vmatpush1.bf16.msra.mxu0 %v6791_v50  ;;  %v6869_v50 = vld [vmem:[#allocation8 + $0x880] ss:$16 sps:$4 sm:$0xff]  }
 0x28f   :  { %4747 = vmatpush1.bf16.msra.mxu1 %v6794_v56  ;;  %4310 = vmatprep.subr.bf16.mxu0 %v6799_v2  ;;  %v6877_v56 = vld [vmem:[#allocation8 + $0x8a4] ss:$16 sps:$4 sm:$0xff]   ;;  %v6880_v2 = vld [vmem:[#allocation8 + $0x8ac] ss:$16 sps:$4 sm:$0xff]  }
 0x290   :  { %4748 = vmatprep.subr.bf16.mxu1 %v6802_v23 }
 0x292   :  { %4311 = vmatpush1.bf16.msra.mxu0 %v6797_v5 }
 0x293   :  { %4749 = vmatpush1.bf16.msra.mxu1 %v6800_v41  ;;  %4312 = vmatprep.subr.bf16.mxu0 %v6805_v52  ;;  %v6878_v52 = vld [vmem:[#allocation8 + $0x8a8] ss:$16 sps:$4 sm:$0xff]  }
 0x294   :  { %4750 = vmatprep.subr.bf16.mxu1 %v6808_v19  ;;  %v6883_v19 = vld [vmem:[#allocation8 + $0x8c4] ss:$16 sps:$4 sm:$0xff]  }
 0x296   :  { %4313 = vmatpush1.bf16.msra.mxu0 %v6803_v40  ;;  %v6886_v40 = vld [vmem:[#allocation8 + $0x8cc] ss:$16 sps:$4 sm:$0xff]  }
 0x297   :  { %4751 = vmatpush1.bf16.msra.mxu1 %v6806_v33  ;;  %4314 = vmatprep.subr.bf16.mxu0 %v6811_v27  ;;  %v6881_v27 = vld [vmem:[#allocation8 + $0x8c0] ss:$16 sps:$4 sm:$0xff]  }
 0x298   :  { %4752 = vmatprep.subr.bf16.mxu1 %v6814_v10 }
 0x29a   :  { %4315 = vmatpush1.bf16.msra.mxu0 %v6809_v21  ;;  %v6889_v21 = vld [vmem:[#allocation8 + $0x8e4] ss:$16 sps:$4 sm:$0xff]  }
 0x29b   :  { %4753 = vmatpush1.bf16.msra.mxu1 %v6812_v55  ;;  %4316 = vmatprep.subr.bf16.mxu0 %v6817_v14  ;;  %v6892_v55 = vld [vmem:[#allocation8 + $0x8ec] ss:$16 sps:$4 sm:$0xff]   ;;  %v6887_v14 = vld [vmem:[#allocation8 + $0x8e0] ss:$16 sps:$4 sm:$0xff]  }
 0x29c   :  { %4754 = vmatprep.subr.bf16.mxu1 %v6820_v22  ;;  %v6890_v22 = vld [vmem:[#allocation8 + $0x8e8] ss:$16 sps:$4 sm:$0xff]  }
 0x29e   :  { %4317 = vmatpush1.bf16.msra.mxu0 %v6815_v17  ;;  %v6895_v17 = vld [vmem:[#allocation8 + $0x904] ss:$16 sps:$4 sm:$0xff]  }
 0x29f   :  { %4755 = vmatpush1.bf16.msra.mxu1 %v6818_v32  ;;  %4318 = vmatprep.subr.bf16.mxu0 %v6823_v51  ;;  %v6898_v32 = vld [vmem:[#allocation8 + $0x90c] ss:$16 sps:$4 sm:$0xff]   ;;  %v6893_v51 = vld [vmem:[#allocation8 + $0x900] ss:$16 sps:$4 sm:$0xff]  }
 0x2a0   :  { %4756 = vmatprep.subr.bf16.mxu1 %v6826_v59  ;;  %v6896_v59 = vld [vmem:[#allocation8 + $0x908] ss:$16 sps:$4 sm:$0xff]  }
 0x2a2   :  { %4319 = vmatpush1.bf16.msra.mxu0 %v6821_v28  ;;  %v6901_v28 = vld [vmem:[#allocation8 + $0x924] ss:$16 sps:$4 sm:$0xff]  }
 0x2a3   :  { %4757 = vmatpush1.bf16.msra.mxu1 %v6824_v9  ;;  %4320 = vmatprep.subr.bf16.mxu0 %v6829_v62  ;;  %v6904_v9 = vld [vmem:[#allocation8 + $0x92c] ss:$16 sps:$4 sm:$0xff]   ;;  %v6902_v62 = vld [vmem:[#allocation8 + $0x928] ss:$16 sps:$4 sm:$0xff]  }
 0x2a4   :  { %4758 = vmatprep.subr.bf16.mxu1 %v6832_v38  ;;  %v6907_v38 = vld [vmem:[#allocation8 + $0x944] ss:$16 sps:$4 sm:$0xff]  }
 0x2a6   :  { %4321 = vmatpush1.bf16.msra.mxu0 %v6827_v25  ;;  %v6910_v25 = vld [vmem:[#allocation8 + $0x94c] ss:$16 sps:$4 sm:$0xff]  }
 0x2a7   :  { %4759 = vmatpush1.bf16.msra.mxu1 %v6830_v43  ;;  %4322 = vmatprep.subr.bf16.mxu0 %v6835_v46  ;;  %v6905_v43 = vld [vmem:[#allocation8 + $0x940] ss:$16 sps:$4 sm:$0xff]   ;;  %v6908_v46 = vld [vmem:[#allocation8 + $0x948] ss:$16 sps:$4 sm:$0xff]  }
 0x2a8   :  { %4760 = vmatprep.subr.bf16.mxu1 %v6838_v36  ;;  %v6913_v36 = vld [vmem:[#allocation8 + $0x964] ss:$16 sps:$4 sm:$0xff]  }
 0x2aa   :  { %4323 = vmatpush1.bf16.msra.mxu0 %v6833_v16  ;;  %v6916_v16 = vld [vmem:[#allocation8 + $0x96c] ss:$16 sps:$4 sm:$0xff]  }
 0x2ab   :  { %4761 = vmatpush1.bf16.msra.mxu1 %v6836_v48  ;;  %4324 = vmatprep.subr.bf16.mxu0 %v6841_v15  ;;  %v6911_v48 = vld [vmem:[#allocation8 + $0x960] ss:$16 sps:$4 sm:$0xff]  }
 0x2ac   :  { %4762 = vmatprep.subr.bf16.mxu1 %v6844_v61  ;;  %v1095_v15 = vld [vmem:[#allocation2 + $0x40] sm:$0xff]  ;;  %v6914_v61 = vld [vmem:[#allocation8 + $0x968] ss:$16 sps:$4 sm:$0xff]  }
 0x2ae   :  { %4325 = vmatpush1.bf16.msra.mxu0 %v6839_v1  ;;  %v6919_v1 = vld [vmem:[#allocation8 + $0x984] ss:$16 sps:$4 sm:$0xff]  }
 0x2af   :  { %4763 = vmatpush1.bf16.msra.mxu1 %v6842_v60  ;;  %4367 = vmatprep.subr.bf16.mxu0 %v6847_v45  ;;  %v1100_v60 = vld [vmem:[#allocation2 + $0x68] sm:$0x1]  ;;  %v6922_v45 = vld [vmem:[#allocation8 + $0x98c] ss:$16 sps:$4 sm:$0xff]  }
 0x2b0   :  { %4805 = vmatprep.subr.bf16.mxu1 %v6850_v8  ;;  %v1091_v8 = vld [vmem:[#allocation2 + $0x20] sm:$0xff] }
 0x2b1   :  { %4327 = vmatmul.mubr.bf16.vlgmr.msra.gmra.mrb[16].mxu0 %v7885_v53 }
 0x2b2   :  { %4765 = vmatmul.mubr.bf16.vlgmr.msra.gmra.mrb[16].mxu1 %v7885_v53  ;;  %4336 = vmatprep.mubr.bf16.mxu0 %v7869_v57  ;;  %v6860_v53 = vld [vmem:[#allocation8 + $0x848] ss:$16 sps:$4 sm:$0xff]  }
 0x2b3   :  { %4368 = vmatpush1.bf16.msra.mxu0 %v6845_v30  ;;  %4774 = vmatprep.mubr.bf16.mxu1 %v7869_v57  ;;  %v1262_v57 = vrot.slane %v1092_v58, 1  ;;  %v1265_v30 = vrot.slane %v1095_v15, 1  ;;  %v6923_v58 = vld [vmem:[#allocation8 + $0x9a0] ss:$16 sps:$4 sm:$0xff]  }
 0x2b4   :  { %4806 = vmatpush1.bf16.msra.mxu1 %v6848_v6  ;;  %4369 = vmatprep.subr.bf16.mxu0 %v6853_v37  ;;  %v6917_v6 = vld [vmem:[#allocation8 + $0x980] ss:$16 sps:$4 sm:$0xff]   ;;  %v1275_v37 = vrot.slane %v1100_v60, 1 }
 0x2b5   :  { %4807 = vmatprep.subr.bf16.mxu1 %v6856_v39  ;;  %v1268_v54 = vsel %vm1260_vm10, %v1262_v57, %v1267_v3  ;;  %v1390_v5 = vshrl.u32 %v1262_v57, 16  ;;  %v6920_v39 = vld [vmem:[#allocation8 + $0x988] ss:$16 sps:$4 sm:$0xff]   ;;  %v6931_v57 = vld [vmem:[#allocation8 + $0x9c4] ss:$16 sps:$4 sm:$0xff]  }
 0x2b6   :  { %v1394_v4 = vshrl.u32 %v1268_v54, 16  ;;  %v1397_v41 = vshll.u32 %v1268_v54, 16  ;;  %v6934_v54 = vld [vmem:[#allocation8 + $0x9cc] ss:$16 sps:$4 sm:$0xff]   ;;  %v6947_v60 = vld [vmem:[#allocation8 + $0xa20] ss:$16 sps:$4 sm:$0xff]  }
 0x2b7   :  { %4370 = vmatpush1.bf16.msra.mxu0 %v6851_v20  ;;  %v1392_v10 = vrot.slane %v1390_v5, 7  ;;  %v6925_v20 = vld [vmem:[#allocation8 + $0x9a4] ss:$16 sps:$4 sm:$0xff]  }
 0x2b8   :  { %4808 = vmatpush1.bf16.msra.mxu1 %v6854_v63  ;;  %4371 = vmatprep.subr.bf16.mxu0 %v6859_v31  ;;  %v7955_v23 = vrot.slane %v1394_v4, 7  ;;  %v1261_v63 = vrot.slane %v1091_v8, 1  ;;  %v6928_v31 = vld [vmem:[#allocation8 + $0x9ac] ss:$16 sps:$4 sm:$0xff]   ;;  %v6929_v4 = vld [vmem:[#allocation8 + $0x9c0] ss:$16 sps:$4 sm:$0xff]  }
 0x2b9   :  { %4337 = vmatmul.mubr.bf16.gmra.mrb[20].mxu0 %v7879_v42  ;;  %4809 = vmatprep.subr.bf16.mxu1 %v6862_v26 }
 0x2ba   :  { %4775 = vmatmul.mubr.bf16.gmra.mrb[20].mxu1 %v7879_v42  ;;  %4346 = vmatprep.mubr.bf16.mxu0 %v7894_v29  ;;  %v6872_v42 = vld [vmem:[#allocation8 + $0x888] ss:$16 sps:$4 sm:$0xff]   ;;  %v1399_v33 = vor.u32 %v1397_v41, %v7955_v23  ;;  %v1266_v26 = vsel %vm1260_vm10, %v1261_v63, %v1265_v30  ;;  %v1112_v41 = vld [vmem:[#allocation2 + $0xe8] sm:$0x1] }
 0x2bb   :  { %4372 = vmatpush1.bf16.msra.mxu0 %v6857_v49  ;;  %4784 = vmatprep.mubr.bf16.mxu1 %v7894_v29  ;;  %v6875_v29 = vld [vmem:[#allocation8 + $0x8a0] ss:$16 sps:$4 sm:$0xff]   ;;  %v1276_v49 = vsel %vm1260_vm10, %v1267_v3, %v1275_v37  ;;  %v6940_v3 = vld [vmem:[#allocation8 + $0x9ec] ss:$16 sps:$4 sm:$0xff]   ;;  %v6955_v37 = vld [vmem:[#allocation8 + $0xa44] ss:$16 sps:$4 sm:$0xff]  }
 0x2bc   :  { %4810 = vmatpush1.bf16.msra.mxu1 %v6860_v53  ;;  %4373 = vmatprep.subr.bf16.mxu0 %v6865_v35  ;;  %v1099_v53 = vld [vmem:[#allocation2 + $0x60] sm:$0x1]  ;;  %v6926_v35 = vld [vmem:[#allocation8 + $0x9a8] ss:$16 sps:$4 sm:$0xff]  }
 0x2bd   :  { %4811 = vmatprep.subr.bf16.mxu1 %v6868_v7  ;;  %v1108_v7 = vld [vmem:[#allocation2 + $0xc8] sm:$0xff] }
 0x2bf   :  { %4374 = vmatpush1.bf16.msra.mxu0 %v6863_v12  ;;  %v1382_v12 = vshrl.u32 %v1266_v26, 16 }
 0x2c0   :  { %4812 = vmatpush1.bf16.msra.mxu1 %v6866_v11  ;;  %4375 = vmatprep.subr.bf16.mxu0 %v6871_v18  ;;  %v1478_v11 = vshrl.u32 %v1276_v49, 16  ;;  %v1273_v18 = vrot.slane %v1099_v53, 1  ;;  %v6953_v53 = vld [vmem:[#allocation8 + $0xa40] ss:$16 sps:$4 sm:$0xff]  }
 0x2c1   :  { %4347 = vmatmul.mubr.bf16.gmra.mrb[24].mxu0 %v7897_v24  ;;  %4813 = vmatprep.subr.bf16.mxu1 %v6874_v44  ;;  %v1104_v44 = vld [vmem:[#allocation2 + $0xa8] sm:$0xff] }
 0x2c2   :  { %4785 = vmatmul.mubr.bf16.gmra.mrb[24].mxu1 %v7897_v24  ;;  %4356 = vmatprep.mubr.bf16.mxu0 %v7900_v13  ;;  %v6884_v24 = vld [vmem:[#allocation8 + $0x8c8] ss:$16 sps:$4 sm:$0xff]   ;;  %v1274_v5 = vsel %vm1260_vm10, %v1265_v30, %v1273_v18 }
 0x2c3   :  { %4376 = vmatpush1.bf16.msra.mxu0 %v6869_v50  ;;  %4794 = vmatprep.mubr.bf16.mxu1 %v7900_v13  ;;  %v1400_v13 = vsel %vm1041_vm6, %v1392_v10, %v1399_v33  ;;  %v1287_v50 = vrot.slane %v1108_v7, 1  ;;  %v6938_v10 = vld [vmem:[#allocation8 + $0x9e8] ss:$16 sps:$4 sm:$0xff]   ;;  %v1473_v15 = vshll.u32 %v1274_v5, 16 }
 0x2c4   :  { %4814 = vmatpush1.bf16.msra.mxu1 %v6872_v42  ;;  %4377 = vmatprep.subr.bf16.mxu0 %v6877_v56  ;;  %v6937_v42 = vld [vmem:[#allocation8 + $0x9e4] ss:$16 sps:$4 sm:$0xff]   ;;  %v7968_v56 = vrot.slane %v1382_v12, 7  ;;  %v6956_v7 = vld [vmem:[#allocation8 + $0xa48] ss:$16 sps:$4 sm:$0xff]  }
 0x2c5   :  { %4815 = vmatprep.subr.bf16.mxu1 %v6880_v2  ;;  %v1282_v2 = vrot.slane %v1104_v44, 1  ;;  %v7986_v30 = vld [vmem:[#allocation2 + $0x58] sm:$0xff]  ;;  %v6964_v44 = vld [vmem:[#allocation8 + $0xa6c] ss:$16 sps:$4 sm:$0xff]  }
 0x2c7   :  { %4378 = vmatpush1.bf16.msra.mxu0 %v6875_v29  ;;  %v1480_v29 = vrot.slane %v1478_v11, 7  ;;  %v1288_v33 = vsel %vm1260_vm10, %v1282_v2, %v1287_v50 }
 0x2c8   :  { %4816 = vmatpush1.bf16.msra.mxu1 %v6878_v52  ;;  %4379 = vmatprep.subr.bf16.mxu0 %v6883_v19  ;;  %v6935_v52 = vld [vmem:[#allocation8 + $0x9e0] ss:$16 sps:$4 sm:$0xff]   ;;  %v1378_v19 = vshrl.u32 %v1261_v63, 16  ;;  %v1597_v8 = vshll.u32 %v1288_v33, 16 }
 0x2c9   :  { %4357 = vmatmul.mubr.bf16.gmra.mrb[28].mxu0 %v7904_v47  ;;  %4817 = vmatprep.subr.bf16.mxu1 %v6886_v40  ;;  %v1385_v40 = vshll.u32 %v1266_v26, 16 }
 0x2ca   :  { %4795 = vmatmul.mubr.bf16.gmra.mrb[28].mxu1 %v7904_v47  ;;  %4399 = vmatprep.mubr.bf16.mxu0 %v1400_v13  ;;  %v6899_v47 = vld [vmem:[#allocation8 + $0x920] ss:$16 sps:$4 sm:$0xff]  }
 0x2cb   :  { %4380 = vmatpush1.bf16.msra.mxu0 %v6881_v27  ;;  %4837 = vmatprep.mubr.bf16.mxu1 %v1400_v13  ;;  %v7972_v27 = vld [vmem:[#allocation2 + $0xc0] sm:$0xff]  ;;  %v1387_v13 = vor.u32 %v1385_v40, %v7968_v56 }
 0x2cc   :  { %4818 = vmatpush1.bf16.msra.mxu1 %v6884_v24  ;;  %4381 = vmatprep.subr.bf16.mxu0 %v6889_v21  ;;  %v6943_v24 = vld [vmem:[#allocation8 + $0xa04] ss:$16 sps:$4 sm:$0xff]   ;;  %v1481_v21 = vshll.u32 %v1276_v49, 16  ;;  %v1271_v49 = vrot.slane %v7986_v30, 1  ;;  %v7028_v30 = vld [vmem:[#allocation8 + $0xbc8] ss:$16 sps:$4 sm:$0xff]  }
 0x2cd   :  { %4819 = vmatprep.subr.bf16.mxu1 %v6892_v55  ;;  %v6946_v55 = vld [vmem:[#allocation8 + $0xa0c] ss:$16 sps:$4 sm:$0xff]  }
 0x2cf   :  { %4382 = vmatpush1.bf16.msra.mxu0 %v6887_v14  ;;  %v1470_v14 = vshrl.u32 %v1274_v5, 16 }
 0x2d0   :  { %4820 = vmatpush1.bf16.msra.mxu1 %v6890_v22  ;;  %4383 = vmatprep.subr.bf16.mxu0 %v6895_v17  ;;  %v7975_v22 = vld [vmem:[#allocation2 + $0xa0] sm:$0xff]  ;;  %v1483_v17 = vor.u32 %v1481_v21, %v1480_v29  ;;  %v6962_v29 = vld [vmem:[#allocation8 + $0xa68] ss:$16 sps:$4 sm:$0xff]  }
 0x2d1   :  { %4821 = vmatprep.subr.bf16.mxu1 %v6898_v32  ;;  %v1594_v32 = vshrl.u32 %v1288_v33, 16  ;;  %v6968_v21 = vld [vmem:[#allocation8 + $0xa88] ss:$16 sps:$4 sm:$0xff]  }
 0x2d3   :  { %4384 = vmatpush1.bf16.msra.mxu0 %v6893_v51  ;;  %v1285_v51 = vrot.slane %v7972_v27, 1 }
 0x2d4   :  { %4822 = vmatpush1.bf16.msra.mxu1 %v6896_v59  ;;  %4385 = vmatprep.subr.bf16.mxu0 %v6901_v28  ;;  %v1380_v59 = vrot.slane %v1378_v19, 7  ;;  %v1295_v28 = vrot.slane %v1112_v41, 1  ;;  %v6967_v41 = vld [vmem:[#allocation8 + $0xa84] ss:$16 sps:$4 sm:$0xff]   ;;  %v6970_v19 = vld [vmem:[#allocation8 + $0xa8c] ss:$16 sps:$4 sm:$0xff]  }
 0x2d5   :  { %4823 = vmatprep.subr.bf16.mxu1 %v6904_v9  ;;  %v6941_v9 = vld [vmem:[#allocation8 + $0xa00] ss:$16 sps:$4 sm:$0xff]  }
 0x2d7   :  { %4386 = vmatpush1.bf16.msra.mxu0 %v6899_v47  ;;  %v1281_v47 = vrot.slane %v7975_v22, 1  ;;  %v6976_v22 = vld [vmem:[#allocation8 + $0xaac] ss:$16 sps:$4 sm:$0xff]  }
 0x2d8   :  { %4824 = vmatpush1.bf16.msra.mxu1 %v6902_v62  ;;  %4387 = vmatprep.subr.bf16.mxu0 %v6907_v38  ;;  %v1388_v62 = vsel %vm1041_vm6, %v1380_v59, %v1387_v13  ;;  %v6944_v38 = vld [vmem:[#allocation8 + $0xa08] ss:$16 sps:$4 sm:$0xff]   ;;  %v6973_v13 = vld [vmem:[#allocation8 + $0xaa4] ss:$16 sps:$4 sm:$0xff]  }
 0x2d9   :  { %4825 = vmatprep.subr.bf16.mxu1 %v6910_v25  ;;  %v6949_v25 = vld [vmem:[#allocation8 + $0xa24] ss:$16 sps:$4 sm:$0xff]  }
 0x2db   :  { %4388 = vmatpush1.bf16.msra.mxu0 %v6905_v43  ;;  %v1472_v43 = vrot.slane %v1470_v14, 7 }
 0x2dc   :  { %4826 = vmatpush1.bf16.msra.mxu1 %v6908_v46  ;;  %4389 = vmatprep.subr.bf16.mxu0 %v6913_v36  ;;  %v1484_v46 = vsel %vm1041_vm6, %v7955_v23, %v1483_v17  ;;  %v6952_v36 = vld [vmem:[#allocation8 + $0xa2c] ss:$16 sps:$4 sm:$0xff]   ;;  %v6950_v23 = vld [vmem:[#allocation8 + $0xa28] ss:$16 sps:$4 sm:$0xff]  }
 0x2dd   :  { %4827 = vmatprep.subr.bf16.mxu1 %v6916_v16  ;;  %v7982_v16 = vrot.slane %v1594_v32, 7 }
 0x2df   :  { %4390 = vmatpush1.bf16.msra.mxu0 %v6911_v48  ;;  %v1286_v48 = vsel %vm1260_vm10, %v1281_v47, %v1285_v51  ;;  %v1599_v63 = vor.u32 %v1597_v8, %v7982_v16  ;;  %v6994_v8 = vld [vmem:[#allocation8 + $0xb0c] ss:$16 sps:$4 sm:$0xff]  }
 0x2e0   :  { %4828 = vmatpush1.bf16.msra.mxu1 %v6914_v61  ;;  %4391 = vmatprep.subr.bf16.mxu0 %v6919_v1  ;;  %v1296_v61 = vsel %vm1260_vm10, %v1287_v50, %v1295_v28  ;;  %v1111_v1 = vld [vmem:[#allocation2 + $0xe0] sm:$0x1] }
 0x2e1   :  { %4829 = vmatprep.subr.bf16.mxu1 %v6922_v45  ;;  %v1590_v45 = vshrl.u32 %v1282_v2, 16  ;;  %v1293_v26 = vrot.slane %v1111_v1, 1  ;;  %v1681_v2 = vshll.u32 %v1296_v61, 16  ;;  %v6983_v1 = vld [vmem:[#allocation8 + $0xae0] ss:$16 sps:$4 sm:$0xff]  }
 0x2e3   :  { %4392 = vmatpush1.bf16.msra.mxu0 %v6917_v6  ;;  %v1475_v6 = vor.u32 %v1473_v15, %v1472_v43  ;;  %v1294_v50 = vsel %vm1260_vm10, %v1285_v51, %v1293_v26  ;;  %v6971_v51 = vld [vmem:[#allocation8 + $0xaa0] ss:$16 sps:$4 sm:$0xff]   ;;  %v7006_v26 = vld [vmem:[#allocation8 + $0xb4c] ss:$16 sps:$4 sm:$0xff]  }
 0x2e4   :  { %4830 = vmatpush1.bf16.msra.mxu1 %v6920_v39  ;;  %4393 = vmatprep.subr.bf16.mxu0 %v6925_v20  ;;  %v1582_v39 = vshrl.u32 %v1286_v48, 16  ;;  %v6958_v20 = vld [vmem:[#allocation8 + $0xa4c] ss:$16 sps:$4 sm:$0xff]   ;;  %v1673_v32 = vshll.u32 %v1294_v50, 16  ;;  %v6977_v43 = vld [vmem:[#allocation8 + $0xac0] ss:$16 sps:$4 sm:$0xff]  }
 0x2e5   :  { %4831 = vmatprep.subr.bf16.mxu1 %v6928_v31  ;;  %v1678_v31 = vshrl.u32 %v1296_v61, 16  ;;  %v6988_v61 = vld [vmem:[#allocation8 + $0xaec] ss:$16 sps:$4 sm:$0xff]  }
 0x2e6   :  { %v1584_v12 = vrot.slane %v1582_v39, 7  ;;  %v7000_v39 = vld [vmem:[#allocation8 + $0xb2c] ss:$16 sps:$4 sm:$0xff]  }
 0x2e7   :  { %4394 = vmatpush1.bf16.msra.mxu0 %v6923_v58  ;;  %v1094_v58 = vld [vmem:[#allocation2 + $0x38] sm:$0xff] }
 0x2e8   :  { %4832 = vmatpush1.bf16.msra.mxu1 %v6926_v35  ;;  %4395 = vmatprep.subr.bf16.mxu0 %v6931_v57  ;;  %v1592_v35 = vrot.slane %v1590_v45, 7  ;;  %v1476_v57 = vsel %vm1041_vm6, %v7968_v56, %v1475_v6  ;;  %v1264_v11 = vrot.slane %v1094_v58, 1  ;;  %v6959_v56 = vld [vmem:[#allocation8 + $0xa60] ss:$16 sps:$4 sm:$0xff]   ;;  %v6991_v45 = vld [vmem:[#allocation8 + $0xb04] ss:$16 sps:$4 sm:$0xff]  }
 0x2e9   :  { %4833 = vmatprep.subr.bf16.mxu1 %v6934_v54  ;;  %v6961_v54 = vld [vmem:[#allocation8 + $0xa64] ss:$16 sps:$4 sm:$0xff]   ;;  %v6992_v6 = vld [vmem:[#allocation8 + $0xb08] ss:$16 sps:$4 sm:$0xff]   ;;  %v7001_v58 = vld [vmem:[#allocation8 + $0xb40] ss:$16 sps:$4 sm:$0xff]  }
 0x2ea   :  { %v1600_v18 = vsel %vm1041_vm6, %v1592_v35, %v1599_v63  ;;  %v1414_v59 = vshrl.u32 %v1264_v11, 16  ;;  %v6998_v63 = vld [vmem:[#allocation8 + $0xb28] ss:$16 sps:$4 sm:$0xff]   ;;  %v7009_v35 = vld [vmem:[#allocation8 + $0xb64] ss:$16 sps:$4 sm:$0xff]  }
 0x2eb   :  { %4396 = vmatpush1.bf16.msra.mxu0 %v6929_v4  ;;  %v1680_v4 = vrot.slane %v1678_v31, 7  ;;  %v7003_v31 = vld [vmem:[#allocation8 + $0xb44] ss:$16 sps:$4 sm:$0xff]  }
 0x2ec   :  { %4834 = vmatpush1.bf16.msra.mxu1 %v6932_v0  ;;  %4397 = vmatprep.subr.bf16.mxu0 %v6937_v42  ;;  %v1578_v0 = vshrl.u32 %v1281_v47, 16  ;;  %v1585_v42 = vshll.u32 %v1286_v48, 16  ;;  %v6985_v48 = vld [vmem:[#allocation8 + $0xae4] ss:$16 sps:$4 sm:$0xff]  }
 0x2ed   :  { %4835 = vmatprep.subr.bf16.mxu1 %v6940_v3  ;;  %v1272_v3 = vsel %vm1260_vm10, %v1264_v11, %v1271_v49  ;;  %v1683_v40 = vor.u32 %v1681_v2, %v1680_v4  ;;  %v7015_v11 = vld [vmem:[#allocation8 + $0xb84] ss:$16 sps:$4 sm:$0xff]   ;;  %v1093_v4 = vld [vmem:[#allocation2 + $0x30] sm:$0xff] }
 0x2ee   :  { %v1587_v5 = vor.u32 %v1585_v42, %v1584_v12  ;;  %v1418_v33 = vshrl.u32 %v1272_v3, 16  ;;  %v1580_v27 = vrot.slane %v1578_v0, 7  ;;  %v1421_v28 = vshll.u32 %v1272_v3, 16  ;;  %v7013_v0 = vld [vmem:[#allocation8 + $0xb80] ss:$16 sps:$4 sm:$0xff]  }
 0x2ef   :  { %4398 = vmatpush1.bf16.msra.mxu0 %v6935_v52  ;;  %v1670_v52 = vshrl.u32 %v1294_v50, 16  ;;  %v1684_v14 = vsel %vm1041_vm6, %v7982_v16, %v1683_v40  ;;  %v6980_v16 = vld [vmem:[#allocation8 + $0xac8] ss:$16 sps:$4 sm:$0xff]   ;;  %v1263_v2 = vrot.slane %v1093_v4, 1 }
 0x2f0   :  { %4836 = vmatpush1.bf16.msra.mxu1 %v6938_v10  ;;  %4440 = vmatprep.subr.bf16.mxu0 %v6943_v24  ;;  %v6965_v10 = vld [vmem:[#allocation8 + $0xa80] ss:$16 sps:$4 sm:$0xff]   ;;  %v1588_v24 = vsel %vm1041_vm6, %v1580_v27, %v1587_v5  ;;  %v8000_v17 = vrot.slane %v1418_v33, 7  ;;  %v7016_v3 = vld [vmem:[#allocation8 + $0xb88] ss:$16 sps:$4 sm:$0xff]  }
 0x2f1   :  { %4878 = vmatprep.subr.bf16.mxu1 %v6946_v55  ;;  %v1672_v55 = vrot.slane %v1670_v52, 7  ;;  %v7022_v40 = vld [vmem:[#allocation8 + $0xba8] ss:$16 sps:$4 sm:$0xff]   ;;  %v7027_v33 = vld [vmem:[#allocation8 + $0xbc4] ss:$16 sps:$4 sm:$0xff]  }
 0x2f2   :  { %4400 = vmatmul.mubr.bf16.vlgmr.msra.gmra.mrb[16].mxu0 %v1388_v62  ;;  %v1110_v27 = vld [vmem:[#allocation2 + $0xd8] sm:$0xff] }
 0x2f3   :  { %4838 = vmatmul.mubr.bf16.vlgmr.msra.gmra.mrb[16].mxu1 %v1388_v62  ;;  %4409 = vmatprep.mubr.bf16.mxu0 %v1484_v46  ;;  %v1675_v47 = vor.u32 %v1673_v32, %v1672_v55  ;;  %v6979_v62 = vld [vmem:[#allocation8 + $0xac4] ss:$16 sps:$4 sm:$0xff]  }
 0x2f4   :  { %4441 = vmatpush1.bf16.msra.mxu0 %v6941_v9  ;;  %4847 = vmatprep.mubr.bf16.mxu1 %v1484_v46  ;;  %v6974_v9 = vld [vmem:[#allocation8 + $0xaa8] ss:$16 sps:$4 sm:$0xff]   ;;  %v1416_v46 = vrot.slane %v1414_v59, 7  ;;  %v7033_v32 = vld [vmem:[#allocation8 + $0xbe4] ss:$16 sps:$4 sm:$0xff]  }
 0x2f5   :  { %4879 = vmatpush1.bf16.msra.mxu1 %v6944_v38  ;;  %4442 = vmatprep.subr.bf16.mxu0 %v6949_v25  ;;  %v6982_v38 = vld [vmem:[#allocation8 + $0xacc] ss:$16 sps:$4 sm:$0xff]   ;;  %v1423_v25 = vor.u32 %v1421_v28, %v8000_v17  ;;  %v1106_v55 = vld [vmem:[#allocation2 + $0xb8] sm:$0xff] }
 0x2f6   :  { %4880 = vmatprep.subr.bf16.mxu1 %v6952_v36  ;;  %v1676_v36 = vsel %vm1041_vm6, %v1584_v12, %v1675_v47  ;;  %v7010_v12 = vld [vmem:[#allocation8 + $0xb68] ss:$16 sps:$4 sm:$0xff]   ;;  %v1284_v59 = vrot.slane %v1106_v55, 1  ;;  %v7031_v47 = vld [vmem:[#allocation8 + $0xbe0] ss:$16 sps:$4 sm:$0xff]  }
 0x2f7   :  { %v1424_v15 = vsel %vm1041_vm6, %v1416_v46, %v1423_v25  ;;  %v7034_v46 = vld [vmem:[#allocation8 + $0xbe8] ss:$16 sps:$4 sm:$0xff]  }
 0x2f8   :  { %4443 = vmatpush1.bf16.msra.mxu0 %v6947_v60  ;;  %v6986_v60 = vld [vmem:[#allocation8 + $0xae8] ss:$16 sps:$4 sm:$0xff]  }
 0x2f9   :  { %4881 = vmatpush1.bf16.msra.mxu1 %v6950_v23  ;;  %4444 = vmatprep.subr.bf16.mxu0 %v6955_v37  ;;  %v6989_v23 = vld [vmem:[#allocation8 + $0xb00] ss:$16 sps:$4 sm:$0xff]   ;;  %v6997_v37 = vld [vmem:[#allocation8 + $0xb24] ss:$16 sps:$4 sm:$0xff]  }
 0x2fa   :  { %4410 = vmatmul.mubr.bf16.gmra.mrb[20].mxu0 %v1476_v57  ;;  %4882 = vmatprep.subr.bf16.mxu1 %v6958_v20  ;;  %v6995_v20 = vld [vmem:[#allocation8 + $0xb20] ss:$16 sps:$4 sm:$0xff]   ;;  %v7039_v55 = vld [vmem:[#allocation11 + $0xc0] sm:$0xff]  }
 0x2fb   :  { %4848 = vmatmul.mubr.bf16.gmra.mrb[20].mxu1 %v1476_v57  ;;  %4419 = vmatprep.mubr.bf16.mxu0 %v1600_v18  ;;  %v7012_v57 = vld [vmem:[#allocation8 + $0xb6c] ss:$16 sps:$4 sm:$0xff]  }
 0x2fc   :  { %4445 = vmatpush1.bf16.msra.mxu0 %v6953_v53  ;;  %4857 = vmatprep.mubr.bf16.mxu1 %v1600_v18  ;;  %v7004_v53 = vld [vmem:[#allocation8 + $0xb48] ss:$16 sps:$4 sm:$0xff]   ;;  %v1102_v18 = vld [vmem:[#allocation2 + $0x78] sm:$0x1] }
 0x2fd   :  { %4883 = vmatpush1.bf16.msra.mxu1 %v6956_v7  ;;  %4446 = vmatprep.subr.bf16.mxu0 %v6961_v54  ;;  %v7007_v7 = vld [vmem:[#allocation8 + $0xb60] ss:$16 sps:$4 sm:$0xff]   ;;  %v1279_v42 = vrot.slane %v1102_v18, 1 }
 0x2fe   :  { %4884 = vmatprep.subr.bf16.mxu1 %v6964_v44  ;;  %v1097_v54 = vld [vmem:[#allocation2 + $0x50] sm:$0xff] }
 0x2ff   :  { %v7018_v44 = vld [vmem:[#allocation8 + $0xb8c] ss:$16 sps:$4 sm:$0xff]   ;;  %v1269_v50 = vrot.slane %v1097_v54, 1  ;;  %v1280_v52 = vsel %vm1260_vm10, %v1271_v49, %v1279_v42 }
 0x300   :  { %4447 = vmatpush1.bf16.msra.mxu0 %v6959_v56  ;;  %v7021_v56 = vld [vmem:[#allocation8 + $0xba4] ss:$16 sps:$4 sm:$0xff]   ;;  %v7036_v49 = vld [vmem:[#allocation8 + $0xbec] ss:$16 sps:$4 sm:$0xff]  }
 0x301   :  { %4885 = vmatpush1.bf16.msra.mxu1 %v6962_v29  ;;  %4448 = vmatprep.subr.bf16.mxu0 %v6967_v41  ;;  %v7024_v29 = vld [vmem:[#allocation8 + $0xbac] ss:$16 sps:$4 sm:$0xff]   ;;  %v1270_v5 = vsel %vm1260_vm10, %v1263_v2, %v1269_v50  ;;  %v7019_v41 = vld [vmem:[#allocation8 + $0xba0] ss:$16 sps:$4 sm:$0xff]  }
 0x302   :  { %4420 = vmatmul.mubr.bf16.gmra.mrb[24].mxu0 %v1588_v24  ;;  %4886 = vmatprep.subr.bf16.mxu1 %v6970_v19  ;;  %v1101_v19 = vld [vmem:[#allocation2 + $0x70] sm:$0x1] }
 0x303   :  { %4858 = vmatmul.mubr.bf16.gmra.mrb[24].mxu1 %v1588_v24  ;;  %4429 = vmatprep.mubr.bf16.mxu0 %v1684_v14  ;;  %v1406_v24 = vshrl.u32 %v1270_v5, 16 }
 0x304   :  { %4449 = vmatpush1.bf16.msra.mxu0 %v6965_v10  ;;  %4867 = vmatprep.mubr.bf16.mxu1 %v1684_v14  ;;  %v7030_v10 = vld [vmem:[#allocation8 + $0xbcc] ss:$16 sps:$4 sm:$0xff]   ;;  %v7025_v14 = vld [vmem:[#allocation8 + $0xbc0] ss:$16 sps:$4 sm:$0xff]  }
 0x305   :  { %4887 = vmatpush1.bf16.msra.mxu1 %v6968_v21  ;;  %4450 = vmatprep.subr.bf16.mxu0 %v6973_v13  ;;  %v1494_v21 = vshrl.u32 %v1280_v52, 16  ;;  %v1277_v13 = vrot.slane %v1101_v19, 1 }
 0x306   :  { %4888 = vmatprep.subr.bf16.mxu1 %v6976_v22  ;;  %v1291_v22 = vrot.slane %v1110_v27, 1 }
 0x307   :  { %v1496_v28 = vrot.slane %v1494_v21, 7  ;;  %v7037_v21 = vld [vmem:[#allocation11 + $0x40] sm:$0xff]  }
 0x308   :  { %4451 = vmatpush1.bf16.msra.mxu0 %v6971_v51  ;;  %v1408_v51 = vrot.slane %v1406_v24, 7  ;;  %v1292_v25 = vsel %vm1260_vm10, %v1284_v59, %v1291_v22 }
 0x309   :  { %4889 = vmatpush1.bf16.msra.mxu1 %v6974_v9  ;;  %4452 = vmatprep.subr.bf16.mxu0 %v6979_v62  ;;  %v1278_v9 = vsel %vm1260_vm10, %v1269_v50, %v1277_v13  ;;  %v1402_v62 = vshrl.u32 %v1263_v2, 16  ;;  %v7038_v13 = vld [vmem:[#allocation11] sm:$0xff]  }
 0x30a   :  { %4430 = vmatmul.mubr.bf16.gmra.mrb[28].mxu0 %v1676_v36  ;;  %4890 = vmatprep.subr.bf16.mxu1 %v6982_v38  ;;  %v1409_v38 = vshll.u32 %v1270_v5, 16 }
 0x30b   :  { %4868 = vmatmul.mubr.bf16.gmra.mrb[28].mxu1 %v1676_v36  ;;  %4472 = vmatprep.mubr.bf16.mxu0 %v1424_v15  ;;  %v1497_v36 = vshll.u32 %v1280_v52, 16 }
 0x30c   :  { %4453 = vmatpush1.bf16.msra.mxu0 %v6977_v43  ;;  %4910 = vmatprep.mubr.bf16.mxu1 %v1424_v15  ;;  %v1109_v43 = vld [vmem:[#allocation2 + $0xd0] sm:$0xff]  ;;  %v1486_v15 = vshrl.u32 %v1278_v9, 16 }
 0x30d   :  { %4891 = vmatpush1.bf16.msra.mxu1 %v6980_v16  ;;  %4454 = vmatprep.subr.bf16.mxu0 %v6985_v48  ;;  %v1114_v16 = vld [vmem:[#allocation2 + $0xf8] sm:$0x1]  ;;  %v1411_v48 = vor.u32 %v1409_v38, %v1408_v51  ;;  %v7050_v38 = vld [vmem:[#allocation11 + $0x18] sm:$0xff]  }
 0x30e   :  { %4892 = vmatprep.subr.bf16.mxu1 %v6988_v61  ;;  %v1105_v61 = vld [vmem:[#allocation2 + $0xb0] sm:$0xff] }
 0x310   :  { %4455 = vmatpush1.bf16.msra.mxu0 %v6983_v1  ;;  %v1499_v1 = vor.u32 %v1497_v36, %v1496_v28  ;;  %v7046_v28 = vld [vmem:[#allocation11 + $0x10] sm:$0xff]   ;;  %v7054_v36 = vld [vmem:[#allocation11 + $0x20] sm:$0xff]  }
 0x311   :  { %4893 = vmatpush1.bf16.msra.mxu1 %v6986_v60  ;;  %4456 = vmatprep.subr.bf16.mxu0 %v6991_v45  ;;  %v1618_v60 = vshrl.u32 %v1292_v25, 16  ;;  %v1289_v45 = vrot.slane %v1109_v43, 1  ;;  %v7053_v43 = vld [vmem:[#allocation11 + $0x60] sm:$0xff]  }
 0x312   :  { %4894 = vmatprep.subr.bf16.mxu1 %v6994_v8  ;;  %v1404_v8 = vrot.slane %v1402_v62, 7  ;;  %v7051_v62 = vld [vmem:[#allocation11 + $0xd8] sm:$0xff]  }
 0x314   :  { %4457 = vmatpush1.bf16.msra.mxu0 %v6989_v23  ;;  %v1299_v23 = vrot.slane %v1114_v16, 1  ;;  %v7056_v16 = vld [vmem:[#allocation11 + $0xa0] sm:$0xff]  }
 0x315   :  { %4895 = vmatpush1.bf16.msra.mxu1 %v6992_v6  ;;  %4458 = vmatprep.subr.bf16.mxu0 %v6997_v37  ;;  %v1283_v6 = vrot.slane %v1105_v61, 1  ;;  %v1412_v37 = vsel %vm1041_vm6, %v1404_v8, %v1411_v48  ;;  %v7057_v48 = vld [vmem:[#allocation11 + $0x68] sm:$0xff]   ;;  %v7062_v8 = vld [vmem:[#allocation11 + $0x30] sm:$0xff]  }
 0x316   :  { %4896 = vmatprep.subr.bf16.mxu1 %v7000_v39  ;;  %v1488_v39 = vrot.slane %v1486_v15, 7  ;;  %v7059_v15 = vld [vmem:[#allocation11 + $0xe8] sm:$0xff]  }
 0x317   :  { %v7058_v61 = vld [vmem:[#allocation11 + $0x28] sm:$0xff]  }
 0x318   :  { %4459 = vmatpush1.bf16.msra.mxu0 %v6995_v20  ;;  %v1500_v20 = vsel %vm1041_vm6, %v8000_v17, %v1499_v1  ;;  %v7060_v1 = vld [vmem:[#allocation11 + $0xa8] sm:$0xff]  }
 0x319   :  { %4897 = vmatpush1.bf16.msra.mxu1 %v6998_v63  ;;  %4460 = vmatprep.subr.bf16.mxu0 %v7003_v31  ;;  %v1620_v63 = vrot.slane %v1618_v60, 7  ;;  %v1290_v31 = vsel %vm1260_vm10, %v1283_v6, %v1289_v45  ;;  %v7061_v60 = vld [vmem:[#allocation11 + $0x70] sm:$0xff]  }
 0x31a   :  { %4898 = vmatprep.subr.bf16.mxu1 %v7006_v26  ;;  %v1489_v26 = vshll.u32 %v1278_v9, 16  ;;  %v1606_v54 = vshrl.u32 %v1290_v31, 16  ;;  %v7048_v9 = vld [vmem:[#allocation11 + $0x90] sm:$0xff]  }
 0x31c   :  { %4461 = vmatpush1.bf16.msra.mxu0 %v7001_v58  ;;  %v1300_v58 = vsel %vm1260_vm10, %v1291_v22, %v1299_v23  ;;  %v1608_v4 = vrot.slane %v1606_v54, 7  ;;  %v7041_v22 = vld [vmem:[#allocation11 + $0x48] sm:$0xff]   ;;  %v7064_v23 = vld [vmem:[#allocation11 + $0xb0] sm:$0xff]  }
 0x31d   :  { %4899 = vmatpush1.bf16.msra.mxu1 %v7004_v53  ;;  %4462 = vmatprep.subr.bf16.mxu0 %v7009_v35  ;;  %v1113_v53 = vld [vmem:[#allocation2 + $0xf0] sm:$0x1]  ;;  %v1614_v35 = vshrl.u32 %v1284_v59, 16  ;;  %v1697_v2 = vshll.u32 %v1300_v58, 16  ;;  %v7047_v59 = vld [vmem:[#allocation11 + $0xd0] sm:$0xff]  }
 0x31e   :  { %4900 = vmatprep.subr.bf16.mxu1 %v7012_v57  ;;  %v1621_v57 = vshll.u32 %v1292_v25, 16  ;;  %v1297_v18 = vrot.slane %v1113_v53, 1  ;;  %v7052_v25 = vld [vmem:[#allocation11 + $0x98] sm:$0xff]   ;;  %v4992_v53 = vand.u32 1, %v7512_v34 }
 0x320   :  { %4463 = vmatpush1.bf16.msra.mxu0 %v7007_v7  ;;  %v1491_v7 = vor.u32 %v1489_v26, %v1488_v39  ;;  %v1298_v42 = vsel %vm1260_vm10, %v1289_v45, %v1297_v18  ;;  %v7063_v45 = vld [vmem:[#allocation11 + $0xf0] sm:$0xff]   ;;  %v7066_v39 = vld [vmem:[#allocation11 + $0x38] sm:$0xff]   ;;  %v8202_v26 = vsub.s32 0, %v7512_v34  ;;  %vm8042_vm11 = vcmp.eq.s32.totalorder %v4992_v53, 0 }
 0x321   :  { %4901 = vmatpush1.bf16.msra.mxu1 %v7010_v12  ;;  %4464 = vmatprep.subr.bf16.mxu0 %v7015_v11  ;;  %v1623_v12 = vor.u32 %v1621_v57, %v1620_v63  ;;  %v1694_v11 = vshrl.u32 %v1300_v58, 16  ;;  %v1686_v5 = vshrl.u32 %v1298_v42, 16  ;;  %v1689_v27 = vshll.u32 %v1298_v42, 16 }
 0x322   :  { %4902 = vmatprep.subr.bf16.mxu1 %v7018_v44  ;;  %v1616_v44 = vrot.slane %v1614_v35, 7  ;;  %v1492_v17 = vsel %vm1041_vm6, %v1408_v51, %v1491_v7  ;;  %v7045_v51 = vld [vmem:[#allocation11 + $0x50] sm:$0xff]   ;;  %v8203_v35 = vsub.s32 2, %v7512_v34  ;;  %v8204_v7 = vsub.s32 1, %v7512_v34 }
 0x324   :  { %4465 = vmatpush1.bf16.msra.mxu0 %v7013_v0  ;;  %v1624_v50 = vsel %vm1041_vm6, %v1616_v44, %v1623_v12  ;;  %v1696_v0 = vrot.slane %v1694_v11, 7  ;;  %v8205_v12 = vsub.s32 3, %v7512_v34 }
 0x325   :  { %4903 = vmatpush1.bf16.msra.mxu1 %v7016_v3  ;;  %4466 = vmatprep.subr.bf16.mxu0 %v7021_v56  ;;  %v1602_v3 = vshrl.u32 %v1283_v6, 16  ;;  %v1609_v56 = vshll.u32 %v1290_v31, 16  ;;  %v7065_v6 = vld [vmem:[#allocation11 + $0x78] sm:$0xff]   ;;  %v4985_v31 = vadd.s32 8, %v7512_v34 }
 0x326   :  { %4904 = vmatprep.subr.bf16.mxu1 %v7024_v29 }
 0x327   :  { %v1611_v29 = vor.u32 %v1609_v56, %v1608_v4  ;;  %v1604_v52 = vrot.slane %v1602_v3, 7  ;;  %v4999_v18 = vand.u32 1, %v4985_v31 }
 0x328   :  { %4467 = vmatpush1.bf16.msra.mxu0 %v7019_v41  ;;  %v1699_v41 = vor.u32 %v1697_v2, %v1696_v0  ;;  %v4986_v0 = vadd.s32 16, %v7512_v34 }
 0x329   :  { %4905 = vmatpush1.bf16.msra.mxu1 %v7022_v40  ;;  %4468 = vmatprep.subr.bf16.mxu0 %v7027_v33  ;;  %v1612_v19 = vsel %vm1041_vm6, %v1604_v52, %v1611_v29  ;;  %v1688_v40 = vrot.slane %v1686_v5, 7  ;;  %v4987_v5 = vadd.s32 24, %v7512_v34  ;;  %vm8051_vm12 = vcmp.eq.s32.totalorder %v4999_v18, 0 }
 0x32a   :  { %4906 = vmatprep.subr.bf16.mxu1 %v7030_v10  ;;  %v1700_v33 = vsel %vm1041_vm6, %v1620_v63, %v1699_v41  ;;  %v2133_v63 = vld [vmem:[#allocation9] sm:$0xf] }
 0x32b   :  { %v1691_v10 = vor.u32 %v1689_v27, %v1688_v40  ;;  %v8025_v58 = vrot.slane %v2133_v63, %v8202_v26  ;;  %v8030_v57 = vrot.slane %v2133_v63, %v8203_v35  ;;  %v8034_v54 = vrot.slane %v2133_v63, %v8204_v7 }
 0x32c   :  { %4469 = vmatpush1.bf16.msra.mxu0 %v7025_v14  ;;  %v7040_v14 = vld [vmem:[#allocation11 + $0x80] sm:$0xff]   ;;  %v8038_v11 = vrot.slane %v2133_v63, %v8205_v12 }
 0x32d   :  { %4907 = vmatpush1.bf16.msra.mxu1 %v7028_v30  ;;  %4470 = vmatprep.subr.bf16.mxu0 %v7033_v32  ;;  %v1692_v24 = vsel %vm1041_vm6, %v1608_v4, %v1691_v10  ;;  %v7042_v30 = vld [vmem:[#allocation11 + $0x8] sm:$0xff]  }
 0x32e   :  { %4908 = vmatprep.subr.bf16.mxu1 %v7036_v49  ;;  %v7043_v32 = vld [vmem:[#allocation11 + $0xc8] sm:$0xff]  }
 0x32f   :  { %v7044_v49 = vld [vmem:[#allocation11 + $0x88] sm:$0xff]  }
 0x330   :  { %4471 = vmatpush1.bf16.msra.mxu0 %v7031_v47  ;;  %v7049_v47 = vld [vmem:[#allocation11 + $0x58] sm:$0xff]  }
 0x331   :  { %4909 = vmatpush1.bf16.msra.mxu1 %v7034_v46  ;;  %6040 = vmatprep.subr.bf16.mxu0 %v7037_v21  ;;  %v7055_v46 = vld [vmem:[#allocation11 + $0xe0] sm:$0xff]  }
 0x332   :  { %6062 = vmatprep.subr.bf16.mxu1 %v7039_v55 }
 0x333   :  { %4473 = vmatmul.mubr.bf16.vlgmr.msra.gmra.mrb[16].mxu0 %v1412_v37 }
 0x334   :  { %4911 = vmatmul.mubr.bf16.vlgmr.msra.gmra.mrb[16].mxu1 %v1412_v37  ;;  %4482 = vmatprep.mubr.bf16.mxu0 %v1500_v20  ;;  %v7067_v37 = vld [vmem:[#allocation11 + $0xf8] sm:$0xff]  }
 0x335   :  { %4920 = vmatprep.mubr.bf16.mxu1 %v1500_v20  ;;  %6041 = vmatpush3.bf16.msra.mxu0 %v7038_v13  ;;  %v7068_v20 = vld [vmem:[#allocation11 + $0xb8] sm:$0xff]  }
 0x336   :  { %6063 = vmatpush3.bf16.msra.mxu1 %v7040_v14  ;;  %6042 = vmatprep.subr.bf16.mxu0 %v7041_v22 }
 0x337   :  { %6064 = vmatprep.subr.bf16.mxu1 %v7043_v32 }
 0x339   :  { %6043 = vmatpush3.bf16.msra.mxu0 %v7042_v30  ;;  %v5006_v30 = vand.u32 1, %v4986_v0 }
 0x33a   :  { %6065 = vmatpush3.bf16.msra.mxu1 %v7044_v49  ;;  %6044 = vmatprep.subr.bf16.mxu0 %v7045_v51 }
 0x33b   :  { %4483 = vmatmul.mubr.bf16.gmra.mrb[20].mxu0 %v1492_v17  ;;  %6066 = vmatprep.subr.bf16.mxu1 %v7047_v59  ;;  %v5013_v59 = vand.u32 1, %v4987_v5  ;;  %vm8075_vm13 = vcmp.eq.s32.totalorder %v5006_v30, 0 }
 0x33c   :  { %4921 = vmatmul.mubr.bf16.gmra.mrb[20].mxu1 %v1492_v17  ;;  %4492 = vmatprep.mubr.bf16.mxu0 %v1624_v50 }
 0x33d   :  { %4930 = vmatprep.mubr.bf16.mxu1 %v1624_v50  ;;  %6045 = vmatpush3.bf16.msra.mxu0 %v7046_v28  ;;  %vm8083_vm14 = vcmp.eq.s32.totalorder %v5013_v59, 0 }
 0x33e   :  { %6067 = vmatpush3.bf16.msra.mxu1 %v7048_v9  ;;  %6046 = vmatprep.subr.bf16.mxu0 %v7049_v47 }
 0x33f   :  { %6068 = vmatprep.subr.bf16.mxu1 %v7051_v62 }
 0x341   :  { %6047 = vmatpush3.bf16.msra.mxu0 %v7050_v38 }
 0x342   :  { %6069 = vmatpush3.bf16.msra.mxu1 %v7052_v25  ;;  %6048 = vmatprep.subr.bf16.mxu0 %v7053_v43 }
 0x343   :  { %4493 = vmatmul.mubr.bf16.gmra.mrb[24].mxu0 %v1612_v19  ;;  %6070 = vmatprep.subr.bf16.mxu1 %v7055_v46 }
 0x344   :  { %4931 = vmatmul.mubr.bf16.gmra.mrb[24].mxu1 %v1612_v19  ;;  %4502 = vmatprep.mubr.bf16.mxu0 %v1700_v33 }
 0x345   :  { %4940 = vmatprep.mubr.bf16.mxu1 %v1700_v33  ;;  %6049 = vmatpush3.bf16.msra.mxu0 %v7054_v36 }
 0x346   :  { %6071 = vmatpush3.bf16.msra.mxu1 %v7056_v16  ;;  %6050 = vmatprep.subr.bf16.mxu0 %v7057_v48 }
 0x347   :  { %6072 = vmatprep.subr.bf16.mxu1 %v7059_v15 }
 0x349   :  { %6051 = vmatpush3.bf16.msra.mxu0 %v7058_v61 }
 0x34a   :  { %6073 = vmatpush3.bf16.msra.mxu1 %v7060_v1  ;;  %6052 = vmatprep.subr.bf16.mxu0 %v7061_v60 }
 0x34b   :  { %4503 = vmatmul.mubr.bf16.gmra.mrb[28].mxu0 %v1692_v24  ;;  %6074 = vmatprep.subr.bf16.mxu1 %v7063_v45 }
 0x34c   :  { %4941 = vmatmul.mubr.bf16.gmra.mrb[28].mxu1 %v1692_v24 }
 0x34d   :  { %6053 = vmatpush3.bf16.msra.mxu0 %v7062_v8 }
 0x34e   :  { %6075 = vmatpush3.bf16.msra.mxu1 %v7064_v23  ;;  %6054 = vmatprep.subr.bf16.mxu0 %v7065_v6 }
 0x34f   :  { %6076 = vmatprep.subr.bf16.mxu1 %v7067_v37 }
 0x351   :  { %6055 = vmatpush3.bf16.msra.mxu0 %v7066_v39 }
 0x352   :  { %6077 = vmatpush3.bf16.msra.mxu1 %v7068_v20 }
 0x406   :  { %v4474_v44 = vpop.f32.mrb[16].mxu0 }
 0x407   :  { %v6116_v17 = vadd.f32 %v4474_v44, %v8025_v58  ;;  %v4912_v4 = vpop.f32.mrb[16].mxu1  ;;  %v4476_v50 = vpop.f32.mrb[17].mxu0 }
 0x408   :  { %v6132_v3 = vadd.f32 %v4912_v4, %v8030_v57  ;;  %v6117_v56 = vadd.f32 %v4476_v50, %v8034_v54  ;;  %v4914_v2 = vpop.f32.mrb[17].mxu1  ;;  %v4478_v29 = vpop.f32.mrb[18].mxu0 }
 0x409   :  { %v4951_v41 = vmax.f32 %v6116_v17, 0.0  ;;  %v6133_v52 = vadd.f32 %v4914_v2, %v8038_v11  ;;  %v6118_v19 = vadd.f32 %v4478_v29, %v8025_v58  ;;  %v4916_v33 = vpop.f32.mrb[18].mxu1  ;;  %v4480_v27 = vpop.f32.mrb[19].mxu0 }
 0x40a   :  { %v4953_v10 = vmax.f32 %v6132_v3, 0.0  ;;  %v4952_v24 = vmax.f32 %v6117_v56, 0.0  ;;  %v6134_v21 = vadd.f32 %v4916_v33, %v8030_v57  ;;  %v6119_v13 = vadd.f32 %v4480_v27, %v8034_v54  ;;  %v4918_v55 = vpop.f32.mrb[19].mxu1 }
 0x40b   :  { %v4954_v14 = vmax.f32 %v6133_v52, 0.0  ;;  %v4955_v34 = vmax.f32 %v6118_v19, 0.0  ;;  %v6135_v22 = vadd.f32 %v4918_v55, %v8038_v11  ;;  %v5040_v32 = vsel %vm8042_vm11, %v4951_v41, 0.0 }
 0x40c   :  { %v4957_v49 = vmax.f32 %v6134_v21, 0.0  ;;  %v4956_v51 = vmax.f32 %v6119_v13, 0.0  ;;  %v5042_v28 = vsel %vm8042_vm11, %v4953_v10, 0.0  ;;  %v5041_v9 = vsel %vm8042_vm11, %v4952_v24, 0.0 }
 0x40d   :  { %v5044_v47 = vsel %vm8051_vm12, %v4955_v34, 0.0  ;;  %v4958_v62 = vmax.f32 %v6135_v22, 0.0  ;;  %v5043_v38 = vsel %vm8042_vm11, %v4954_v14, 0.0 }
 0x40e   :  { %v5072_v25 = vadd.f32 %v5044_v47, %v5040_v32  ;;  %v5046_v43 = vsel %vm8051_vm12, %v4957_v49, 0.0  ;;  %v5045_v46 = vsel %vm8051_vm12, %v4956_v51, 0.0  ;;  %v4484_v36 = vpop.f32.mrb[20].mxu0 }
 0x40f   :  { %v5090_v16 = vadd.f32 %v5046_v43, %v5042_v28  ;;  %v5081_v48 = vadd.f32 %v5045_v46, %v5041_v9  ;;  %v5047_v15 = vsel %vm8051_vm12, %v4958_v62, 0.0  ;;  %v6120_v61 = vadd.f32 %v4484_v36, %v8025_v58  ;;  %v4922_v1 = vpop.f32.mrb[20].mxu1  ;;  %v4486_v60 = vpop.f32.mrb[21].mxu0 }
 0x410   :  { %v5099_v45 = vadd.f32 %v5047_v15, %v5043_v38  ;;  %v6136_v23 = vadd.f32 %v4922_v1, %v8030_v57  ;;  %v6121_v6 = vadd.f32 %v4486_v60, %v8034_v54  ;;  %v4924_v37 = vpop.f32.mrb[21].mxu1  ;;  %v4488_v39 = vpop.f32.mrb[22].mxu0 }
 0x411   :  { %v4959_v20 = vmax.f32 %v6120_v61, 0.0  ;;  %v6137_v63 = vadd.f32 %v4924_v37, %v8038_v11  ;;  %v6122_v31 = vadd.f32 %v4488_v39, %v8025_v58  ;;  %v4926_v53 = vpop.f32.mrb[22].mxu1  ;;  %v4490_v35 = vpop.f32.mrb[23].mxu0 }
 0x412   :  { %v4961_v7 = vmax.f32 %v6136_v23, 0.0  ;;  %v4960_v12 = vmax.f32 %v6121_v6, 0.0  ;;  %v6138_v18 = vadd.f32 %v4926_v53, %v8030_v57  ;;  %v6123_v44 = vadd.f32 %v4490_v35, %v8034_v54  ;;  %v4928_v17 = vpop.f32.mrb[23].mxu1 }
 0x413   :  { %v5048_v4 = vsel %vm8075_vm13, %v4959_v20, 0.0  ;;  %v4962_v50 = vmax.f32 %v6137_v63, 0.0  ;;  %v4963_v0 = vmax.f32 %v6122_v31, 0.0  ;;  %v6139_v3 = vadd.f32 %v4928_v17, %v8038_v11 }
 0x414   :  { %v5073_v56 = vadd.f32 %v5072_v25, %v5048_v4  ;;  %v5050_v2 = vsel %vm8075_vm13, %v4961_v7, 0.0  ;;  %v5049_v29 = vsel %vm8075_vm13, %v4960_v12, 0.0  ;;  %v4965_v5 = vmax.f32 %v6138_v18, 0.0 }
 0x415   :  { %v5091_v41 = vadd.f32 %v5090_v16, %v5050_v2  ;;  %v5082_v52 = vadd.f32 %v5081_v48, %v5049_v29  ;;  %v5051_v19 = vsel %vm8075_vm13, %v4962_v50, 0.0  ;;  %v5052_v33 = vsel %vm8083_vm14, %v4963_v0, 0.0 }
 0x416   :  { %v5100_v27 = vadd.f32 %v5099_v45, %v5051_v19  ;;  %v5074_v10 = vadd.f32 %v5073_v56, %v5052_v33  ;;  %v5054_v24 = vsel %vm8083_vm14, %v4965_v5, 0.0  ;;  %v4964_v21 = vmax.f32 %v6123_v44, 0.0  ;;  %v4494_v13 = vpop.f32.mrb[24].mxu0 }
 0x417   :  { %v5092_v55 = vadd.f32 %v5091_v41, %v5054_v24  ;;  %v4966_v14 = vmax.f32 %v6139_v3, 0.0  ;;  %v4932_v34 = vpop.f32.mrb[24].mxu1  ;;  %v4496_v22 = vpop.f32.mrb[25].mxu0  ;;  %v6124_v28 = vadd.f32 %v4494_v13, %v8025_v58 }
 0x418   :  { %v5053_v30 = vsel %vm8083_vm14, %v4964_v21, 0.0  ;;  %v4934_v32 = vpop.f32.mrb[25].mxu1  ;;  %v4498_v49 = vpop.f32.mrb[26].mxu0  ;;  %v6140_v38 = vadd.f32 %v4932_v34, %v8030_v57  ;;  %v6125_v43 = vadd.f32 %v4496_v22, %v8034_v54  ;;  %v5075_v46 = vrot.slane %v5074_v10, 4 }
 0x419   :  { %v5083_v51 = vadd.f32 %v5082_v52, %v5053_v30  ;;  %v5055_v59 = vsel %vm8083_vm14, %v4966_v14, 0.0  ;;  %v4936_v9 = vpop.f32.mrb[26].mxu1  ;;  %v4500_v47 = vpop.f32.mrb[27].mxu0  ;;  %v5093_v36 = vrot.slane %v5092_v55, 4  ;;  %v4967_v48 = vmax.f32 %v6124_v28, 0.0 }
 0x41a   :  { %v5101_v62 = vadd.f32 %v5100_v27, %v5055_v59  ;;  %v4938_v25 = vpop.f32.mrb[27].mxu1  ;;  %v6126_v15 = vadd.f32 %v4498_v49, %v8025_v58  ;;  %v4969_v61 = vmax.f32 %v6140_v38, 0.0  ;;  %v6141_v1 = vadd.f32 %v4934_v32, %v8038_v11 }
 0x41b   :  { %v5084_v16 = vrot.slane %v5083_v51, 4  ;;  %v6142_v60 = vadd.f32 %v4936_v9, %v8030_v57  ;;  %v6127_v45 = vadd.f32 %v4500_v47, %v8034_v54  ;;  %v4968_v37 = vmax.f32 %v6125_v43, 0.0 }
 0x41c   :  { %v5102_v6 = vrot.slane %v5101_v62, 4  ;;  %v4971_v39 = vmax.f32 %v6126_v15, 0.0  ;;  %v5076_v31 = vadd.f32 %v5075_v46, %v5074_v10  ;;  %v5094_v53 = vadd.f32 %v5093_v36, %v5092_v55 }
 0x41d   :  { %v4973_v35 = vmax.f32 %v6142_v60, 0.0  ;;  %v4972_v7 = vmax.f32 %v6127_v45, 0.0  ;;  %v5085_v44 = vadd.f32 %v5084_v16, %v5083_v51  ;;  %v5056_v17 = vsel %vm8042_vm11, %v4967_v48, 0.0 }
 0x41e   :  { %v4504_v23 = vpop.f32.mrb[28].mxu0  ;;  %v5060_v4 = vsel %vm8051_vm12, %v4971_v39, 0.0  ;;  %v6143_v50 = vadd.f32 %v4938_v25, %v8038_v11  ;;  %v5058_v56 = vsel %vm8042_vm11, %v4969_v61, 0.0  ;;  %v4970_v2 = vmax.f32 %v6141_v1, 0.0 }
 0x41f   :  { %v4942_v20 = vpop.f32.mrb[28].mxu1  ;;  %v4506_v63 = vpop.f32.mrb[29].mxu0  ;;  %v5108_v29 = vadd.f32 %v5060_v4, %v5056_v17  ;;  %v5062_v5 = vsel %vm8051_vm12, %v4973_v35, 0.0  ;;  %v5103_v52 = vadd.f32 %v5102_v6, %v5101_v62  ;;  %v5057_v19 = vsel %vm8042_vm11, %v4968_v37, 0.0 }
 0x420   :  { %v4944_v12 = vpop.f32.mrb[29].mxu1  ;;  %v4508_v18 = vpop.f32.mrb[30].mxu0  ;;  %v5126_v33 = vadd.f32 %v5062_v5, %v5058_v56  ;;  %v5061_v27 = vsel %vm8051_vm12, %v4972_v7, 0.0  ;;  %v5077_v10 = vrot.slane %v5076_v31, 2  ;;  %v5095_v24 = vrot.slane %v5094_v53, 2 }
 0x421   :  { %v4946_v0 = vpop.f32.mrb[30].mxu1  ;;  %v4510_v3 = vpop.f32.mrb[31].mxu0  ;;  %v5117_v21 = vadd.f32 %v5061_v27, %v5057_v19  ;;  %v4974_v13 = vmax.f32 %v6143_v50, 0.0  ;;  %v5086_v55 = vrot.slane %v5085_v44, 2  ;;  %v6128_v14 = vadd.f32 %v4504_v23, %v8025_v58 }
 0x422   :  { %v4948_v41 = vpop.f32.mrb[31].mxu1  ;;  %v6144_v34 = vadd.f32 %v4942_v20, %v8030_v57  ;;  %v6129_v22 = vadd.f32 %v4506_v63, %v8034_v54  ;;  %v5059_v30 = vsel %vm8042_vm11, %v4970_v2, 0.0  ;;  %v6145_v49 = vadd.f32 %v4944_v12, %v8038_v11 }
 0x423   :  { %v5063_v32 = vsel %vm8051_vm12, %v4974_v13, 0.0  ;;  %v6130_v51 = vadd.f32 %v4508_v18, %v8025_v58  ;;  %v5104_v59 = vrot.slane %v5103_v52, 2  ;;  %v4975_v9 = vmax.f32 %v6128_v14, 0.0 }
 0x424   :  { %v5135_v28 = vadd.f32 %v5063_v32, %v5059_v30  ;;  %v4977_v47 = vmax.f32 %v6144_v34, 0.0  ;;  %v4976_v62 = vmax.f32 %v6129_v22, 0.0  ;;  %v4978_v38 = vmax.f32 %v6145_v49, 0.0 }
 0x425   :  { %v4979_v25 = vmax.f32 %v6130_v51, 0.0  ;;  %v6146_v43 = vadd.f32 %v4946_v0, %v8030_v57  ;;  %v5064_v42 = vsel %vm8075_vm13, %v4975_v9, 0.0  ;;  %v6131_v46 = vadd.f32 %v4510_v3, %v8034_v54 }
 0x426   :  { %v5066_v40 = vsel %vm8075_vm13, %v4977_v47, 0.0  ;;  %v6147_v36 = vadd.f32 %v4948_v41, %v8038_v11  ;;  %v5109_v58 = vadd.f32 %v5108_v29, %v5064_v42  ;;  %v5065_v48 = vsel %vm8075_vm13, %v4976_v62, 0.0 }
 0x427   :  { %v5127_v16 = vadd.f32 %v5126_v33, %v5066_v40  ;;  %v5067_v15 = vsel %vm8075_vm13, %v4978_v38, 0.0  ;;  %v5118_v61 = vadd.f32 %v5117_v21, %v5065_v48  ;;  %v5068_v1 = vsel %vm8083_vm14, %v4979_v25, 0.0 }
 0x428   :  { %v5136_v57 = vadd.f32 %v5135_v28, %v5067_v15  ;;  %v4981_v60 = vmax.f32 %v6146_v43, 0.0  ;;  %v5078_v45 = vadd.f32 %v5077_v10, %v5076_v31  ;;  %v5110_v23 = vadd.f32 %v5109_v58, %v5068_v1 }
 0x429   :  { %v4980_v6 = vmax.f32 %v6131_v46, 0.0  ;;  %v4982_v54 = vmax.f32 %v6147_v36, 0.0  ;;  %v5096_v37 = vadd.f32 %v5095_v24, %v5094_v53  ;;  %v5087_v35 = vadd.f32 %v5086_v55, %v5085_v44 }
 0x42a   :  { %v5070_v11 = vsel %vm8083_vm14, %v4981_v60, 0.0  ;;  %v5111_v39 = vrot.slane %v5110_v23, 4  ;;  %v5105_v7 = vadd.f32 %v5104_v59, %v5103_v52  ;;  %v5079_v31 = vrot.slane %v5078_v45, 1 }
 0x42b   :  { %v5128_v20 = vadd.f32 %v5127_v16, %v5070_v11  ;;  %v5069_v8 = vsel %vm8083_vm14, %v4980_v6, 0.0  ;;  %v5071_v63 = vsel %vm8083_vm14, %v4982_v54, 0.0  ;;  %v5097_v0 = vrot.slane %v5096_v37, 1 }
 0x42c   :  { %v5119_v12 = vadd.f32 %v5118_v61, %v5069_v8  ;;  %v5137_v18 = vadd.f32 %v5136_v57, %v5071_v63  ;;  %v5112_v17 = vadd.f32 %v5111_v39, %v5110_v23  ;;  %v5088_v2 = vrot.slane %v5087_v35, 1 }
 0x42d   :  { %v5129_v4 = vrot.slane %v5128_v20, 4  ;;  %v5106_v29 = vrot.slane %v5105_v7, 1  ;;  %v5080_v19 = vadd.f32 %v5079_v31, %v5078_v45  ;;  %v5098_v52 = vadd.f32 %v5097_v0, %v5096_v37 }
 0x42e   :  { %v5120_v50 = vrot.slane %v5119_v12, 4  ;;  %v5138_v53 = vrot.slane %v5137_v18, 4  ;;  %v5113_v3 = vrot.slane %v5112_v17, 2  ;;  %v5089_v55 = vadd.f32 %v5088_v2, %v5087_v35 }
 0x42f   :  { %v5130_v56 = vadd.f32 %v5129_v4, %v5128_v20  ;;  %v5107_v14 = vadd.f32 %v5106_v29, %v5105_v7  ;;  %v5144_v34 = vpack.c.bf16 %v5080_v19, %v5080_v19  ;;  %v5146_v51 = vpack.c.bf16 %v5098_v52, %v5098_v52  ;;  %v6007_v20 = vld [vmem:[#allocation12] ss:$0 sm:$0xff] }
 0x430   :  { %v5121_v5 = vadd.f32 %v5120_v50, %v5119_v12  ;;  %v5139_v41 = vadd.f32 %v5138_v53, %v5137_v18  ;;  %v5114_v33 = vadd.f32 %v5113_v3, %v5112_v17  ;;  %v5145_v47 = vpack.c.bf16 %v5089_v55, %v5089_v55 }
 0x431   :  { %v5131_v26 = vrot.slane %v5130_v56, 2  ;;  %v5147_v38 = vpack.c.bf16 %v5107_v14, %v5107_v14  ;;  %v5231_v25 = vunpack.c.l.b16 %v5144_v34  ;;  %v5233_v36 = vunpack.c.l.b16 %v5146_v51 }
 0x432   :  { %v5122_v27 = vrot.slane %v5121_v5, 2  ;;  %v5140_v44 = vrot.slane %v5139_v41, 2  ;;  %v5115_v10 = vrot.slane %v5114_v33, 1  ;;  %v5232_v48 = vunpack.c.l.b16 %v5145_v47 }
 0x433   :  { %v5132_v24 = vadd.f32 %v5131_v26, %v5130_v56  ;;  %v5234_v61 = vunpack.c.l.b16 %v5147_v38 }
 0x434   :  { %v5123_v21 = vadd.f32 %v5122_v27, %v5121_v5  ;;  %v5141_v13 = vadd.f32 %v5140_v44, %v5139_v41  ;;  %v5116_v22 = vadd.f32 %v5115_v10, %v5114_v33 }
 0x435   :  { %v5133_v30 = vrot.slane %v5132_v24, 1 }
 0x436   :  { %v5124_v32 = vrot.slane %v5123_v21, 1  ;;  %v5142_v49 = vrot.slane %v5141_v13, 1  ;;  %v5148_v59 = vpack.c.bf16 %v5116_v22, %v5116_v22 }
 0x437   :  { %v5134_v28 = vadd.f32 %v5133_v30, %v5132_v24 }
 0x438   :  { %v5125_v9 = vadd.f32 %v5124_v32, %v5123_v21  ;;  %v5143_v62 = vadd.f32 %v5142_v49, %v5141_v13  ;;  %v5235_v43 = vunpack.c.l.b16 %v5148_v59 }
 0x439   :  { %v5150_v42 = vpack.c.bf16 %v5134_v28, %v5134_v28 }
 0x43a   :  { %v5149_v40 = vpack.c.bf16 %v5125_v9, %v5125_v9  ;;  %v5151_v46 = vpack.c.bf16 %v5143_v62, %v5143_v62  ;;  %v5240_v16 = vsel %vm5239_vm15, %v5235_v43, %v5231_v25 }
 0x43b   :  { %v5237_v58 = vunpack.c.l.b16 %v5150_v42  ;;  %v5244_v54 = vpack.c.b16 %v5240_v16, %v5240_v16 }
 0x43c   :  { %v5236_v15 = vunpack.c.l.b16 %v5149_v40  ;;  %v5238_v57 = vunpack.c.l.b16 %v5151_v46 }
 0x43d   :  { %v5242_v1 = vsel %vm5239_vm15, %v5237_v58, %v5233_v36 }
 0x43e   :  { %v5241_v60 = vsel %vm5239_vm15, %v5236_v15, %v5232_v48  ;;  %v5243_v45 = vsel %vm5239_vm15, %v5238_v57, %v5234_v61  ;;  %v5246_v37 = vpack.c.b16 %v5242_v1, %v5242_v1 }
 0x43f   :  { %v5245_v23 = vpack.c.b16 %v5241_v60, %v5241_v60  ;;  %v5247_v6 = vpack.c.b16 %v5243_v45, %v5243_v45 }
 0x441   :  { %5476 = vmatprep.mubr.bf16.mxu0 %v5245_v23  ;;  %5516 = vmatprep.mubr.bf16.mxu1 %v5247_v6 }
 0x442   :  { %5477 = vmatmul.mubr.bf16.vlgmr.msra.gmra.mrb[32].mxu0 %v5244_v54  ;;  %5517 = vmatmul.mubr.bf16.vlgmr.msra.gmra.mrb[32].mxu1 %v5246_v37 }
 0x515   :  { %v6056_v11 = vpop.f32.mrb[32].mxu0  ;;  %v6078_v39 = vpop.f32.mrb[32].mxu1 }
 0x516   :  { %v6057_v8 = vpop.f32.mrb[33].mxu0  ;;  %v6079_v63 = vpop.f32.mrb[33].mxu1 }
 0x517   :  { %v6058_v35 = vadd.f32 %v6057_v8, %v6056_v11  ;;  %v6080_v7 = vadd.f32 %v6079_v63, %v6078_v39  ;;  %v6059_v12 = vpop.f32.mrb[34].mxu0  ;;  %v6081_v18 = vpop.f32.mrb[34].mxu1 }
 0x518   :  { %v6060_v31 = vpop.f32.mrb[35].mxu0  ;;  %v6082_v17 = vpop.f32.mrb[35].mxu1 }
 0x519   :  { %v5479_v4 = vadd.f32 %v6058_v35, %v6007_v20 }
 0x51b   :  { %v5519_v50 = vadd.f32 %v6080_v7, %v5479_v4 }
 0x51d   :  { %5524 = vst [vmem:[#allocation14] sm:$0x3] %v5519_v50 }
 0x51e   :  { %7212 = shalt.err (!%p7209_p10)
}
 0x51f   :  { %s7213_s2 = scalar_lea.hbm %s8177_s7, 32 }
 0x520   :  { %p7214_p11 = scmp.ne.s32.totalorder %s8177_s7, %s7213_s2  ;;  %p7217_p12 = scmp.lt.u32.totalorder %s7213_s2, %s8177_s7 }
 0x522   :  { %p7219_p13 = pnand %p7217_p12, %p7214_p11 }
 0x524   :  { %7222 = shalt.err (!%p7219_p13)
}
 0x525   :  { %5534 = dma.vmem_to_hbm [thread:$0]  %s5532_s19, 32, %s8177_s7, [#allocation5]  }
 0x526   :  { %7231 = dma.done.wait [#allocation5], 32  }
 0x527   :  { %7232 = vsyncadd [#allocation5], 4294967264 }
 0x528   :  { %5538 = vsyncpa [#allocation4], 1 }
 0x529   :  { %5539 = vsyncpa [#allocation7], 1 }
 0x52a   :  { %5540 = vsyncpa [#allocation10], 1 }
 0x52b   :  { %5541 = vsyncpa [#allocation13], 1 }
 0x52c   :  { %5542 = vsyncpa [#allocation5], 1 }

</bundles_post_ra>
